<compile_context>
chip_gen: v5e
topology: v5e:2x2
jax: 0.10.0
libtpu: 0.0.40
codegen_flags: <defaults>
</compile_context>

<pallas_src>
import math
from math import ceil

import jax
import jax.numpy as jnp
from jax.experimental import pallas as pl
from jax.experimental.pallas import tpu as pltpu

LN_EPS = 1e-5  # PyTorch nn.LayerNorm default eps

# ----------------------- model configuration (small, shape-consistent) ----------------
N_CHANNELS = 4                     # n_channels
INPLANES = N_CHANNELS * 4          # 16
PLANES1 = INPLANES * 2             # 32
LEN_FEATURE = 256                  # len_feature
D_MODEL = 16                       # d_model
GROUPS = 1                         # groups (AdaptiveAvgPool2d H-dim)
BATCH = 2
SEQ_LEN = 256                      # input length L

STEM_K, STEM_STRIDE, STEM_PAD = 64, 2, 3
BLK_K, BLK_PAD = 16, 1

F0 = ceil(LEN_FEATURE / 2)         # 128 (stem LN width)
LF0 = ceil(LEN_FEATURE / 4)        # 64  (layer-0 feature length)
LF1 = ceil(LEN_FEATURE / 8)        # 32  (layer-1 feature length)

PATCH_W = 128                      # lane-padded conv output length (128-lane dense)
XPAD_W = 256                       # padded-activation scratch width (>= 1 + LF0 + BLK_K + 128)


# =======================================================================================
# Fused Pallas kernel (one batch element per grid step)
# =======================================================================================
def _autoencoder_kernel(
        sp_ref,
        w0_ref, p0_ref, g0_ref, b0_ref, a1_ref,
        w11_ref, p11_ref, g11_ref, b11_ref,
        w12_ref, p12_ref, g12_ref, b12_ref,
        w21_ref, p21_ref, g21_ref, b21_ref,
        w22_ref, p22_ref, g22_ref, b22_ref,
        wds_ref, sds_ref, gds_ref, bds_ref,
        ph_ref,
        out_ref,
        xpad_ref, patch_ref):
    """stem conv -> adaptive pool -> LN -> ReLU -> AvgPool1d -> BasicBlock x2 -> head."""
    f32, bf16 = jnp.float32, jnp.bfloat16

    def ln(y, g_ref, b_ref):
        mu = jnp.mean(y, axis=-1, keepdims=True)
        var = jnp.mean(jnp.square(y - mu), axis=-1, keepdims=True)
        return (y - mu) * jax.lax.rsqrt(var + LN_EPS) * g_ref[...] + b_ref[...]

    def conv_pool(h, w_ref, p_ref):
        """Conv1d(K=16, pad=1) with (stride + AdaptiveAvgPool1d) folded into p_ref.

        h: (cin, length) f32 activation.  Only the pad columns of the xpad scratch
        are zeroed; im2col taps are copied as full 128-lane rows (unmasked stores)
        into the bf16 patch scratch; conv + pool are two bf16 MXU matmuls with f32
        accumulation.  Pool-matrix rows >= the valid conv length are zero, so the
        lane-padding tail contributes exactly 0.
        """
        cin, length = h.shape
        xpad_ref[0:cin, 0:1] = jnp.zeros((cin, 1), bf16)                       # left pad
        xpad_ref[0:cin, 1:1 + length] = h.astype(bf16)
        xpad_ref[0:cin, 1 + length:XPAD_W] = jnp.zeros(
            (cin, XPAD_W - 1 - length), bf16)                                  # right pad
        for k in range(BLK_K):                                                 # im2col
            patch_ref[k * cin:(k + 1) * cin, :] = xpad_ref[0:cin, k:k + PATCH_W]
        conv = jnp.dot(w_ref[...], patch_ref[0:BLK_K * cin, :],
                       preferred_element_type=f32)                             # (cout, 128)
        return jnp.dot(conv.astype(bf16), p_ref[...],
                       preferred_element_type=f32)                             # (cout, F)

    # ---- stem: Conv1d(K=64,s=2,p=3) -> AdaptiveAvgPool1d(128) -> LN -> ReLU
    #            -> AvgPool1d(3,2,1).  Stem im2col patch was precomputed on host.
    conv0 = jnp.dot(w0_ref[...], sp_ref[0], preferred_element_type=f32)        # (16, 128)
    h = jnp.dot(conv0.astype(bf16), p0_ref[...], preferred_element_type=f32)   # (16, 128)
    h = jnp.maximum(ln(h, g0_ref, b0_ref), 0.0)
    h = jnp.dot(h.astype(bf16), a1_ref[...], preferred_element_type=f32)       # (16, 64)

    # ---- layer 0 BasicBlock (stride 1, no downsample)
    identity = h
    h = jnp.maximum(ln(conv_pool(h, w11_ref, p11_ref), g11_ref, b11_ref), 0.0)
    h = ln(conv_pool(h, w12_ref, p12_ref), g12_ref, b12_ref)
    h = jnp.maximum(h + identity, 0.0)                                         # (16, 64)

    # ---- layer 1 BasicBlock (stride 2, 1x1-conv downsample + LN)
    identity = h
    h = jnp.maximum(ln(conv_pool(h, w21_ref, p21_ref), g21_ref, b21_ref), 0.0) # (32, 32)
    h = ln(conv_pool(h, w22_ref, p22_ref), g22_ref, b22_ref)                   # (32, 32)
    idsel = jnp.dot(identity.astype(bf16), sds_ref[...],
                    preferred_element_type=f32)                                # (16, 32)
    ids = jnp.dot(wds_ref[...], idsel.astype(bf16), preferred_element_type=f32)
    h = jnp.maximum(h + ln(ids, gds_ref, bds_ref), 0.0)                        # (32, 32)

    # ---- head: dropout2 (identity at inference) -> AdaptiveAvgPool2d((1, d_model))
    hp = jnp.dot(h.astype(bf16), ph_ref[...], preferred_element_type=f32)      # (32, 16)
    out_ref[0] = jnp.mean(hp, axis=0, keepdims=True)                           # (1, 16)


# =======================================================================================
# Wrapper-side constant matrices (layout prep, no hot compute)
# =======================================================================================
def _adaptive_pool_matrix(n_in, n_out):
    # PyTorch AdaptiveAvgPool1d: start=floor(i*in/out), end=ceil((i+1)*in/out)
    i = jnp.arange(n_out)
    starts = (i * n_in) // n_out
    ends = ((i + 1) * n_in + n_out - 1) // n_out
    j = jnp.arange(n_in)[:, None]
    mask = (j >= starts[None, :]) & (j < ends[None, :])
    counts = (ends - starts).astype(jnp.float32)
    return mask.astype(jnp.float32) / counts[None, :]                   # (n_in, n_out)


def _strided_pool_matrix(conv_len_s1, stride, n_out):
    # Fold a strided conv into the pooling matrix: rows of the stride-1 conv output
    # that the strided conv would produce carry the adaptive-pool weights, others 0.
    n_pos = (conv_len_s1 - 1) // stride + 1
    p = _adaptive_pool_matrix(n_pos, n_out)
    m = jnp.zeros((conv_len_s1, n_out), jnp.float32)
    return m.at[jnp.arange(n_pos) * stride].set(p)                      # (conv_len_s1, n_out)


def _avgpool1d_matrix(n_in, k=3, stride=2, pad=1):
    # nn.AvgPool1d(k, stride, pad) with count_include_pad=True
    n_out = (n_in + 2 * pad - k) // stride + 1
    taps = jnp.arange(n_out)[None, :] * stride - pad + jnp.arange(k)[:, None]
    j = jnp.arange(n_in)[:, None, None]
    hit = (j == taps[None, :, :]) & (taps[None, :, :] >= 0) & (taps[None, :, :] < n_in)
    return hit.sum(axis=1).astype(jnp.float32) / float(k)               # (n_in, n_out)


def _pad_rows(m, n_rows):
    return jnp.pad(m, ((0, n_rows - m.shape[0]), (0, 0)))


def _flat_w(w):
    # (Cout, Cin, K) -> (Cout, K*Cin) with column index k*Cin + ci (matches the
    # in-kernel im2col row order patch[k*cin + ci, :]).
    cout, cin, k = w.shape
    return jnp.transpose(w, (0, 2, 1)).reshape(cout, k * cin).astype(jnp.bfloat16)


def _stem_patch(x, n_lanes):
    # Pre-im2col of the stem conv (K=64, stride=2, pad=3): rows are k*Cin + ci,
    # columns are strided conv output positions, zero-padded to n_lanes so the
    # kernel-side matmul is 128-lane dense.
    b, c, l = x.shape
    n_out = (l + 2 * STEM_PAD - STEM_K) // STEM_STRIDE + 1              # 100
    idx = (jnp.arange(n_out)[None, :] * STEM_STRIDE - STEM_PAD
           + jnp.arange(STEM_K)[:, None])                               # (K, n_out)
    valid = (idx >= 0) & (idx < l)
    g = x[:, :, jnp.clip(idx, 0, l - 1)]                                # (B, C, K, n_out)
    g = jnp.where(valid[None, None], g, 0.0)
    g = jnp.transpose(g, (0, 2, 1, 3)).reshape(b, STEM_K * c, n_out)
    g = jnp.pad(g, ((0, 0), (0, 0), (0, n_lanes - n_out)))
    return g.astype(jnp.bfloat16)                                       # (B, 256, 128)


# =======================================================================================
# Pallas forward wrapper
# =======================================================================================
def autoencoder_forward(params, x):
    batch, cin, seq = x.shape
    assert (cin, seq) == (N_CHANNELS, SEQ_LEN)
    bf16 = jnp.bfloat16

    stem_out = (seq + 2 * STEM_PAD - STEM_K) // STEM_STRIDE + 1         # 100
    lc_blk = LF0 + 2 * BLK_PAD - BLK_K + 1                              # 51
    lc_l1c2 = LF1 + 2 * BLK_PAD - BLK_K + 1                             # 19

    l0, l1 = params["l0"], params["l1"]
    sel_ds = jnp.zeros((LF0, LF1), jnp.float32).at[
        jnp.arange(LF1) * 2, jnp.arange(LF1)].set(1.0)                  # stride-2 select

    ops = [
        _stem_patch(x, PATCH_W),                                                    # (B,256,128)
        _flat_w(params["stem_conv"]),                                               # (16, 256)
        _pad_rows(_adaptive_pool_matrix(stem_out, F0), PATCH_W).astype(bf16),       # (128, 128)
        params["stem_ln_g"].reshape(1, F0), params["stem_ln_b"].reshape(1, F0),
        _avgpool1d_matrix(F0, 3, 2, 1).astype(bf16),                                # (128, 64)
        _flat_w(l0["conv1"]),
        _pad_rows(_strided_pool_matrix(lc_blk, 1, LF0), PATCH_W).astype(bf16),
        l0["ln1_g"].reshape(1, LF0), l0["ln1_b"].reshape(1, LF0),
        _flat_w(l0["conv2"]),
        _pad_rows(_strided_pool_matrix(lc_blk, 1, LF0), PATCH_W).astype(bf16),
        l0["ln2_g"].reshape(1, LF0), l0["ln2_b"].reshape(1, LF0),
        _flat_w(l1["conv1"]),
        _pad_rows(_strided_pool_matrix(lc_blk, 2, LF1), PATCH_W).astype(bf16),
        l1["ln1_g"].reshape(1, LF1), l1["ln1_b"].reshape(1, LF1),
        _flat_w(l1["conv2"]),
        _pad_rows(_strided_pool_matrix(lc_l1c2, 1, LF1), PATCH_W).astype(bf16),
        l1["ln2_g"].reshape(1, LF1), l1["ln2_b"].reshape(1, LF1),
        l1["ds_conv"][:, :, 0].astype(bf16),                                        # (32, 16)
        sel_ds.astype(bf16),                                                        # (64, 32)
        l1["ds_ln_g"].reshape(1, LF1), l1["ds_ln_b"].reshape(1, LF1),
        _adaptive_pool_matrix(LF1, D_MODEL).astype(bf16),                           # (32, 16)
    ]

    # batched stem patch: one (256,128) block per grid step; everything else is a
    # shared constant (index_map returns the same block -> stays resident in VMEM).
    in_specs = [pl.BlockSpec((1,) + ops[0].shape[1:], lambda b: (b, 0, 0))]
    in_specs += [pl.BlockSpec(o.shape, lambda b: (0, 0)) for o in ops[1:]]

    flops = 2 * batch * (
        16 * 256 * 128 + 16 * 128 * 128 + 16 * 128 * 64        # stem conv + pools
        + 2 * (16 * 256 * 128 + 16 * 128 * 64)                 # layer0 convs + pools
        + 32 * 256 * 128 + 32 * 128 * 32                       # layer1 conv1 + pool
        + 32 * 512 * 128 + 32 * 128 * 32                       # layer1 conv2 + pool
        + 16 * 64 * 32 + 32 * 16 * 32 + 32 * 32 * 16)          # downsample + head
    bytes_accessed = (sum(int(o.size) * o.dtype.itemsize for o in ops)
                      + batch * GROUPS * D_MODEL * 4)
    cost = pl.CostEstimate(flops=flops, transcendentals=256 * batch,
                           bytes_accessed=bytes_accessed)

    out = pl.pallas_call(
        _autoencoder_kernel,
        out_shape=jax.ShapeDtypeStruct((batch, GROUPS, D_MODEL), jnp.float32),
        grid_spec=pltpu.PrefetchScalarGridSpec(
            num_scalar_prefetch=0,
            grid=(batch,),
            in_specs=in_specs,
            out_specs=pl.BlockSpec((1, GROUPS, D_MODEL), lambda b: (b, 0, 0)),
            scratch_shapes=[
                pltpu.VMEM((PLANES1, XPAD_W), jnp.bfloat16),           # padded activation
                pltpu.VMEM((BLK_K * PLANES1, PATCH_W), jnp.bfloat16),  # im2col patch
            ]),
        compiler_params=pltpu.CompilerParams(
            dimension_semantics=("parallel",),
            vmem_limit_bytes=32 * 1024 * 1024),
        cost_estimate=cost,
    )(*ops)
    return out                                                           # (B, 1, d_model)


# =======================================================================================
# Deterministic parameter init (Kaiming-normal convs, LN weight=1 / bias=0)
# =======================================================================================
def kaiming_conv(key, cout, cin, k):
    std = math.sqrt(2.0 / (cout * k))   # fan_out mode, relu gain
    return std * jax.random.normal(key, (cout, cin, k), dtype=jnp.float32)


def init_params(key):
    ks = jax.random.split(key, 6)
    c1 = INPLANES * 2
    return {
        "stem_conv": kaiming_conv(ks[0], INPLANES, N_CHANNELS, STEM_K),
        "stem_ln_g": jnp.ones((F0,), jnp.float32),
        "stem_ln_b": jnp.zeros((F0,), jnp.float32),
        "l0": {
            "conv1": kaiming_conv(ks[1], INPLANES, INPLANES, BLK_K),
            "ln1_g": jnp.ones((LF0,), jnp.float32), "ln1_b": jnp.zeros((LF0,), jnp.float32),
            "conv2": kaiming_conv(ks[2], INPLANES, INPLANES, BLK_K),
            "ln2_g": jnp.ones((LF0,), jnp.float32), "ln2_b": jnp.zeros((LF0,), jnp.float32),
        },
        "l1": {
            "conv1": kaiming_conv(ks[3], c1, INPLANES, BLK_K),
            "ln1_g": jnp.ones((LF1,), jnp.float32), "ln1_b": jnp.zeros((LF1,), jnp.float32),
            "conv2": kaiming_conv(ks[4], c1, c1, BLK_K),
            "ln2_g": jnp.ones((LF1,), jnp.float32), "ln2_b": jnp.zeros((LF1,), jnp.float32),
            "ds_conv": kaiming_conv(ks[5], c1, INPLANES, 1),
            "ds_ln_g": jnp.ones((LF1,), jnp.float32), "ds_ln_b": jnp.zeros((LF1,), jnp.float32),
        },
    }


# =======================================================================================
# Pure-JAX reference (textbook PyTorch mirror, HIGHEST precision) for correctness check
# =======================================================================================
def _reference_forward(params, x):
    hi = jax.lax.Precision.HIGHEST

    def conv1d(h, w, stride, pad):
        return jax.lax.conv_general_dilated(
            h, w, window_strides=(stride,), padding=[(pad, pad)],
            dimension_numbers=("NCH", "OIH", "NCH"), precision=hi)

    def apool(h, n_out):
        p = _adaptive_pool_matrix(h.shape[-1], n_out)
        return jnp.einsum("bcl,lf->bcf", h, p, precision=hi)

    def ln(h, g, b):
        mu = h.mean(-1, keepdims=True)
        var = jnp.square(h - mu).mean(-1, keepdims=True)
        return (h - mu) * jax.lax.rsqrt(var + LN_EPS) * g + b

    h = conv1d(x, params["stem_conv"], STEM_STRIDE, STEM_PAD)
    h = jnp.maximum(ln(apool(h, F0), params["stem_ln_g"], params["stem_ln_b"]), 0.0)
    h = jnp.einsum("bcl,lf->bcf", h, _avgpool1d_matrix(F0, 3, 2, 1), precision=hi)

    def block(h, bp, stride, lf):
        idn = h
        o = conv1d(h, bp["conv1"], stride, BLK_PAD)
        o = jnp.maximum(ln(apool(o, lf), bp["ln1_g"], bp["ln1_b"]), 0.0)
        o = conv1d(o, bp["conv2"], 1, BLK_PAD)
        o = ln(apool(o, lf), bp["ln2_g"], bp["ln2_b"])
        if "ds_conv" in bp:
            idn = ln(conv1d(h, bp["ds_conv"], stride, 0), bp["ds_ln_g"], bp["ds_ln_b"])
        return jnp.maximum(o + idn, 0.0)

    h = block(h, params["l0"], 1, LF0)
    h = block(h, params["l1"], 2, LF1)
    # dropout2: identity (inference)
    hm = h.mean(axis=1, keepdims=True)
    return jnp.einsum("bcl,ld->bcd", hm,
                      _adaptive_pool_matrix(h.shape[-1], D_MODEL), precision=hi)


# =======================================================================================
if __name__ == "__main__":
    key = jax.random.PRNGKey(0)
    pkey, xkey = jax.random.split(key)
    params = init_params(pkey)
    x = jax.random.normal(xkey, (BATCH, N_CHANNELS, SEQ_LEN), dtype=jnp.float32)

    fwd = jax.jit(lambda xx: autoencoder_forward(params, xx))
    y = jax.block_until_ready(fwd(x))

    assert y.shape == (BATCH, GROUPS, D_MODEL), y.shape
    assert bool(jnp.all(jnp.isfinite(y)))

    y_ref = jax.block_until_ready(jax.jit(lambda xx: _reference_forward(params, xx))(x))
    # bf16 MXU operands (f32 accumulation) checked against an all-f32 HIGHEST reference.
    max_diff = float(jnp.max(jnp.abs(y - y_ref)))
    assert max_diff < 5e-2, f"Pallas vs reference mismatch: {max_diff}"

    print("KERNEL_OK")
</pallas_src>

<mosaic_0001>
module attributes {stable_mosaic.version = 11 : i64} {
  func.func @_autoencoder_kernel(%arg0: i32, %arg1: memref<1x256x128xbf16, #tpu.memory_space<vmem>>, %arg2: memref<16x256xbf16, #tpu.memory_space<vmem>>, %arg3: memref<128x128xbf16, #tpu.memory_space<vmem>>, %arg4: memref<1x128xf32, #tpu.memory_space<vmem>>, %arg5: memref<1x128xf32, #tpu.memory_space<vmem>>, %arg6: memref<128x64xbf16, #tpu.memory_space<vmem>>, %arg7: memref<16x256xbf16, #tpu.memory_space<vmem>>, %arg8: memref<128x64xbf16, #tpu.memory_space<vmem>>, %arg9: memref<1x64xf32, #tpu.memory_space<vmem>>, %arg10: memref<1x64xf32, #tpu.memory_space<vmem>>, %arg11: memref<16x256xbf16, #tpu.memory_space<vmem>>, %arg12: memref<128x64xbf16, #tpu.memory_space<vmem>>, %arg13: memref<1x64xf32, #tpu.memory_space<vmem>>, %arg14: memref<1x64xf32, #tpu.memory_space<vmem>>, %arg15: memref<32x256xbf16, #tpu.memory_space<vmem>>, %arg16: memref<128x32xbf16, #tpu.memory_space<vmem>>, %arg17: memref<1x32xf32, #tpu.memory_space<vmem>>, %arg18: memref<1x32xf32, #tpu.memory_space<vmem>>, %arg19: memref<32x512xbf16, #tpu.memory_space<vmem>>, %arg20: memref<128x32xbf16, #tpu.memory_space<vmem>>, %arg21: memref<1x32xf32, #tpu.memory_space<vmem>>, %arg22: memref<1x32xf32, #tpu.memory_space<vmem>>, %arg23: memref<32x16xbf16, #tpu.memory_space<vmem>>, %arg24: memref<64x32xbf16, #tpu.memory_space<vmem>>, %arg25: memref<1x32xf32, #tpu.memory_space<vmem>>, %arg26: memref<1x32xf32, #tpu.memory_space<vmem>>, %arg27: memref<32x16xbf16, #tpu.memory_space<vmem>>, %arg28: memref<1x1x16xf32, #tpu.memory_space<vmem>>, %arg29: memref<32x256xbf16, #tpu.memory_space<vmem>>, %arg30: memref<512x128xbf16, #tpu.memory_space<vmem>>) attributes {dimension_semantics = [#tpu.dimension_semantics<parallel>], iteration_bounds = array<i64: 2>, scalar_prefetch = 0 : i64, scratch_operands = 2 : i64, tpu.core_type = #tpu.core_type<tc>, window_params = [{transform_indices = @transform_0, window_bounds = array<i64: 1, 256, 128>}, {pipeline_mode = #tpu.pipeline_mode<synchronous>, transform_indices = @transform_1, window_bounds = array<i64: 16, 256>}, {pipeline_mode = #tpu.pipeline_mode<synchronous>, transform_indices = @transform_2, window_bounds = array<i64: 128, 128>}, {pipeline_mode = #tpu.pipeline_mode<synchronous>, transform_indices = @transform_3, window_bounds = array<i64: 1, 128>}, {pipeline_mode = #tpu.pipeline_mode<synchronous>, transform_indices = @transform_4, window_bounds = array<i64: 1, 128>}, {pipeline_mode = #tpu.pipeline_mode<synchronous>, transform_indices = @transform_5, window_bounds = array<i64: 128, 64>}, {pipeline_mode = #tpu.pipeline_mode<synchronous>, transform_indices = @transform_6, window_bounds = array<i64: 16, 256>}, {pipeline_mode = #tpu.pipeline_mode<synchronous>, transform_indices = @transform_7, window_bounds = array<i64: 128, 64>}, {pipeline_mode = #tpu.pipeline_mode<synchronous>, transform_indices = @transform_8, window_bounds = array<i64: 1, 64>}, {pipeline_mode = #tpu.pipeline_mode<synchronous>, transform_indices = @transform_9, window_bounds = array<i64: 1, 64>}, {pipeline_mode = #tpu.pipeline_mode<synchronous>, transform_indices = @transform_10, window_bounds = array<i64: 16, 256>}, {pipeline_mode = #tpu.pipeline_mode<synchronous>, transform_indices = @transform_11, window_bounds = array<i64: 128, 64>}, {pipeline_mode = #tpu.pipeline_mode<synchronous>, transform_indices = @transform_12, window_bounds = array<i64: 1, 64>}, {pipeline_mode = #tpu.pipeline_mode<synchronous>, transform_indices = @transform_13, window_bounds = array<i64: 1, 64>}, {pipeline_mode = #tpu.pipeline_mode<synchronous>, transform_indices = @transform_14, window_bounds = array<i64: 32, 256>}, {pipeline_mode = #tpu.pipeline_mode<synchronous>, transform_indices = @transform_15, window_bounds = array<i64: 128, 32>}, {pipeline_mode = #tpu.pipeline_mode<synchronous>, transform_indices = @transform_16, window_bounds = array<i64: 1, 32>}, {pipeline_mode = #tpu.pipeline_mode<synchronous>, transform_indices = @transform_17, window_bounds = array<i64: 1, 32>}, {pipeline_mode = #tpu.pipeline_mode<synchronous>, transform_indices = @transform_18, window_bounds = array<i64: 32, 512>}, {pipeline_mode = #tpu.pipeline_mode<synchronous>, transform_indices = @transform_19, window_bounds = array<i64: 128, 32>}, {pipeline_mode = #tpu.pipeline_mode<synchronous>, transform_indices = @transform_20, window_bounds = array<i64: 1, 32>}, {pipeline_mode = #tpu.pipeline_mode<synchronous>, transform_indices = @transform_21, window_bounds = array<i64: 1, 32>}, {pipeline_mode = #tpu.pipeline_mode<synchronous>, transform_indices = @transform_22, window_bounds = array<i64: 32, 16>}, {pipeline_mode = #tpu.pipeline_mode<synchronous>, transform_indices = @transform_23, window_bounds = array<i64: 64, 32>}, {pipeline_mode = #tpu.pipeline_mode<synchronous>, transform_indices = @transform_24, window_bounds = array<i64: 1, 32>}, {pipeline_mode = #tpu.pipeline_mode<synchronous>, transform_indices = @transform_25, window_bounds = array<i64: 1, 32>}, {pipeline_mode = #tpu.pipeline_mode<synchronous>, transform_indices = @transform_26, window_bounds = array<i64: 32, 16>}, {transform_indices = @transform_27, window_bounds = array<i64: 1, 1, 16>}]} {
    %c0 = arith.constant 0 : index
    %c0_0 = arith.constant 0 : index
    %0 = vector.load %arg2[%c0, %c0_0] : memref<16x256xbf16, #tpu.memory_space<vmem>>, vector<16x256xbf16>
    %c0_1 = arith.constant 0 : index
    %c0_2 = arith.constant 0 : index
    %c0_3 = arith.constant 0 : index
    %1 = vector.load %arg1[%c0_1, %c0_2, %c0_3] : memref<1x256x128xbf16, #tpu.memory_space<vmem>>, vector<1x256x128xbf16>
    %2 = vector.shape_cast %1 : vector<1x256x128xbf16> to vector<256x128xbf16>
    %cst = arith.constant dense<0.000000e+00> : vector<16x128xf32>
    %3 = tpu.matmul %0, %2, %cst {dimension_numbers = #tpu.dot_dimension_numbers<[1], [0], [0], [1], [0, 0, 1, 1], [], []>} : vector<16x256xbf16>, vector<256x128xbf16>, vector<16x128xf32> -> vector<16x128xf32>
    %4 = arith.truncf %3 : vector<16x128xf32> to vector<16x128xbf16>
    %c0_4 = arith.constant 0 : index
    %c0_5 = arith.constant 0 : index
    %5 = vector.load %arg3[%c0_4, %c0_5] : memref<128x128xbf16, #tpu.memory_space<vmem>>, vector<128x128xbf16>
    %cst_6 = arith.constant dense<0.000000e+00> : vector<16x128xf32>
    %6 = tpu.matmul %4, %5, %cst_6 {dimension_numbers = #tpu.dot_dimension_numbers<[1], [0], [0], [1], [0, 0, 1, 1], [], []>} : vector<16x128xbf16>, vector<128x128xbf16>, vector<16x128xf32> -> vector<16x128xf32>
    %cst_7 = arith.constant dense<0.000000e+00> : vector<16xf32>
    %7 = vector.multi_reduction <add>, %6, %cst_7 [1] : vector<16x128xf32> to vector<16xf32>
    %8 = vector.shape_cast %7 : vector<16xf32> to vector<16x1xf32>
    %cst_8 = arith.constant 1.280000e+02 : f32
    %9 = vector.broadcast %cst_8 : f32 to vector<16x1xf32>
    %10 = arith.divf %8, %9 : vector<16x1xf32>
    %11 = vector.broadcast %10 : vector<16x1xf32> to vector<16x128xf32>
    %12 = arith.subf %6, %11 : vector<16x128xf32>
    %13 = arith.mulf %12, %12 : vector<16x128xf32>
    %cst_9 = arith.constant dense<0.000000e+00> : vector<16xf32>
    %14 = vector.multi_reduction <add>, %13, %cst_9 [1] : vector<16x128xf32> to vector<16xf32>
    %15 = vector.shape_cast %14 : vector<16xf32> to vector<16x1xf32>
    %cst_10 = arith.constant 1.280000e+02 : f32
    %16 = vector.broadcast %cst_10 : f32 to vector<16x1xf32>
    %17 = arith.divf %15, %16 : vector<16x1xf32>
    %18 = vector.broadcast %10 : vector<16x1xf32> to vector<16x128xf32>
    %19 = arith.subf %6, %18 : vector<16x128xf32>
    %cst_11 = arith.constant 9.99999974E-6 : f32
    %20 = vector.broadcast %cst_11 : f32 to vector<16x1xf32>
    %21 = arith.addf %17, %20 : vector<16x1xf32>
    %22 = math.rsqrt %21 : vector<16x1xf32>
    %23 = vector.broadcast %22 : vector<16x1xf32> to vector<16x128xf32>
    %24 = arith.mulf %19, %23 : vector<16x128xf32>
    %c0_12 = arith.constant 0 : index
    %c0_13 = arith.constant 0 : index
    %25 = vector.load %arg4[%c0_12, %c0_13] : memref<1x128xf32, #tpu.memory_space<vmem>>, vector<1x128xf32>
    %26 = vector.broadcast %25 : vector<1x128xf32> to vector<16x128xf32>
    %27 = arith.mulf %24, %26 : vector<16x128xf32>
    %c0_14 = arith.constant 0 : index
    %c0_15 = arith.constant 0 : index
    %28 = vector.load %arg5[%c0_14, %c0_15] : memref<1x128xf32, #tpu.memory_space<vmem>>, vector<1x128xf32>
    %29 = vector.broadcast %28 : vector<1x128xf32> to vector<16x128xf32>
    %30 = arith.addf %27, %29 : vector<16x128xf32>
    %cst_16 = arith.constant 0.000000e+00 : f32
    %31 = vector.broadcast %cst_16 : f32 to vector<16x128xf32>
    %32 = arith.maximumf %30, %31 : vector<16x128xf32>
    %33 = arith.truncf %32 : vector<16x128xf32> to vector<16x128xbf16>
    %c0_17 = arith.constant 0 : index
    %c0_18 = arith.constant 0 : index
    %34 = vector.load %arg6[%c0_17, %c0_18] : memref<128x64xbf16, #tpu.memory_space<vmem>>, vector<128x64xbf16>
    %cst_19 = arith.constant dense<0.000000e+00> : vector<16x64xf32>
    %35 = tpu.matmul %33, %34, %cst_19 {dimension_numbers = #tpu.dot_dimension_numbers<[1], [0], [0], [1], [0, 0, 1, 1], [], []>} : vector<16x128xbf16>, vector<128x64xbf16>, vector<16x64xf32> -> vector<16x64xf32>
    %cst_20 = arith.constant 0.000000e+00 : bf16
    %36 = vector.broadcast %cst_20 : bf16 to vector<16x1xbf16>
    %c0_21 = arith.constant 0 : index
    %c0_22 = arith.constant 0 : index
    %37 = vector.load %arg29[%c0_21, %c0_22] : memref<32x256xbf16, #tpu.memory_space<vmem>>, vector<16x1xbf16>
    tpu.vector_store %arg29[%c0_21, %c0_22], %36 {strides = array<i32>} : memref<32x256xbf16, #tpu.memory_space<vmem>>, vector<16x1xbf16>,
    %38 = arith.truncf %35 : vector<16x64xf32> to vector<16x64xbf16>
    %c0_23 = arith.constant 0 : index
    %c1 = arith.constant 1 : index
    %39 = vector.load %arg29[%c0_23, %c1] : memref<32x256xbf16, #tpu.memory_space<vmem>>, vector<16x64xbf16>
    tpu.vector_store %arg29[%c0_23, %c1], %38 {strides = array<i32>} : memref<32x256xbf16, #tpu.memory_space<vmem>>, vector<16x64xbf16>,
    %cst_24 = arith.constant 0.000000e+00 : bf16
    %40 = vector.broadcast %cst_24 : bf16 to vector<16x191xbf16>
    %c0_25 = arith.constant 0 : index
    %c65 = arith.constant 65 : index
    %41 = vector.load %arg29[%c0_25, %c65] : memref<32x256xbf16, #tpu.memory_space<vmem>>, vector<16x191xbf16>
    tpu.vector_store %arg29[%c0_25, %c65], %40 {strides = array<i32>} : memref<32x256xbf16, #tpu.memory_space<vmem>>, vector<16x191xbf16>,
    %c0_26 = arith.constant 0 : index
    %c0_27 = arith.constant 0 : index
    %42 = vector.load %arg29[%c0_26, %c0_27] : memref<32x256xbf16, #tpu.memory_space<vmem>>, vector<16x128xbf16>
    %c0_28 = arith.constant 0 : index
    %c0_29 = arith.constant 0 : index
    %43 = vector.load %arg30[%c0_28, %c0_29] : memref<512x128xbf16, #tpu.memory_space<vmem>>, vector<16x128xbf16>
    tpu.vector_store %arg30[%c0_28, %c0_29], %42 {strides = array<i32>} : memref<512x128xbf16, #tpu.memory_space<vmem>>, vector<16x128xbf16>,
    %c0_30 = arith.constant 0 : index
    %c1_31 = arith.constant 1 : index
    %44 = vector.load %arg29[%c0_30, %c1_31] : memref<32x256xbf16, #tpu.memory_space<vmem>>, vector<16x128xbf16>
    %c16 = arith.constant 16 : index
    %c0_32 = arith.constant 0 : index
    %45 = vector.load %arg30[%c16, %c0_32] : memref<512x128xbf16, #tpu.memory_space<vmem>>, vector<16x128xbf16>
    tpu.vector_store %arg30[%c16, %c0_32], %44 {strides = array<i32>} : memref<512x128xbf16, #tpu.memory_space<vmem>>, vector<16x128xbf16>,
    %c0_33 = arith.constant 0 : index
    %c2 = arith.constant 2 : index
    %46 = vector.load %arg29[%c0_33, %c2] : memref<32x256xbf16, #tpu.memory_space<vmem>>, vector<16x128xbf16>
    %c32 = arith.constant 32 : index
    %c0_34 = arith.constant 0 : index
    %47 = vector.load %arg30[%c32, %c0_34] : memref<512x128xbf16, #tpu.memory_space<vmem>>, vector<16x128xbf16>
    tpu.vector_store %arg30[%c32, %c0_34], %46 {strides = array<i32>} : memref<512x128xbf16, #tpu.memory_space<vmem>>, vector<16x128xbf16>,
    %c0_35 = arith.constant 0 : index
    %c3 = arith.constant 3 : index
    %48 = vector.load %arg29[%c0_35, %c3] : memref<32x256xbf16, #tpu.memory_space<vmem>>, vector<16x128xbf16>
    %c48 = arith.constant 48 : index
    %c0_36 = arith.constant 0 : index
    %49 = vector.load %arg30[%c48, %c0_36] : memref<512x128xbf16, #tpu.memory_space<vmem>>, vector<16x128xbf16>
    tpu.vector_store %arg30[%c48, %c0_36], %48 {strides = array<i32>} : memref<512x128xbf16, #tpu.memory_space<vmem>>, vector<16x128xbf16>,
    %c0_37 = arith.constant 0 : index
    %c4 = arith.constant 4 : index
    %50 = vector.load %arg29[%c0_37, %c4] : memref<32x256xbf16, #tpu.memory_space<vmem>>, vector<16x128xbf16>
    %c64 = arith.constant 64 : index
    %c0_38 = arith.constant 0 : index
    %51 = vector.load %arg30[%c64, %c0_38] : memref<512x128xbf16, #tpu.memory_space<vmem>>, vector<16x128xbf16>
    tpu.vector_store %arg30[%c64, %c0_38], %50 {strides = array<i32>} : memref<512x128xbf16, #tpu.memory_space<vmem>>, vector<16x128xbf16>,
    %c0_39 = arith.constant 0 : index
    %c5 = arith.constant 5 : index
    %52 = vector.load %arg29[%c0_39, %c5] : memref<32x256xbf16, #tpu.memory_space<vmem>>, vector<16x128xbf16>
    %c80 = arith.constant 80 : index
    %c0_40 = arith.constant 0 : index
    %53 = vector.load %arg30[%c80, %c0_40] : memref<512x128xbf16, #tpu.memory_space<vmem>>, vector<16x128xbf16>
    tpu.vector_store %arg30[%c80, %c0_40], %52 {strides = array<i32>} : memref<512x128xbf16, #tpu.memory_space<vmem>>, vector<16x128xbf16>,
    %c0_41 = arith.constant 0 : index
    %c6 = arith.constant 6 : index
    %54 = vector.load %arg29[%c0_41, %c6] : memref<32x256xbf16, #tpu.memory_space<vmem>>, vector<16x128xbf16>
    %c96 = arith.constant 96 : index
    %c0_42 = arith.constant 0 : index
    %55 = vector.load %arg30[%c96, %c0_42] : memref<512x128xbf16, #tpu.memory_space<vmem>>, vector<16x128xbf16>
    tpu.vector_store %arg30[%c96, %c0_42], %54 {strides = array<i32>} : memref<512x128xbf16, #tpu.memory_space<vmem>>, vector<16x128xbf16>,
    %c0_43 = arith.constant 0 : index
    %c7 = arith.constant 7 : index
    %56 = vector.load %arg29[%c0_43, %c7] : memref<32x256xbf16, #tpu.memory_space<vmem>>, vector<16x128xbf16>
    %c112 = arith.constant 112 : index
    %c0_44 = arith.constant 0 : index
    %57 = vector.load %arg30[%c112, %c0_44] : memref<512x128xbf16, #tpu.memory_space<vmem>>, vector<16x128xbf16>
    tpu.vector_store %arg30[%c112, %c0_44], %56 {strides = array<i32>} : memref<512x128xbf16, #tpu.memory_space<vmem>>, vector<16x128xbf16>,
    %c0_45 = arith.constant 0 : index
    %c8 = arith.constant 8 : index
    %58 = vector.load %arg29[%c0_45, %c8] : memref<32x256xbf16, #tpu.memory_space<vmem>>, vector<16x128xbf16>
    %c128 = arith.constant 128 : index
    %c0_46 = arith.constant 0 : index
    %59 = vector.load %arg30[%c128, %c0_46] : memref<512x128xbf16, #tpu.memory_space<vmem>>, vector<16x128xbf16>
    tpu.vector_store %arg30[%c128, %c0_46], %58 {strides = array<i32>} : memref<512x128xbf16, #tpu.memory_space<vmem>>, vector<16x128xbf16>,
    %c0_47 = arith.constant 0 : index
    %c9 = arith.constant 9 : index
    %60 = vector.load %arg29[%c0_47, %c9] : memref<32x256xbf16, #tpu.memory_space<vmem>>, vector<16x128xbf16>
    %c144 = arith.constant 144 : index
    %c0_48 = arith.constant 0 : index
    %61 = vector.load %arg30[%c144, %c0_48] : memref<512x128xbf16, #tpu.memory_space<vmem>>, vector<16x128xbf16>
    tpu.vector_store %arg30[%c144, %c0_48], %60 {strides = array<i32>} : memref<512x128xbf16, #tpu.memory_space<vmem>>, vector<16x128xbf16>,
    %c0_49 = arith.constant 0 : index
    %c10 = arith.constant 10 : index
    %62 = vector.load %arg29[%c0_49, %c10] : memref<32x256xbf16, #tpu.memory_space<vmem>>, vector<16x128xbf16>
    %c160 = arith.constant 160 : index
    %c0_50 = arith.constant 0 : index
    %63 = vector.load %arg30[%c160, %c0_50] : memref<512x128xbf16, #tpu.memory_space<vmem>>, vector<16x128xbf16>
    tpu.vector_store %arg30[%c160, %c0_50], %62 {strides = array<i32>} : memref<512x128xbf16, #tpu.memory_space<vmem>>, vector<16x128xbf16>,
    %c0_51 = arith.constant 0 : index
    %c11 = arith.constant 11 : index
    %64 = vector.load %arg29[%c0_51, %c11] : memref<32x256xbf16, #tpu.memory_space<vmem>>, vector<16x128xbf16>
    %c176 = arith.constant 176 : index
    %c0_52 = arith.constant 0 : index
    %65 = vector.load %arg30[%c176, %c0_52] : memref<512x128xbf16, #tpu.memory_space<vmem>>, vector<16x128xbf16>
    tpu.vector_store %arg30[%c176, %c0_52], %64 {strides = array<i32>} : memref<512x128xbf16, #tpu.memory_space<vmem>>, vector<16x128xbf16>,
    %c0_53 = arith.constant 0 : index
    %c12 = arith.constant 12 : index
    %66 = vector.load %arg29[%c0_53, %c12] : memref<32x256xbf16, #tpu.memory_space<vmem>>, vector<16x128xbf16>
    %c192 = arith.constant 192 : index
    %c0_54 = arith.constant 0 : index
    %67 = vector.load %arg30[%c192, %c0_54] : memref<512x128xbf16, #tpu.memory_space<vmem>>, vector<16x128xbf16>
    tpu.vector_store %arg30[%c192, %c0_54], %66 {strides = array<i32>} : memref<512x128xbf16, #tpu.memory_space<vmem>>, vector<16x128xbf16>,
    %c0_55 = arith.constant 0 : index
    %c13 = arith.constant 13 : index
    %68 = vector.load %arg29[%c0_55, %c13] : memref<32x256xbf16, #tpu.memory_space<vmem>>, vector<16x128xbf16>
    %c208 = arith.constant 208 : index
    %c0_56 = arith.constant 0 : index
    %69 = vector.load %arg30[%c208, %c0_56] : memref<512x128xbf16, #tpu.memory_space<vmem>>, vector<16x128xbf16>
    tpu.vector_store %arg30[%c208, %c0_56], %68 {strides = array<i32>} : memref<512x128xbf16, #tpu.memory_space<vmem>>, vector<16x128xbf16>,
    %c0_57 = arith.constant 0 : index
    %c14 = arith.constant 14 : index
    %70 = vector.load %arg29[%c0_57, %c14] : memref<32x256xbf16, #tpu.memory_space<vmem>>, vector<16x128xbf16>
    %c224 = arith.constant 224 : index
    %c0_58 = arith.constant 0 : index
    %71 = vector.load %arg30[%c224, %c0_58] : memref<512x128xbf16, #tpu.memory_space<vmem>>, vector<16x128xbf16>
    tpu.vector_store %arg30[%c224, %c0_58], %70 {strides = array<i32>} : memref<512x128xbf16, #tpu.memory_space<vmem>>, vector<16x128xbf16>,
    %c0_59 = arith.constant 0 : index
    %c15 = arith.constant 15 : index
    %72 = vector.load %arg29[%c0_59, %c15] : memref<32x256xbf16, #tpu.memory_space<vmem>>, vector<16x128xbf16>
    %c240 = arith.constant 240 : index
    %c0_60 = arith.constant 0 : index
    %73 = vector.load %arg30[%c240, %c0_60] : memref<512x128xbf16, #tpu.memory_space<vmem>>, vector<16x128xbf16>
    tpu.vector_store %arg30[%c240, %c0_60], %72 {strides = array<i32>} : memref<512x128xbf16, #tpu.memory_space<vmem>>, vector<16x128xbf16>,
    %c0_61 = arith.constant 0 : index
    %c0_62 = arith.constant 0 : index
    %74 = vector.load %arg7[%c0_61, %c0_62] : memref<16x256xbf16, #tpu.memory_space<vmem>>, vector<16x256xbf16>
    %c0_63 = arith.constant 0 : index
    %c0_64 = arith.constant 0 : index
    %75 = vector.load %arg30[%c0_63, %c0_64] : memref<512x128xbf16, #tpu.memory_space<vmem>>, vector<256x128xbf16>
    %cst_65 = arith.constant dense<0.000000e+00> : vector<16x128xf32>
    %76 = tpu.matmul %74, %75, %cst_65 {dimension_numbers = #tpu.dot_dimension_numbers<[1], [0], [0], [1], [0, 0, 1, 1], [], []>} : vector<16x256xbf16>, vector<256x128xbf16>, vector<16x128xf32> -> vector<16x128xf32>
    %77 = arith.truncf %76 : vector<16x128xf32> to vector<16x128xbf16>
    %c0_66 = arith.constant 0 : index
    %c0_67 = arith.constant 0 : index
    %78 = vector.load %arg8[%c0_66, %c0_67] : memref<128x64xbf16, #tpu.memory_space<vmem>>, vector<128x64xbf16>
    %cst_68 = arith.constant dense<0.000000e+00> : vector<16x64xf32>
    %79 = tpu.matmul %77, %78, %cst_68 {dimension_numbers = #tpu.dot_dimension_numbers<[1], [0], [0], [1], [0, 0, 1, 1], [], []>} : vector<16x128xbf16>, vector<128x64xbf16>, vector<16x64xf32> -> vector<16x64xf32>
    %cst_69 = arith.constant dense<0.000000e+00> : vector<16xf32>
    %80 = vector.multi_reduction <add>, %79, %cst_69 [1] : vector<16x64xf32> to vector<16xf32>
    %81 = vector.shape_cast %80 : vector<16xf32> to vector<16x1xf32>
    %cst_70 = arith.constant 6.400000e+01 : f32
    %82 = vector.broadcast %cst_70 : f32 to vector<16x1xf32>
    %83 = arith.divf %81, %82 : vector<16x1xf32>
    %84 = vector.broadcast %83 : vector<16x1xf32> to vector<16x64xf32>
    %85 = arith.subf %79, %84 : vector<16x64xf32>
    %86 = arith.mulf %85, %85 : vector<16x64xf32>
    %cst_71 = arith.constant dense<0.000000e+00> : vector<16xf32>
    %87 = vector.multi_reduction <add>, %86, %cst_71 [1] : vector<16x64xf32> to vector<16xf32>
    %88 = vector.shape_cast %87 : vector<16xf32> to vector<16x1xf32>
    %cst_72 = arith.constant 6.400000e+01 : f32
    %89 = vector.broadcast %cst_72 : f32 to vector<16x1xf32>
    %90 = arith.divf %88, %89 : vector<16x1xf32>
    %91 = vector.broadcast %83 : vector<16x1xf32> to vector<16x64xf32>
    %92 = arith.subf %79, %91 : vector<16x64xf32>
    %cst_73 = arith.constant 9.99999974E-6 : f32
    %93 = vector.broadcast %cst_73 : f32 to vector<16x1xf32>
    %94 = arith.addf %90, %93 : vector<16x1xf32>
    %95 = math.rsqrt %94 : vector<16x1xf32>
    %96 = vector.broadcast %95 : vector<16x1xf32> to vector<16x64xf32>
    %97 = arith.mulf %92, %96 : vector<16x64xf32>
    %c0_74 = arith.constant 0 : index
    %c0_75 = arith.constant 0 : index
    %98 = vector.load %arg9[%c0_74, %c0_75] : memref<1x64xf32, #tpu.memory_space<vmem>>, vector<1x64xf32>
    %99 = vector.broadcast %98 : vector<1x64xf32> to vector<16x64xf32>
    %100 = arith.mulf %97, %99 : vector<16x64xf32>
    %c0_76 = arith.constant 0 : index
    %c0_77 = arith.constant 0 : index
    %101 = vector.load %arg10[%c0_76, %c0_77] : memref<1x64xf32, #tpu.memory_space<vmem>>, vector<1x64xf32>
    %102 = vector.broadcast %101 : vector<1x64xf32> to vector<16x64xf32>
    %103 = arith.addf %100, %102 : vector<16x64xf32>
    %cst_78 = arith.constant 0.000000e+00 : f32
    %104 = vector.broadcast %cst_78 : f32 to vector<16x64xf32>
    %105 = arith.maximumf %103, %104 : vector<16x64xf32>
    %cst_79 = arith.constant 0.000000e+00 : bf16
    %106 = vector.broadcast %cst_79 : bf16 to vector<16x1xbf16>
    %c0_80 = arith.constant 0 : index
    %c0_81 = arith.constant 0 : index
    %107 = vector.load %arg29[%c0_80, %c0_81] : memref<32x256xbf16, #tpu.memory_space<vmem>>, vector<16x1xbf16>
    tpu.vector_store %arg29[%c0_80, %c0_81], %106 {strides = array<i32>} : memref<32x256xbf16, #tpu.memory_space<vmem>>, vector<16x1xbf16>,
    %108 = arith.truncf %105 : vector<16x64xf32> to vector<16x64xbf16>
    %c0_82 = arith.constant 0 : index
    %c1_83 = arith.constant 1 : index
    %109 = vector.load %arg29[%c0_82, %c1_83] : memref<32x256xbf16, #tpu.memory_space<vmem>>, vector<16x64xbf16>
    tpu.vector_store %arg29[%c0_82, %c1_83], %108 {strides = array<i32>} : memref<32x256xbf16, #tpu.memory_space<vmem>>, vector<16x64xbf16>,
    %cst_84 = arith.constant 0.000000e+00 : bf16
    %110 = vector.broadcast %cst_84 : bf16 to vector<16x191xbf16>
    %c0_85 = arith.constant 0 : index
    %c65_86 = arith.constant 65 : index
    %111 = vector.load %arg29[%c0_85, %c65_86] : memref<32x256xbf16, #tpu.memory_space<vmem>>, vector<16x191xbf16>
    tpu.vector_store %arg29[%c0_85, %c65_86], %110 {strides = array<i32>} : memref<32x256xbf16, #tpu.memory_space<vmem>>, vector<16x191xbf16>,
    %c0_87 = arith.constant 0 : index
    %c0_88 = arith.constant 0 : index
    %112 = vector.load %arg29[%c0_87, %c0_88] : memref<32x256xbf16, #tpu.memory_space<vmem>>, vector<16x128xbf16>
    %c0_89 = arith.constant 0 : index
    %c0_90 = arith.constant 0 : index
    %113 = vector.load %arg30[%c0_89, %c0_90] : memref<512x128xbf16, #tpu.memory_space<vmem>>, vector<16x128xbf16>
    tpu.vector_store %arg30[%c0_89, %c0_90], %112 {strides = array<i32>} : memref<512x128xbf16, #tpu.memory_space<vmem>>, vector<16x128xbf16>,
    %c0_91 = arith.constant 0 : index
    %c1_92 = arith.constant 1 : index
    %114 = vector.load %arg29[%c0_91, %c1_92] : memref<32x256xbf16, #tpu.memory_space<vmem>>, vector<16x128xbf16>
    %c16_93 = arith.constant 16 : index
    %c0_94 = arith.constant 0 : index
    %115 = vector.load %arg30[%c16_93, %c0_94] : memref<512x128xbf16, #tpu.memory_space<vmem>>, vector<16x128xbf16>
    tpu.vector_store %arg30[%c16_93, %c0_94], %114 {strides = array<i32>} : memref<512x128xbf16, #tpu.memory_space<vmem>>, vector<16x128xbf16>,
    %c0_95 = arith.constant 0 : index
    %c2_96 = arith.constant 2 : index
    %116 = vector.load %arg29[%c0_95, %c2_96] : memref<32x256xbf16, #tpu.memory_space<vmem>>, vector<16x128xbf16>
    %c32_97 = arith.constant 32 : index
    %c0_98 = arith.constant 0 : index
    %117 = vector.load %arg30[%c32_97, %c0_98] : memref<512x128xbf16, #tpu.memory_space<vmem>>, vector<16x128xbf16>
    tpu.vector_store %arg30[%c32_97, %c0_98], %116 {strides = array<i32>} : memref<512x128xbf16, #tpu.memory_space<vmem>>, vector<16x128xbf16>,
    %c0_99 = arith.constant 0 : index
    %c3_100 = arith.constant 3 : index
    %118 = vector.load %arg29[%c0_99, %c3_100] : memref<32x256xbf16, #tpu.memory_space<vmem>>, vector<16x128xbf16>
    %c48_101 = arith.constant 48 : index
    %c0_102 = arith.constant 0 : index
    %119 = vector.load %arg30[%c48_101, %c0_102] : memref<512x128xbf16, #tpu.memory_space<vmem>>, vector<16x128xbf16>
    tpu.vector_store %arg30[%c48_101, %c0_102], %118 {strides = array<i32>} : memref<512x128xbf16, #tpu.memory_space<vmem>>, vector<16x128xbf16>,
    %c0_103 = arith.constant 0 : index
    %c4_104 = arith.constant 4 : index
    %120 = vector.load %arg29[%c0_103, %c4_104] : memref<32x256xbf16, #tpu.memory_space<vmem>>, vector<16x128xbf16>
    %c64_105 = arith.constant 64 : index
    %c0_106 = arith.constant 0 : index
    %121 = vector.load %arg30[%c64_105, %c0_106] : memref<512x128xbf16, #tpu.memory_space<vmem>>, vector<16x128xbf16>
    tpu.vector_store %arg30[%c64_105, %c0_106], %120 {strides = array<i32>} : memref<512x128xbf16, #tpu.memory_space<vmem>>, vector<16x128xbf16>,
    %c0_107 = arith.constant 0 : index
    %c5_108 = arith.constant 5 : index
    %122 = vector.load %arg29[%c0_107, %c5_108] : memref<32x256xbf16, #tpu.memory_space<vmem>>, vector<16x128xbf16>
    %c80_109 = arith.constant 80 : index
    %c0_110 = arith.constant 0 : index
    %123 = vector.load %arg30[%c80_109, %c0_110] : memref<512x128xbf16, #tpu.memory_space<vmem>>, vector<16x128xbf16>
    tpu.vector_store %arg30[%c80_109, %c0_110], %122 {strides = array<i32>} : memref<512x128xbf16, #tpu.memory_space<vmem>>, vector<16x128xbf16>,
    %c0_111 = arith.constant 0 : index
    %c6_112 = arith.constant 6 : index
    %124 = vector.load %arg29[%c0_111, %c6_112] : memref<32x256xbf16, #tpu.memory_space<vmem>>, vector<16x128xbf16>
    %c96_113 = arith.constant 96 : index
    %c0_114 = arith.constant 0 : index
    %125 = vector.load %arg30[%c96_113, %c0_114] : memref<512x128xbf16, #tpu.memory_space<vmem>>, vector<16x128xbf16>
    tpu.vector_store %arg30[%c96_113, %c0_114], %124 {strides = array<i32>} : memref<512x128xbf16, #tpu.memory_space<vmem>>, vector<16x128xbf16>,
    %c0_115 = arith.constant 0 : index
    %c7_116 = arith.constant 7 : index
    %126 = vector.load %arg29[%c0_115, %c7_116] : memref<32x256xbf16, #tpu.memory_space<vmem>>, vector<16x128xbf16>
    %c112_117 = arith.constant 112 : index
    %c0_118 = arith.constant 0 : index
    %127 = vector.load %arg30[%c112_117, %c0_118] : memref<512x128xbf16, #tpu.memory_space<vmem>>, vector<16x128xbf16>
    tpu.vector_store %arg30[%c112_117, %c0_118], %126 {strides = array<i32>} : memref<512x128xbf16, #tpu.memory_space<vmem>>, vector<16x128xbf16>,
    %c0_119 = arith.constant 0 : index
    %c8_120 = arith.constant 8 : index
    %128 = vector.load %arg29[%c0_119, %c8_120] : memref<32x256xbf16, #tpu.memory_space<vmem>>, vector<16x128xbf16>
    %c128_121 = arith.constant 128 : index
    %c0_122 = arith.constant 0 : index
    %129 = vector.load %arg30[%c128_121, %c0_122] : memref<512x128xbf16, #tpu.memory_space<vmem>>, vector<16x128xbf16>
    tpu.vector_store %arg30[%c128_121, %c0_122], %128 {strides = array<i32>} : memref<512x128xbf16, #tpu.memory_space<vmem>>, vector<16x128xbf16>,
    %c0_123 = arith.constant 0 : index
    %c9_124 = arith.constant 9 : index
    %130 = vector.load %arg29[%c0_123, %c9_124] : memref<32x256xbf16, #tpu.memory_space<vmem>>, vector<16x128xbf16>
    %c144_125 = arith.constant 144 : index
    %c0_126 = arith.constant 0 : index
    %131 = vector.load %arg30[%c144_125, %c0_126] : memref<512x128xbf16, #tpu.memory_space<vmem>>, vector<16x128xbf16>
    tpu.vector_store %arg30[%c144_125, %c0_126], %130 {strides = array<i32>} : memref<512x128xbf16, #tpu.memory_space<vmem>>, vector<16x128xbf16>,
    %c0_127 = arith.constant 0 : index
    %c10_128 = arith.constant 10 : index
    %132 = vector.load %arg29[%c0_127, %c10_128] : memref<32x256xbf16, #tpu.memory_space<vmem>>, vector<16x128xbf16>
    %c160_129 = arith.constant 160 : index
    %c0_130 = arith.constant 0 : index
    %133 = vector.load %arg30[%c160_129, %c0_130] : memref<512x128xbf16, #tpu.memory_space<vmem>>, vector<16x128xbf16>
    tpu.vector_store %arg30[%c160_129, %c0_130], %132 {strides = array<i32>} : memref<512x128xbf16, #tpu.memory_space<vmem>>, vector<16x128xbf16>,
    %c0_131 = arith.constant 0 : index
    %c11_132 = arith.constant 11 : index
    %134 = vector.load %arg29[%c0_131, %c11_132] : memref<32x256xbf16, #tpu.memory_space<vmem>>, vector<16x128xbf16>
    %c176_133 = arith.constant 176 : index
    %c0_134 = arith.constant 0 : index
    %135 = vector.load %arg30[%c176_133, %c0_134] : memref<512x128xbf16, #tpu.memory_space<vmem>>, vector<16x128xbf16>
    tpu.vector_store %arg30[%c176_133, %c0_134], %134 {strides = array<i32>} : memref<512x128xbf16, #tpu.memory_space<vmem>>, vector<16x128xbf16>,
    %c0_135 = arith.constant 0 : index
    %c12_136 = arith.constant 12 : index
    %136 = vector.load %arg29[%c0_135, %c12_136] : memref<32x256xbf16, #tpu.memory_space<vmem>>, vector<16x128xbf16>
    %c192_137 = arith.constant 192 : index
    %c0_138 = arith.constant 0 : index
    %137 = vector.load %arg30[%c192_137, %c0_138] : memref<512x128xbf16, #tpu.memory_space<vmem>>, vector<16x128xbf16>
    tpu.vector_store %arg30[%c192_137, %c0_138], %136 {strides = array<i32>} : memref<512x128xbf16, #tpu.memory_space<vmem>>, vector<16x128xbf16>,
    %c0_139 = arith.constant 0 : index
    %c13_140 = arith.constant 13 : index
    %138 = vector.load %arg29[%c0_139, %c13_140] : memref<32x256xbf16, #tpu.memory_space<vmem>>, vector<16x128xbf16>
    %c208_141 = arith.constant 208 : index
    %c0_142 = arith.constant 0 : index
    %139 = vector.load %arg30[%c208_141, %c0_142] : memref<512x128xbf16, #tpu.memory_space<vmem>>, vector<16x128xbf16>
    tpu.vector_store %arg30[%c208_141, %c0_142], %138 {strides = array<i32>} : memref<512x128xbf16, #tpu.memory_space<vmem>>, vector<16x128xbf16>,
    %c0_143 = arith.constant 0 : index
    %c14_144 = arith.constant 14 : index
    %140 = vector.load %arg29[%c0_143, %c14_144] : memref<32x256xbf16, #tpu.memory_space<vmem>>, vector<16x128xbf16>
    %c224_145 = arith.constant 224 : index
    %c0_146 = arith.constant 0 : index
    %141 = vector.load %arg30[%c224_145, %c0_146] : memref<512x128xbf16, #tpu.memory_space<vmem>>, vector<16x128xbf16>
    tpu.vector_store %arg30[%c224_145, %c0_146], %140 {strides = array<i32>} : memref<512x128xbf16, #tpu.memory_space<vmem>>, vector<16x128xbf16>,
    %c0_147 = arith.constant 0 : index
    %c15_148 = arith.constant 15 : index
    %142 = vector.load %arg29[%c0_147, %c15_148] : memref<32x256xbf16, #tpu.memory_space<vmem>>, vector<16x128xbf16>
    %c240_149 = arith.constant 240 : index
    %c0_150 = arith.constant 0 : index
    %143 = vector.load %arg30[%c240_149, %c0_150] : memref<512x128xbf16, #tpu.memory_space<vmem>>, vector<16x128xbf16>
    tpu.vector_store %arg30[%c240_149, %c0_150], %142 {strides = array<i32>} : memref<512x128xbf16, #tpu.memory_space<vmem>>, vector<16x128xbf16>,
    %c0_151 = arith.constant 0 : index
    %c0_152 = arith.constant 0 : index
    %144 = vector.load %arg11[%c0_151, %c0_152] : memref<16x256xbf16, #tpu.memory_space<vmem>>, vector<16x256xbf16>
    %c0_153 = arith.constant 0 : index
    %c0_154 = arith.constant 0 : index
    %145 = vector.load %arg30[%c0_153, %c0_154] : memref<512x128xbf16, #tpu.memory_space<vmem>>, vector<256x128xbf16>
    %cst_155 = arith.constant dense<0.000000e+00> : vector<16x128xf32>
    %146 = tpu.matmul %144, %145, %cst_155 {dimension_numbers = #tpu.dot_dimension_numbers<[1], [0], [0], [1], [0, 0, 1, 1], [], []>} : vector<16x256xbf16>, vector<256x128xbf16>, vector<16x128xf32> -> vector<16x128xf32>
    %147 = arith.truncf %146 : vector<16x128xf32> to vector<16x128xbf16>
    %c0_156 = arith.constant 0 : index
    %c0_157 = arith.constant 0 : index
    %148 = vector.load %arg12[%c0_156, %c0_157] : memref<128x64xbf16, #tpu.memory_space<vmem>>, vector<128x64xbf16>
    %cst_158 = arith.constant dense<0.000000e+00> : vector<16x64xf32>
    %149 = tpu.matmul %147, %148, %cst_158 {dimension_numbers = #tpu.dot_dimension_numbers<[1], [0], [0], [1], [0, 0, 1, 1], [], []>} : vector<16x128xbf16>, vector<128x64xbf16>, vector<16x64xf32> -> vector<16x64xf32>
    %cst_159 = arith.constant dense<0.000000e+00> : vector<16xf32>
    %150 = vector.multi_reduction <add>, %149, %cst_159 [1] : vector<16x64xf32> to vector<16xf32>
    %151 = vector.shape_cast %150 : vector<16xf32> to vector<16x1xf32>
    %cst_160 = arith.constant 6.400000e+01 : f32
    %152 = vector.broadcast %cst_160 : f32 to vector<16x1xf32>
    %153 = arith.divf %151, %152 : vector<16x1xf32>
    %154 = vector.broadcast %153 : vector<16x1xf32> to vector<16x64xf32>
    %155 = arith.subf %149, %154 : vector<16x64xf32>
    %156 = arith.mulf %155, %155 : vector<16x64xf32>
    %cst_161 = arith.constant dense<0.000000e+00> : vector<16xf32>
    %157 = vector.multi_reduction <add>, %156, %cst_161 [1] : vector<16x64xf32> to vector<16xf32>
    %158 = vector.shape_cast %157 : vector<16xf32> to vector<16x1xf32>
    %cst_162 = arith.constant 6.400000e+01 : f32
    %159 = vector.broadcast %cst_162 : f32 to vector<16x1xf32>
    %160 = arith.divf %158, %159 : vector<16x1xf32>
    %161 = vector.broadcast %153 : vector<16x1xf32> to vector<16x64xf32>
    %162 = arith.subf %149, %161 : vector<16x64xf32>
    %cst_163 = arith.constant 9.99999974E-6 : f32
    %163 = vector.broadcast %cst_163 : f32 to vector<16x1xf32>
    %164 = arith.addf %160, %163 : vector<16x1xf32>
    %165 = math.rsqrt %164 : vector<16x1xf32>
    %166 = vector.broadcast %165 : vector<16x1xf32> to vector<16x64xf32>
    %167 = arith.mulf %162, %166 : vector<16x64xf32>
    %c0_164 = arith.constant 0 : index
    %c0_165 = arith.constant 0 : index
    %168 = vector.load %arg13[%c0_164, %c0_165] : memref<1x64xf32, #tpu.memory_space<vmem>>, vector<1x64xf32>
    %169 = vector.broadcast %168 : vector<1x64xf32> to vector<16x64xf32>
    %170 = arith.mulf %167, %169 : vector<16x64xf32>
    %c0_166 = arith.constant 0 : index
    %c0_167 = arith.constant 0 : index
    %171 = vector.load %arg14[%c0_166, %c0_167] : memref<1x64xf32, #tpu.memory_space<vmem>>, vector<1x64xf32>
    %172 = vector.broadcast %171 : vector<1x64xf32> to vector<16x64xf32>
    %173 = arith.addf %170, %172 : vector<16x64xf32>
    %174 = arith.addf %173, %35 : vector<16x64xf32>
    %cst_168 = arith.constant 0.000000e+00 : f32
    %175 = vector.broadcast %cst_168 : f32 to vector<16x64xf32>
    %176 = arith.maximumf %174, %175 : vector<16x64xf32>
    %cst_169 = arith.constant 0.000000e+00 : bf16
    %177 = vector.broadcast %cst_169 : bf16 to vector<16x1xbf16>
    %c0_170 = arith.constant 0 : index
    %c0_171 = arith.constant 0 : index
    %178 = vector.load %arg29[%c0_170, %c0_171] : memref<32x256xbf16, #tpu.memory_space<vmem>>, vector<16x1xbf16>
    tpu.vector_store %arg29[%c0_170, %c0_171], %177 {strides = array<i32>} : memref<32x256xbf16, #tpu.memory_space<vmem>>, vector<16x1xbf16>,
    %179 = arith.truncf %176 : vector<16x64xf32> to vector<16x64xbf16>
    %c0_172 = arith.constant 0 : index
    %c1_173 = arith.constant 1 : index
    %180 = vector.load %arg29[%c0_172, %c1_173] : memref<32x256xbf16, #tpu.memory_space<vmem>>, vector<16x64xbf16>
    tpu.vector_store %arg29[%c0_172, %c1_173], %179 {strides = array<i32>} : memref<32x256xbf16, #tpu.memory_space<vmem>>, vector<16x64xbf16>,
    %cst_174 = arith.constant 0.000000e+00 : bf16
    %181 = vector.broadcast %cst_174 : bf16 to vector<16x191xbf16>
    %c0_175 = arith.constant 0 : index
    %c65_176 = arith.constant 65 : index
    %182 = vector.load %arg29[%c0_175, %c65_176] : memref<32x256xbf16, #tpu.memory_space<vmem>>, vector<16x191xbf16>
    tpu.vector_store %arg29[%c0_175, %c65_176], %181 {strides = array<i32>} : memref<32x256xbf16, #tpu.memory_space<vmem>>, vector<16x191xbf16>,
    %c0_177 = arith.constant 0 : index
    %c0_178 = arith.constant 0 : index
    %183 = vector.load %arg29[%c0_177, %c0_178] : memref<32x256xbf16, #tpu.memory_space<vmem>>, vector<16x128xbf16>
    %c0_179 = arith.constant 0 : index
    %c0_180 = arith.constant 0 : index
    %184 = vector.load %arg30[%c0_179, %c0_180] : memref<512x128xbf16, #tpu.memory_space<vmem>>, vector<16x128xbf16>
    tpu.vector_store %arg30[%c0_179, %c0_180], %183 {strides = array<i32>} : memref<512x128xbf16, #tpu.memory_space<vmem>>, vector<16x128xbf16>,
    %c0_181 = arith.constant 0 : index
    %c1_182 = arith.constant 1 : index
    %185 = vector.load %arg29[%c0_181, %c1_182] : memref<32x256xbf16, #tpu.memory_space<vmem>>, vector<16x128xbf16>
    %c16_183 = arith.constant 16 : index
    %c0_184 = arith.constant 0 : index
    %186 = vector.load %arg30[%c16_183, %c0_184] : memref<512x128xbf16, #tpu.memory_space<vmem>>, vector<16x128xbf16>
    tpu.vector_store %arg30[%c16_183, %c0_184], %185 {strides = array<i32>} : memref<512x128xbf16, #tpu.memory_space<vmem>>, vector<16x128xbf16>,
    %c0_185 = arith.constant 0 : index
    %c2_186 = arith.constant 2 : index
    %187 = vector.load %arg29[%c0_185, %c2_186] : memref<32x256xbf16, #tpu.memory_space<vmem>>, vector<16x128xbf16>
    %c32_187 = arith.constant 32 : index
    %c0_188 = arith.constant 0 : index
    %188 = vector.load %arg30[%c32_187, %c0_188] : memref<512x128xbf16, #tpu.memory_space<vmem>>, vector<16x128xbf16>
    tpu.vector_store %arg30[%c32_187, %c0_188], %187 {strides = array<i32>} : memref<512x128xbf16, #tpu.memory_space<vmem>>, vector<16x128xbf16>,
    %c0_189 = arith.constant 0 : index
    %c3_190 = arith.constant 3 : index
    %189 = vector.load %arg29[%c0_189, %c3_190] : memref<32x256xbf16, #tpu.memory_space<vmem>>, vector<16x128xbf16>
    %c48_191 = arith.constant 48 : index
    %c0_192 = arith.constant 0 : index
    %190 = vector.load %arg30[%c48_191, %c0_192] : memref<512x128xbf16, #tpu.memory_space<vmem>>, vector<16x128xbf16>
    tpu.vector_store %arg30[%c48_191, %c0_192], %189 {strides = array<i32>} : memref<512x128xbf16, #tpu.memory_space<vmem>>, vector<16x128xbf16>,
    %c0_193 = arith.constant 0 : index
    %c4_194 = arith.constant 4 : index
    %191 = vector.load %arg29[%c0_193, %c4_194] : memref<32x256xbf16, #tpu.memory_space<vmem>>, vector<16x128xbf16>
    %c64_195 = arith.constant 64 : index
    %c0_196 = arith.constant 0 : index
    %192 = vector.load %arg30[%c64_195, %c0_196] : memref<512x128xbf16, #tpu.memory_space<vmem>>, vector<16x128xbf16>
    tpu.vector_store %arg30[%c64_195, %c0_196], %191 {strides = array<i32>} : memref<512x128xbf16, #tpu.memory_space<vmem>>, vector<16x128xbf16>,
    %c0_197 = arith.constant 0 : index
    %c5_198 = arith.constant 5 : index
    %193 = vector.load %arg29[%c0_197, %c5_198] : memref<32x256xbf16, #tpu.memory_space<vmem>>, vector<16x128xbf16>
    %c80_199 = arith.constant 80 : index
    %c0_200 = arith.constant 0 : index
    %194 = vector.load %arg30[%c80_199, %c0_200] : memref<512x128xbf16, #tpu.memory_space<vmem>>, vector<16x128xbf16>
    tpu.vector_store %arg30[%c80_199, %c0_200], %193 {strides = array<i32>} : memref<512x128xbf16, #tpu.memory_space<vmem>>, vector<16x128xbf16>,
    %c0_201 = arith.constant 0 : index
    %c6_202 = arith.constant 6 : index
    %195 = vector.load %arg29[%c0_201, %c6_202] : memref<32x256xbf16, #tpu.memory_space<vmem>>, vector<16x128xbf16>
    %c96_203 = arith.constant 96 : index
    %c0_204 = arith.constant 0 : index
    %196 = vector.load %arg30[%c96_203, %c0_204] : memref<512x128xbf16, #tpu.memory_space<vmem>>, vector<16x128xbf16>
    tpu.vector_store %arg30[%c96_203, %c0_204], %195 {strides = array<i32>} : memref<512x128xbf16, #tpu.memory_space<vmem>>, vector<16x128xbf16>,
    %c0_205 = arith.constant 0 : index
    %c7_206 = arith.constant 7 : index
    %197 = vector.load %arg29[%c0_205, %c7_206] : memref<32x256xbf16, #tpu.memory_space<vmem>>, vector<16x128xbf16>
    %c112_207 = arith.constant 112 : index
    %c0_208 = arith.constant 0 : index
    %198 = vector.load %arg30[%c112_207, %c0_208] : memref<512x128xbf16, #tpu.memory_space<vmem>>, vector<16x128xbf16>
    tpu.vector_store %arg30[%c112_207, %c0_208], %197 {strides = array<i32>} : memref<512x128xbf16, #tpu.memory_space<vmem>>, vector<16x128xbf16>,
    %c0_209 = arith.constant 0 : index
    %c8_210 = arith.constant 8 : index
    %199 = vector.load %arg29[%c0_209, %c8_210] : memref<32x256xbf16, #tpu.memory_space<vmem>>, vector<16x128xbf16>
    %c128_211 = arith.constant 128 : index
    %c0_212 = arith.constant 0 : index
    %200 = vector.load %arg30[%c128_211, %c0_212] : memref<512x128xbf16, #tpu.memory_space<vmem>>, vector<16x128xbf16>
    tpu.vector_store %arg30[%c128_211, %c0_212], %199 {strides = array<i32>} : memref<512x128xbf16, #tpu.memory_space<vmem>>, vector<16x128xbf16>,
    %c0_213 = arith.constant 0 : index
    %c9_214 = arith.constant 9 : index
    %201 = vector.load %arg29[%c0_213, %c9_214] : memref<32x256xbf16, #tpu.memory_space<vmem>>, vector<16x128xbf16>
    %c144_215 = arith.constant 144 : index
    %c0_216 = arith.constant 0 : index
    %202 = vector.load %arg30[%c144_215, %c0_216] : memref<512x128xbf16, #tpu.memory_space<vmem>>, vector<16x128xbf16>
    tpu.vector_store %arg30[%c144_215, %c0_216], %201 {strides = array<i32>} : memref<512x128xbf16, #tpu.memory_space<vmem>>, vector<16x128xbf16>,
    %c0_217 = arith.constant 0 : index
    %c10_218 = arith.constant 10 : index
    %203 = vector.load %arg29[%c0_217, %c10_218] : memref<32x256xbf16, #tpu.memory_space<vmem>>, vector<16x128xbf16>
    %c160_219 = arith.constant 160 : index
    %c0_220 = arith.constant 0 : index
    %204 = vector.load %arg30[%c160_219, %c0_220] : memref<512x128xbf16, #tpu.memory_space<vmem>>, vector<16x128xbf16>
    tpu.vector_store %arg30[%c160_219, %c0_220], %203 {strides = array<i32>} : memref<512x128xbf16, #tpu.memory_space<vmem>>, vector<16x128xbf16>,
    %c0_221 = arith.constant 0 : index
    %c11_222 = arith.constant 11 : index
    %205 = vector.load %arg29[%c0_221, %c11_222] : memref<32x256xbf16, #tpu.memory_space<vmem>>, vector<16x128xbf16>
    %c176_223 = arith.constant 176 : index
    %c0_224 = arith.constant 0 : index
    %206 = vector.load %arg30[%c176_223, %c0_224] : memref<512x128xbf16, #tpu.memory_space<vmem>>, vector<16x128xbf16>
    tpu.vector_store %arg30[%c176_223, %c0_224], %205 {strides = array<i32>} : memref<512x128xbf16, #tpu.memory_space<vmem>>, vector<16x128xbf16>,
    %c0_225 = arith.constant 0 : index
    %c12_226 = arith.constant 12 : index
    %207 = vector.load %arg29[%c0_225, %c12_226] : memref<32x256xbf16, #tpu.memory_space<vmem>>, vector<16x128xbf16>
    %c192_227 = arith.constant 192 : index
    %c0_228 = arith.constant 0 : index
    %208 = vector.load %arg30[%c192_227, %c0_228] : memref<512x128xbf16, #tpu.memory_space<vmem>>, vector<16x128xbf16>
    tpu.vector_store %arg30[%c192_227, %c0_228], %207 {strides = array<i32>} : memref<512x128xbf16, #tpu.memory_space<vmem>>, vector<16x128xbf16>,
    %c0_229 = arith.constant 0 : index
    %c13_230 = arith.constant 13 : index
    %209 = vector.load %arg29[%c0_229, %c13_230] : memref<32x256xbf16, #tpu.memory_space<vmem>>, vector<16x128xbf16>
    %c208_231 = arith.constant 208 : index
    %c0_232 = arith.constant 0 : index
    %210 = vector.load %arg30[%c208_231, %c0_232] : memref<512x128xbf16, #tpu.memory_space<vmem>>, vector<16x128xbf16>
    tpu.vector_store %arg30[%c208_231, %c0_232], %209 {strides = array<i32>} : memref<512x128xbf16, #tpu.memory_space<vmem>>, vector<16x128xbf16>,
    %c0_233 = arith.constant 0 : index
    %c14_234 = arith.constant 14 : index
    %211 = vector.load %arg29[%c0_233, %c14_234] : memref<32x256xbf16, #tpu.memory_space<vmem>>, vector<16x128xbf16>
    %c224_235 = arith.constant 224 : index
    %c0_236 = arith.constant 0 : index
    %212 = vector.load %arg30[%c224_235, %c0_236] : memref<512x128xbf16, #tpu.memory_space<vmem>>, vector<16x128xbf16>
    tpu.vector_store %arg30[%c224_235, %c0_236], %211 {strides = array<i32>} : memref<512x128xbf16, #tpu.memory_space<vmem>>, vector<16x128xbf16>,
    %c0_237 = arith.constant 0 : index
    %c15_238 = arith.constant 15 : index
    %213 = vector.load %arg29[%c0_237, %c15_238] : memref<32x256xbf16, #tpu.memory_space<vmem>>, vector<16x128xbf16>
    %c240_239 = arith.constant 240 : index
    %c0_240 = arith.constant 0 : index
    %214 = vector.load %arg30[%c240_239, %c0_240] : memref<512x128xbf16, #tpu.memory_space<vmem>>, vector<16x128xbf16>
    tpu.vector_store %arg30[%c240_239, %c0_240], %213 {strides = array<i32>} : memref<512x128xbf16, #tpu.memory_space<vmem>>, vector<16x128xbf16>,
    %c0_241 = arith.constant 0 : index
    %c0_242 = arith.constant 0 : index
    %215 = vector.load %arg15[%c0_241, %c0_242] : memref<32x256xbf16, #tpu.memory_space<vmem>>, vector<32x256xbf16>
    %c0_243 = arith.constant 0 : index
    %c0_244 = arith.constant 0 : index
    %216 = vector.load %arg30[%c0_243, %c0_244] : memref<512x128xbf16, #tpu.memory_space<vmem>>, vector<256x128xbf16>
    %cst_245 = arith.constant dense<0.000000e+00> : vector<32x128xf32>
    %217 = tpu.matmul %215, %216, %cst_245 {dimension_numbers = #tpu.dot_dimension_numbers<[1], [0], [0], [1], [0, 0, 1, 1], [], []>} : vector<32x256xbf16>, vector<256x128xbf16>, vector<32x128xf32> -> vector<32x128xf32>
    %218 = arith.truncf %217 : vector<32x128xf32> to vector<32x128xbf16>
    %c0_246 = arith.constant 0 : index
    %c0_247 = arith.constant 0 : index
    %219 = vector.load %arg16[%c0_246, %c0_247] : memref<128x32xbf16, #tpu.memory_space<vmem>>, vector<128x32xbf16>
    %cst_248 = arith.constant dense<0.000000e+00> : vector<32x32xf32>
    %220 = tpu.matmul %218, %219, %cst_248 {dimension_numbers = #tpu.dot_dimension_numbers<[1], [0], [0], [1], [0, 0, 1, 1], [], []>} : vector<32x128xbf16>, vector<128x32xbf16>, vector<32x32xf32> -> vector<32x32xf32>
    %cst_249 = arith.constant dense<0.000000e+00> : vector<32xf32>
    %221 = vector.multi_reduction <add>, %220, %cst_249 [1] : vector<32x32xf32> to vector<32xf32>
    %222 = vector.shape_cast %221 : vector<32xf32> to vector<32x1xf32>
    %cst_250 = arith.constant 3.200000e+01 : f32
    %223 = vector.broadcast %cst_250 : f32 to vector<32x1xf32>
    %224 = arith.divf %222, %223 : vector<32x1xf32>
    %225 = vector.broadcast %224 : vector<32x1xf32> to vector<32x32xf32>
    %226 = arith.subf %220, %225 : vector<32x32xf32>
    %227 = arith.mulf %226, %226 : vector<32x32xf32>
    %cst_251 = arith.constant dense<0.000000e+00> : vector<32xf32>
    %228 = vector.multi_reduction <add>, %227, %cst_251 [1] : vector<32x32xf32> to vector<32xf32>
    %229 = vector.shape_cast %228 : vector<32xf32> to vector<32x1xf32>
    %cst_252 = arith.constant 3.200000e+01 : f32
    %230 = vector.broadcast %cst_252 : f32 to vector<32x1xf32>
    %231 = arith.divf %229, %230 : vector<32x1xf32>
    %232 = vector.broadcast %224 : vector<32x1xf32> to vector<32x32xf32>
    %233 = arith.subf %220, %232 : vector<32x32xf32>
    %cst_253 = arith.constant 9.99999974E-6 : f32
    %234 = vector.broadcast %cst_253 : f32 to vector<32x1xf32>
    %235 = arith.addf %231, %234 : vector<32x1xf32>
    %236 = math.rsqrt %235 : vector<32x1xf32>
    %237 = vector.broadcast %236 : vector<32x1xf32> to vector<32x32xf32>
    %238 = arith.mulf %233, %237 : vector<32x32xf32>
    %c0_254 = arith.constant 0 : index
    %c0_255 = arith.constant 0 : index
    %239 = vector.load %arg17[%c0_254, %c0_255] : memref<1x32xf32, #tpu.memory_space<vmem>>, vector<1x32xf32>
    %240 = vector.broadcast %239 : vector<1x32xf32> to vector<32x32xf32>
    %241 = arith.mulf %238, %240 : vector<32x32xf32>
    %c0_256 = arith.constant 0 : index
    %c0_257 = arith.constant 0 : index
    %242 = vector.load %arg18[%c0_256, %c0_257] : memref<1x32xf32, #tpu.memory_space<vmem>>, vector<1x32xf32>
    %243 = vector.broadcast %242 : vector<1x32xf32> to vector<32x32xf32>
    %244 = arith.addf %241, %243 : vector<32x32xf32>
    %cst_258 = arith.constant 0.000000e+00 : f32
    %245 = vector.broadcast %cst_258 : f32 to vector<32x32xf32>
    %246 = arith.maximumf %244, %245 : vector<32x32xf32>
    %cst_259 = arith.constant 0.000000e+00 : bf16
    %247 = vector.broadcast %cst_259 : bf16 to vector<32x1xbf16>
    %c0_260 = arith.constant 0 : index
    %c0_261 = arith.constant 0 : index
    %248 = vector.load %arg29[%c0_260, %c0_261] : memref<32x256xbf16, #tpu.memory_space<vmem>>, vector<32x1xbf16>
    tpu.vector_store %arg29[%c0_260, %c0_261], %247 {strides = array<i32>} : memref<32x256xbf16, #tpu.memory_space<vmem>>, vector<32x1xbf16>,
    %249 = arith.truncf %246 : vector<32x32xf32> to vector<32x32xbf16>
    %c0_262 = arith.constant 0 : index
    %c1_263 = arith.constant 1 : index
    %250 = vector.load %arg29[%c0_262, %c1_263] : memref<32x256xbf16, #tpu.memory_space<vmem>>, vector<32x32xbf16>
    tpu.vector_store %arg29[%c0_262, %c1_263], %249 {strides = array<i32>} : memref<32x256xbf16, #tpu.memory_space<vmem>>, vector<32x32xbf16>,
    %cst_264 = arith.constant 0.000000e+00 : bf16
    %251 = vector.broadcast %cst_264 : bf16 to vector<32x223xbf16>
    %c0_265 = arith.constant 0 : index
    %c33 = arith.constant 33 : index
    %252 = vector.load %arg29[%c0_265, %c33] : memref<32x256xbf16, #tpu.memory_space<vmem>>, vector<32x223xbf16>
    tpu.vector_store %arg29[%c0_265, %c33], %251 {strides = array<i32>} : memref<32x256xbf16, #tpu.memory_space<vmem>>, vector<32x223xbf16>,
    %c0_266 = arith.constant 0 : index
    %c0_267 = arith.constant 0 : index
    %253 = vector.load %arg29[%c0_266, %c0_267] : memref<32x256xbf16, #tpu.memory_space<vmem>>, vector<32x128xbf16>
    %c0_268 = arith.constant 0 : index
    %c0_269 = arith.constant 0 : index
    %254 = vector.load %arg30[%c0_268, %c0_269] : memref<512x128xbf16, #tpu.memory_space<vmem>>, vector<32x128xbf16>
    tpu.vector_store %arg30[%c0_268, %c0_269], %253 {strides = array<i32>} : memref<512x128xbf16, #tpu.memory_space<vmem>>, vector<32x128xbf16>,
    %c0_270 = arith.constant 0 : index
    %c1_271 = arith.constant 1 : index
    %255 = vector.load %arg29[%c0_270, %c1_271] : memref<32x256xbf16, #tpu.memory_space<vmem>>, vector<32x128xbf16>
    %c32_272 = arith.constant 32 : index
    %c0_273 = arith.constant 0 : index
    %256 = vector.load %arg30[%c32_272, %c0_273] : memref<512x128xbf16, #tpu.memory_space<vmem>>, vector<32x128xbf16>
    tpu.vector_store %arg30[%c32_272, %c0_273], %255 {strides = array<i32>} : memref<512x128xbf16, #tpu.memory_space<vmem>>, vector<32x128xbf16>,
    %c0_274 = arith.constant 0 : index
    %c2_275 = arith.constant 2 : index
    %257 = vector.load %arg29[%c0_274, %c2_275] : memref<32x256xbf16, #tpu.memory_space<vmem>>, vector<32x128xbf16>
    %c64_276 = arith.constant 64 : index
    %c0_277 = arith.constant 0 : index
    %258 = vector.load %arg30[%c64_276, %c0_277] : memref<512x128xbf16, #tpu.memory_space<vmem>>, vector<32x128xbf16>
    tpu.vector_store %arg30[%c64_276, %c0_277], %257 {strides = array<i32>} : memref<512x128xbf16, #tpu.memory_space<vmem>>, vector<32x128xbf16>,
    %c0_278 = arith.constant 0 : index
    %c3_279 = arith.constant 3 : index
    %259 = vector.load %arg29[%c0_278, %c3_279] : memref<32x256xbf16, #tpu.memory_space<vmem>>, vector<32x128xbf16>
    %c96_280 = arith.constant 96 : index
    %c0_281 = arith.constant 0 : index
    %260 = vector.load %arg30[%c96_280, %c0_281] : memref<512x128xbf16, #tpu.memory_space<vmem>>, vector<32x128xbf16>
    tpu.vector_store %arg30[%c96_280, %c0_281], %259 {strides = array<i32>} : memref<512x128xbf16, #tpu.memory_space<vmem>>, vector<32x128xbf16>,
    %c0_282 = arith.constant 0 : index
    %c4_283 = arith.constant 4 : index
    %261 = vector.load %arg29[%c0_282, %c4_283] : memref<32x256xbf16, #tpu.memory_space<vmem>>, vector<32x128xbf16>
    %c128_284 = arith.constant 128 : index
    %c0_285 = arith.constant 0 : index
    %262 = vector.load %arg30[%c128_284, %c0_285] : memref<512x128xbf16, #tpu.memory_space<vmem>>, vector<32x128xbf16>
    tpu.vector_store %arg30[%c128_284, %c0_285], %261 {strides = array<i32>} : memref<512x128xbf16, #tpu.memory_space<vmem>>, vector<32x128xbf16>,
    %c0_286 = arith.constant 0 : index
    %c5_287 = arith.constant 5 : index
    %263 = vector.load %arg29[%c0_286, %c5_287] : memref<32x256xbf16, #tpu.memory_space<vmem>>, vector<32x128xbf16>
    %c160_288 = arith.constant 160 : index
    %c0_289 = arith.constant 0 : index
    %264 = vector.load %arg30[%c160_288, %c0_289] : memref<512x128xbf16, #tpu.memory_space<vmem>>, vector<32x128xbf16>
    tpu.vector_store %arg30[%c160_288, %c0_289], %263 {strides = array<i32>} : memref<512x128xbf16, #tpu.memory_space<vmem>>, vector<32x128xbf16>,
    %c0_290 = arith.constant 0 : index
    %c6_291 = arith.constant 6 : index
    %265 = vector.load %arg29[%c0_290, %c6_291] : memref<32x256xbf16, #tpu.memory_space<vmem>>, vector<32x128xbf16>
    %c192_292 = arith.constant 192 : index
    %c0_293 = arith.constant 0 : index
    %266 = vector.load %arg30[%c192_292, %c0_293] : memref<512x128xbf16, #tpu.memory_space<vmem>>, vector<32x128xbf16>
    tpu.vector_store %arg30[%c192_292, %c0_293], %265 {strides = array<i32>} : memref<512x128xbf16, #tpu.memory_space<vmem>>, vector<32x128xbf16>,
    %c0_294 = arith.constant 0 : index
    %c7_295 = arith.constant 7 : index
    %267 = vector.load %arg29[%c0_294, %c7_295] : memref<32x256xbf16, #tpu.memory_space<vmem>>, vector<32x128xbf16>
    %c224_296 = arith.constant 224 : index
    %c0_297 = arith.constant 0 : index
    %268 = vector.load %arg30[%c224_296, %c0_297] : memref<512x128xbf16, #tpu.memory_space<vmem>>, vector<32x128xbf16>
    tpu.vector_store %arg30[%c224_296, %c0_297], %267 {strides = array<i32>} : memref<512x128xbf16, #tpu.memory_space<vmem>>, vector<32x128xbf16>,
    %c0_298 = arith.constant 0 : index
    %c8_299 = arith.constant 8 : index
    %269 = vector.load %arg29[%c0_298, %c8_299] : memref<32x256xbf16, #tpu.memory_space<vmem>>, vector<32x128xbf16>
    %c256 = arith.constant 256 : index
    %c0_300 = arith.constant 0 : index
    %270 = vector.load %arg30[%c256, %c0_300] : memref<512x128xbf16, #tpu.memory_space<vmem>>, vector<32x128xbf16>
    tpu.vector_store %arg30[%c256, %c0_300], %269 {strides = array<i32>} : memref<512x128xbf16, #tpu.memory_space<vmem>>, vector<32x128xbf16>,
    %c0_301 = arith.constant 0 : index
    %c9_302 = arith.constant 9 : index
    %271 = vector.load %arg29[%c0_301, %c9_302] : memref<32x256xbf16, #tpu.memory_space<vmem>>, vector<32x128xbf16>
    %c288 = arith.constant 288 : index
    %c0_303 = arith.constant 0 : index
    %272 = vector.load %arg30[%c288, %c0_303] : memref<512x128xbf16, #tpu.memory_space<vmem>>, vector<32x128xbf16>
    tpu.vector_store %arg30[%c288, %c0_303], %271 {strides = array<i32>} : memref<512x128xbf16, #tpu.memory_space<vmem>>, vector<32x128xbf16>,
    %c0_304 = arith.constant 0 : index
    %c10_305 = arith.constant 10 : index
    %273 = vector.load %arg29[%c0_304, %c10_305] : memref<32x256xbf16, #tpu.memory_space<vmem>>, vector<32x128xbf16>
    %c320 = arith.constant 320 : index
    %c0_306 = arith.constant 0 : index
    %274 = vector.load %arg30[%c320, %c0_306] : memref<512x128xbf16, #tpu.memory_space<vmem>>, vector<32x128xbf16>
    tpu.vector_store %arg30[%c320, %c0_306], %273 {strides = array<i32>} : memref<512x128xbf16, #tpu.memory_space<vmem>>, vector<32x128xbf16>,
    %c0_307 = arith.constant 0 : index
    %c11_308 = arith.constant 11 : index
    %275 = vector.load %arg29[%c0_307, %c11_308] : memref<32x256xbf16, #tpu.memory_space<vmem>>, vector<32x128xbf16>
    %c352 = arith.constant 352 : index
    %c0_309 = arith.constant 0 : index
    %276 = vector.load %arg30[%c352, %c0_309] : memref<512x128xbf16, #tpu.memory_space<vmem>>, vector<32x128xbf16>
    tpu.vector_store %arg30[%c352, %c0_309], %275 {strides = array<i32>} : memref<512x128xbf16, #tpu.memory_space<vmem>>, vector<32x128xbf16>,
    %c0_310 = arith.constant 0 : index
    %c12_311 = arith.constant 12 : index
    %277 = vector.load %arg29[%c0_310, %c12_311] : memref<32x256xbf16, #tpu.memory_space<vmem>>, vector<32x128xbf16>
    %c384 = arith.constant 384 : index
    %c0_312 = arith.constant 0 : index
    %278 = vector.load %arg30[%c384, %c0_312] : memref<512x128xbf16, #tpu.memory_space<vmem>>, vector<32x128xbf16>
    tpu.vector_store %arg30[%c384, %c0_312], %277 {strides = array<i32>} : memref<512x128xbf16, #tpu.memory_space<vmem>>, vector<32x128xbf16>,
    %c0_313 = arith.constant 0 : index
    %c13_314 = arith.constant 13 : index
    %279 = vector.load %arg29[%c0_313, %c13_314] : memref<32x256xbf16, #tpu.memory_space<vmem>>, vector<32x128xbf16>
    %c416 = arith.constant 416 : index
    %c0_315 = arith.constant 0 : index
    %280 = vector.load %arg30[%c416, %c0_315] : memref<512x128xbf16, #tpu.memory_space<vmem>>, vector<32x128xbf16>
    tpu.vector_store %arg30[%c416, %c0_315], %279 {strides = array<i32>} : memref<512x128xbf16, #tpu.memory_space<vmem>>, vector<32x128xbf16>,
    %c0_316 = arith.constant 0 : index
    %c14_317 = arith.constant 14 : index
    %281 = vector.load %arg29[%c0_316, %c14_317] : memref<32x256xbf16, #tpu.memory_space<vmem>>, vector<32x128xbf16>
    %c448 = arith.constant 448 : index
    %c0_318 = arith.constant 0 : index
    %282 = vector.load %arg30[%c448, %c0_318] : memref<512x128xbf16, #tpu.memory_space<vmem>>, vector<32x128xbf16>
    tpu.vector_store %arg30[%c448, %c0_318], %281 {strides = array<i32>} : memref<512x128xbf16, #tpu.memory_space<vmem>>, vector<32x128xbf16>,
    %c0_319 = arith.constant 0 : index
    %c15_320 = arith.constant 15 : index
    %283 = vector.load %arg29[%c0_319, %c15_320] : memref<32x256xbf16, #tpu.memory_space<vmem>>, vector<32x128xbf16>
    %c480 = arith.constant 480 : index
    %c0_321 = arith.constant 0 : index
    %284 = vector.load %arg30[%c480, %c0_321] : memref<512x128xbf16, #tpu.memory_space<vmem>>, vector<32x128xbf16>
    tpu.vector_store %arg30[%c480, %c0_321], %283 {strides = array<i32>} : memref<512x128xbf16, #tpu.memory_space<vmem>>, vector<32x128xbf16>,
    %c0_322 = arith.constant 0 : index
    %c0_323 = arith.constant 0 : index
    %285 = vector.load %arg19[%c0_322, %c0_323] : memref<32x512xbf16, #tpu.memory_space<vmem>>, vector<32x512xbf16>
    %c0_324 = arith.constant 0 : index
    %c0_325 = arith.constant 0 : index
    %286 = vector.load %arg30[%c0_324, %c0_325] : memref<512x128xbf16, #tpu.memory_space<vmem>>, vector<512x128xbf16>
    %cst_326 = arith.constant dense<0.000000e+00> : vector<32x128xf32>
    %287 = tpu.matmul %285, %286, %cst_326 {dimension_numbers = #tpu.dot_dimension_numbers<[1], [0], [0], [1], [0, 0, 1, 1], [], []>} : vector<32x512xbf16>, vector<512x128xbf16>, vector<32x128xf32> -> vector<32x128xf32>
    %288 = arith.truncf %287 : vector<32x128xf32> to vector<32x128xbf16>
    %c0_327 = arith.constant 0 : index
    %c0_328 = arith.constant 0 : index
    %289 = vector.load %arg20[%c0_327, %c0_328] : memref<128x32xbf16, #tpu.memory_space<vmem>>, vector<128x32xbf16>
    %cst_329 = arith.constant dense<0.000000e+00> : vector<32x32xf32>
    %290 = tpu.matmul %288, %289, %cst_329 {dimension_numbers = #tpu.dot_dimension_numbers<[1], [0], [0], [1], [0, 0, 1, 1], [], []>} : vector<32x128xbf16>, vector<128x32xbf16>, vector<32x32xf32> -> vector<32x32xf32>
    %cst_330 = arith.constant dense<0.000000e+00> : vector<32xf32>
    %291 = vector.multi_reduction <add>, %290, %cst_330 [1] : vector<32x32xf32> to vector<32xf32>
    %292 = vector.shape_cast %291 : vector<32xf32> to vector<32x1xf32>
    %cst_331 = arith.constant 3.200000e+01 : f32
    %293 = vector.broadcast %cst_331 : f32 to vector<32x1xf32>
    %294 = arith.divf %292, %293 : vector<32x1xf32>
    %295 = vector.broadcast %294 : vector<32x1xf32> to vector<32x32xf32>
    %296 = arith.subf %290, %295 : vector<32x32xf32>
    %297 = arith.mulf %296, %296 : vector<32x32xf32>
    %cst_332 = arith.constant dense<0.000000e+00> : vector<32xf32>
    %298 = vector.multi_reduction <add>, %297, %cst_332 [1] : vector<32x32xf32> to vector<32xf32>
    %299 = vector.shape_cast %298 : vector<32xf32> to vector<32x1xf32>
    %cst_333 = arith.constant 3.200000e+01 : f32
    %300 = vector.broadcast %cst_333 : f32 to vector<32x1xf32>
    %301 = arith.divf %299, %300 : vector<32x1xf32>
    %302 = vector.broadcast %294 : vector<32x1xf32> to vector<32x32xf32>
    %303 = arith.subf %290, %302 : vector<32x32xf32>
    %cst_334 = arith.constant 9.99999974E-6 : f32
    %304 = vector.broadcast %cst_334 : f32 to vector<32x1xf32>
    %305 = arith.addf %301, %304 : vector<32x1xf32>
    %306 = math.rsqrt %305 : vector<32x1xf32>
    %307 = vector.broadcast %306 : vector<32x1xf32> to vector<32x32xf32>
    %308 = arith.mulf %303, %307 : vector<32x32xf32>
    %c0_335 = arith.constant 0 : index
    %c0_336 = arith.constant 0 : index
    %309 = vector.load %arg21[%c0_335, %c0_336] : memref<1x32xf32, #tpu.memory_space<vmem>>, vector<1x32xf32>
    %310 = vector.broadcast %309 : vector<1x32xf32> to vector<32x32xf32>
    %311 = arith.mulf %308, %310 : vector<32x32xf32>
    %c0_337 = arith.constant 0 : index
    %c0_338 = arith.constant 0 : index
    %312 = vector.load %arg22[%c0_337, %c0_338] : memref<1x32xf32, #tpu.memory_space<vmem>>, vector<1x32xf32>
    %313 = vector.broadcast %312 : vector<1x32xf32> to vector<32x32xf32>
    %314 = arith.addf %311, %313 : vector<32x32xf32>
    %315 = arith.truncf %176 : vector<16x64xf32> to vector<16x64xbf16>
    %c0_339 = arith.constant 0 : index
    %c0_340 = arith.constant 0 : index
    %316 = vector.load %arg24[%c0_339, %c0_340] : memref<64x32xbf16, #tpu.memory_space<vmem>>, vector<64x32xbf16>
    %cst_341 = arith.constant dense<0.000000e+00> : vector<16x32xf32>
    %317 = tpu.matmul %315, %316, %cst_341 {dimension_numbers = #tpu.dot_dimension_numbers<[1], [0], [0], [1], [0, 0, 1, 1], [], []>} : vector<16x64xbf16>, vector<64x32xbf16>, vector<16x32xf32> -> vector<16x32xf32>
    %c0_342 = arith.constant 0 : index
    %c0_343 = arith.constant 0 : index
    %318 = vector.load %arg23[%c0_342, %c0_343] : memref<32x16xbf16, #tpu.memory_space<vmem>>, vector<32x16xbf16>
    %319 = arith.truncf %317 : vector<16x32xf32> to vector<16x32xbf16>
    %cst_344 = arith.constant dense<0.000000e+00> : vector<32x32xf32>
    %320 = tpu.matmul %318, %319, %cst_344 {dimension_numbers = #tpu.dot_dimension_numbers<[1], [0], [0], [1], [0, 0, 1, 1], [], []>} : vector<32x16xbf16>, vector<16x32xbf16>, vector<32x32xf32> -> vector<32x32xf32>
    %cst_345 = arith.constant dense<0.000000e+00> : vector<32xf32>
    %321 = vector.multi_reduction <add>, %320, %cst_345 [1] : vector<32x32xf32> to vector<32xf32>
    %322 = vector.shape_cast %321 : vector<32xf32> to vector<32x1xf32>
    %cst_346 = arith.constant 3.200000e+01 : f32
    %323 = vector.broadcast %cst_346 : f32 to vector<32x1xf32>
    %324 = arith.divf %322, %323 : vector<32x1xf32>
    %325 = vector.broadcast %324 : vector<32x1xf32> to vector<32x32xf32>
    %326 = arith.subf %320, %325 : vector<32x32xf32>
    %327 = arith.mulf %326, %326 : vector<32x32xf32>
    %cst_347 = arith.constant dense<0.000000e+00> : vector<32xf32>
    %328 = vector.multi_reduction <add>, %327, %cst_347 [1] : vector<32x32xf32> to vector<32xf32>
    %329 = vector.shape_cast %328 : vector<32xf32> to vector<32x1xf32>
    %cst_348 = arith.constant 3.200000e+01 : f32
    %330 = vector.broadcast %cst_348 : f32 to vector<32x1xf32>
    %331 = arith.divf %329, %330 : vector<32x1xf32>
    %332 = vector.broadcast %324 : vector<32x1xf32> to vector<32x32xf32>
    %333 = arith.subf %320, %332 : vector<32x32xf32>
    %cst_349 = arith.constant 9.99999974E-6 : f32
    %334 = vector.broadcast %cst_349 : f32 to vector<32x1xf32>
    %335 = arith.addf %331, %334 : vector<32x1xf32>
    %336 = math.rsqrt %335 : vector<32x1xf32>
    %337 = vector.broadcast %336 : vector<32x1xf32> to vector<32x32xf32>
    %338 = arith.mulf %333, %337 : vector<32x32xf32>
    %c0_350 = arith.constant 0 : index
    %c0_351 = arith.constant 0 : index
    %339 = vector.load %arg25[%c0_350, %c0_351] : memref<1x32xf32, #tpu.memory_space<vmem>>, vector<1x32xf32>
    %340 = vector.broadcast %339 : vector<1x32xf32> to vector<32x32xf32>
    %341 = arith.mulf %338, %340 : vector<32x32xf32>
    %c0_352 = arith.constant 0 : index
    %c0_353 = arith.constant 0 : index
    %342 = vector.load %arg26[%c0_352, %c0_353] : memref<1x32xf32, #tpu.memory_space<vmem>>, vector<1x32xf32>
    %343 = vector.broadcast %342 : vector<1x32xf32> to vector<32x32xf32>
    %344 = arith.addf %341, %343 : vector<32x32xf32>
    %345 = arith.addf %314, %344 : vector<32x32xf32>
    %cst_354 = arith.constant 0.000000e+00 : f32
    %346 = vector.broadcast %cst_354 : f32 to vector<32x32xf32>
    %347 = arith.maximumf %345, %346 : vector<32x32xf32>
    %348 = arith.truncf %347 : vector<32x32xf32> to vector<32x32xbf16>
    %c0_355 = arith.constant 0 : index
    %c0_356 = arith.constant 0 : index
    %349 = vector.load %arg27[%c0_355, %c0_356] : memref<32x16xbf16, #tpu.memory_space<vmem>>, vector<32x16xbf16>
    %cst_357 = arith.constant dense<0.000000e+00> : vector<32x16xf32>
    %350 = tpu.matmul %348, %349, %cst_357 {dimension_numbers = #tpu.dot_dimension_numbers<[1], [0], [0], [1], [0, 0, 1, 1], [], []>} : vector<32x32xbf16>, vector<32x16xbf16>, vector<32x16xf32> -> vector<32x16xf32>
    %cst_358 = arith.constant dense<0.000000e+00> : vector<16xf32>
    %351 = vector.multi_reduction <add>, %350, %cst_358 [0] : vector<32x16xf32> to vector<16xf32>
    %352 = vector.shape_cast %351 : vector<16xf32> to vector<1x16xf32>
    %cst_359 = arith.constant 3.200000e+01 : f32
    %353 = vector.broadcast %cst_359 : f32 to vector<1x16xf32>
    %354 = arith.divf %352, %353 : vector<1x16xf32>
    %c0_360 = arith.constant 0 : index
    %c0_361 = arith.constant 0 : index
    %c0_362 = arith.constant 0 : index
    %355 = vector.load %arg28[%c0_360, %c0_361, %c0_362] : memref<1x1x16xf32, #tpu.memory_space<vmem>>, vector<1x1x16xf32>
    %356 = vector.shape_cast %355 : vector<1x1x16xf32> to vector<1x16xf32>
    %357 = vector.shape_cast %354 : vector<1x16xf32> to vector<1x1x16xf32>
    tpu.vector_store %arg28[%c0_360, %c0_361, %c0_362], %357 {strides = array<i32>} : memref<1x1x16xf32, #tpu.memory_space<vmem>>, vector<1x1x16xf32>,
    return
  }
  func.func @transform_0(%arg0: i32) -> (i32, i32, i32) {
    %c0_i32 = arith.constant 0 : i32
    %c0_i32_0 = arith.constant 0 : i32
    %c0_i32_1 = arith.constant 0 : i32
    return %arg0, %c0_i32, %c0_i32_0 : i32, i32, i32
  }
  func.func @transform_1(%arg0: i32) -> (i32, i32) {
    %c0_i32 = arith.constant 0 : i32
    %c0_i32_0 = arith.constant 0 : i32
    %c0_i32_1 = arith.constant 0 : i32
    return %c0_i32, %c0_i32_0 : i32, i32
  }
  func.func @transform_2(%arg0: i32) -> (i32, i32) {
    %c0_i32 = arith.constant 0 : i32
    %c0_i32_0 = arith.constant 0 : i32
    %c0_i32_1 = arith.constant 0 : i32
    return %c0_i32, %c0_i32_0 : i32, i32
  }
  func.func @transform_3(%arg0: i32) -> (i32, i32) {
    %c0_i32 = arith.constant 0 : i32
    %c0_i32_0 = arith.constant 0 : i32
    %c0_i32_1 = arith.constant 0 : i32
    return %c0_i32, %c0_i32_0 : i32, i32
  }
  func.func @transform_4(%arg0: i32) -> (i32, i32) {
    %c0_i32 = arith.constant 0 : i32
    %c0_i32_0 = arith.constant 0 : i32
    %c0_i32_1 = arith.constant 0 : i32
    return %c0_i32, %c0_i32_0 : i32, i32
  }
  func.func @transform_5(%arg0: i32) -> (i32, i32) {
    %c0_i32 = arith.constant 0 : i32
    %c0_i32_0 = arith.constant 0 : i32
    %c0_i32_1 = arith.constant 0 : i32
    return %c0_i32, %c0_i32_0 : i32, i32
  }
  func.func @transform_6(%arg0: i32) -> (i32, i32) {
    %c0_i32 = arith.constant 0 : i32
    %c0_i32_0 = arith.constant 0 : i32
    %c0_i32_1 = arith.constant 0 : i32
    return %c0_i32, %c0_i32_0 : i32, i32
  }
  func.func @transform_7(%arg0: i32) -> (i32, i32) {
    %c0_i32 = arith.constant 0 : i32
    %c0_i32_0 = arith.constant 0 : i32
    %c0_i32_1 = arith.constant 0 : i32
    return %c0_i32, %c0_i32_0 : i32, i32
  }
  func.func @transform_8(%arg0: i32) -> (i32, i32) {
    %c0_i32 = arith.constant 0 : i32
    %c0_i32_0 = arith.constant 0 : i32
    %c0_i32_1 = arith.constant 0 : i32
    return %c0_i32, %c0_i32_0 : i32, i32
  }
  func.func @transform_9(%arg0: i32) -> (i32, i32) {
    %c0_i32 = arith.constant 0 : i32
    %c0_i32_0 = arith.constant 0 : i32
    %c0_i32_1 = arith.constant 0 : i32
    return %c0_i32, %c0_i32_0 : i32, i32
  }
  func.func @transform_10(%arg0: i32) -> (i32, i32) {
    %c0_i32 = arith.constant 0 : i32
    %c0_i32_0 = arith.constant 0 : i32
    %c0_i32_1 = arith.constant 0 : i32
    return %c0_i32, %c0_i32_0 : i32, i32
  }
  func.func @transform_11(%arg0: i32) -> (i32, i32) {
    %c0_i32 = arith.constant 0 : i32
    %c0_i32_0 = arith.constant 0 : i32
    %c0_i32_1 = arith.constant 0 : i32
    return %c0_i32, %c0_i32_0 : i32, i32
  }
  func.func @transform_12(%arg0: i32) -> (i32, i32) {
    %c0_i32 = arith.constant 0 : i32
    %c0_i32_0 = arith.constant 0 : i32
    %c0_i32_1 = arith.constant 0 : i32
    return %c0_i32, %c0_i32_0 : i32, i32
  }
  func.func @transform_13(%arg0: i32) -> (i32, i32) {
    %c0_i32 = arith.constant 0 : i32
    %c0_i32_0 = arith.constant 0 : i32
    %c0_i32_1 = arith.constant 0 : i32
    return %c0_i32, %c0_i32_0 : i32, i32
  }
  func.func @transform_14(%arg0: i32) -> (i32, i32) {
    %c0_i32 = arith.constant 0 : i32
    %c0_i32_0 = arith.constant 0 : i32
    %c0_i32_1 = arith.constant 0 : i32
    return %c0_i32, %c0_i32_0 : i32, i32
  }
  func.func @transform_15(%arg0: i32) -> (i32, i32) {
    %c0_i32 = arith.constant 0 : i32
    %c0_i32_0 = arith.constant 0 : i32
    %c0_i32_1 = arith.constant 0 : i32
    return %c0_i32, %c0_i32_0 : i32, i32
  }
  func.func @transform_16(%arg0: i32) -> (i32, i32) {
    %c0_i32 = arith.constant 0 : i32
    %c0_i32_0 = arith.constant 0 : i32
    %c0_i32_1 = arith.constant 0 : i32
    return %c0_i32, %c0_i32_0 : i32, i32
  }
  func.func @transform_17(%arg0: i32) -> (i32, i32) {
    %c0_i32 = arith.constant 0 : i32
    %c0_i32_0 = arith.constant 0 : i32
    %c0_i32_1 = arith.constant 0 : i32
    return %c0_i32, %c0_i32_0 : i32, i32
  }
  func.func @transform_18(%arg0: i32) -> (i32, i32) {
    %c0_i32 = arith.constant 0 : i32
    %c0_i32_0 = arith.constant 0 : i32
    %c0_i32_1 = arith.constant 0 : i32
    return %c0_i32, %c0_i32_0 : i32, i32
  }
  func.func @transform_19(%arg0: i32) -> (i32, i32) {
    %c0_i32 = arith.constant 0 : i32
    %c0_i32_0 = arith.constant 0 : i32
    %c0_i32_1 = arith.constant 0 : i32
    return %c0_i32, %c0_i32_0 : i32, i32
  }
  func.func @transform_20(%arg0: i32) -> (i32, i32) {
    %c0_i32 = arith.constant 0 : i32
    %c0_i32_0 = arith.constant 0 : i32
    %c0_i32_1 = arith.constant 0 : i32
    return %c0_i32, %c0_i32_0 : i32, i32
  }
  func.func @transform_21(%arg0: i32) -> (i32, i32) {
    %c0_i32 = arith.constant 0 : i32
    %c0_i32_0 = arith.constant 0 : i32
    %c0_i32_1 = arith.constant 0 : i32
    return %c0_i32, %c0_i32_0 : i32, i32
  }
  func.func @transform_22(%arg0: i32) -> (i32, i32) {
    %c0_i32 = arith.constant 0 : i32
    %c0_i32_0 = arith.constant 0 : i32
    %c0_i32_1 = arith.constant 0 : i32
    return %c0_i32, %c0_i32_0 : i32, i32
  }
  func.func @transform_23(%arg0: i32) -> (i32, i32) {
    %c0_i32 = arith.constant 0 : i32
    %c0_i32_0 = arith.constant 0 : i32
    %c0_i32_1 = arith.constant 0 : i32
    return %c0_i32, %c0_i32_0 : i32, i32
  }
  func.func @transform_24(%arg0: i32) -> (i32, i32) {
    %c0_i32 = arith.constant 0 : i32
    %c0_i32_0 = arith.constant 0 : i32
    %c0_i32_1 = arith.constant 0 : i32
    return %c0_i32, %c0_i32_0 : i32, i32
  }
  func.func @transform_25(%arg0: i32) -> (i32, i32) {
    %c0_i32 = arith.constant 0 : i32
    %c0_i32_0 = arith.constant 0 : i32
    %c0_i32_1 = arith.constant 0 : i32
    return %c0_i32, %c0_i32_0 : i32, i32
  }
  func.func @transform_26(%arg0: i32) -> (i32, i32) {
    %c0_i32 = arith.constant 0 : i32
    %c0_i32_0 = arith.constant 0 : i32
    %c0_i32_1 = arith.constant 0 : i32
    return %c0_i32, %c0_i32_0 : i32, i32
  }
  func.func @transform_27(%arg0: i32) -> (i32, i32, i32) {
    %c0_i32 = arith.constant 0 : i32
    %c0_i32_0 = arith.constant 0 : i32
    %c0_i32_1 = arith.constant 0 : i32
    return %arg0, %c0_i32, %c0_i32_0 : i32, i32, i32
  }
}

</mosaic_0001>

<bundles_post_ra>
// kernel: _lambda_.1
= control target key start
LH: loop header
LB: loop body
LE: loop exit
PB: predicated region body
PF: predicated region fallthrough
CT: control target
= control target key end

     0   :  { %s6705_s0 = inlined_call_operand.vmem [shape: bf16[2,256,128], index: 0, kind: input, shape index: {}]   ;;  %s6706_s1 = inlined_call_operand.vmem [shape: bf16[16,256], index: 1, kind: input, shape index: {}]   ;;  %s6707_s2 = inlined_call_operand.vmem [shape: bf16[128,128], index: 2, kind: input, shape index: {}]   ;;  %s6708_s3 = inlined_call_operand.vmem [shape: f32[1,128], index: 3, kind: input, shape index: {}]   ;;  %s6709_s4 = inlined_call_operand.vmem [shape: f32[1,128], index: 4, kind: input, shape index: {}]   ;;  %s6710_s5 = inlined_call_operand.vmem [shape: bf16[128,64], index: 5, kind: input, shape index: {}]   ;;  %s6711_s6 = inlined_call_operand.vmem [shape: bf16[16,256], index: 6, kind: input, shape index: {}]   ;;  %s6712_s7 = inlined_call_operand.vmem [shape: bf16[128,64], index: 7, kind: input, shape index: {}, may-alias: {7,11}]   ;;  %s6713_s8 = inlined_call_operand.vmem [shape: f32[1,64], index: 8, kind: input, shape index: {}, may-alias: {8,12}]   ;;  %s6714_s9 = inlined_call_operand.vmem [shape: f32[1,64], index: 9, kind: input, shape index: {}, may-alias: {9,13}]   ;;  %s6715_s10 = inlined_call_operand.vmem [shape: bf16[16,256], index: 10, kind: input, shape index: {}]   ;;  %s6716_s11 = inlined_call_operand.vmem [shape: bf16[128,64], index: 11, kind: input, shape index: {}, may-alias: {7,11}]   ;;  %s6717_s12 = inlined_call_operand.vmem [shape: f32[1,64], index: 12, kind: input, shape index: {}, may-alias: {8,12}]   ;;  %s6718_s13 = inlined_call_operand.vmem [shape: f32[1,64], index: 13, kind: input, shape index: {}, may-alias: {9,13}]   ;;  %s6719_s14 = inlined_call_operand.vmem [shape: bf16[32,256], index: 14, kind: input, shape index: {}]   ;;  %s6720_s15 = inlined_call_operand.vmem [shape: bf16[128,32], index: 15, kind: input, shape index: {}]   ;;  %s6721_s16 = inlined_call_operand.vmem [shape: f32[1,32], index: 16, kind: input, shape index: {}, may-alias: {16,20,24}]   ;;  %s6722_s17 = inlined_call_operand.vmem [shape: f32[1,32], index: 17, kind: input, shape index: {}, may-alias: {17,21,25}]   ;;  %s6723_s18 = inlined_call_operand.vmem [shape: bf16[32,512], index: 18, kind: input, shape index: {}]   ;;  %s6724_s19 = inlined_call_operand.vmem [shape: bf16[128,32], index: 19, kind: input, shape index: {}]   ;;  %s6725_s20 = inlined_call_operand.vmem [shape: f32[1,32], index: 20, kind: input, shape index: {}, may-alias: {16,20,24}]   ;;  %s6726_s21 = inlined_call_operand.vmem [shape: f32[1,32], index: 21, kind: input, shape index: {}, may-alias: {17,21,25}]   ;;  %s6727_s22 = inlined_call_operand.vmem [shape: bf16[32,16], index: 22, kind: input, shape index: {}]   ;;  %s6728_s23 = inlined_call_operand.vmem [shape: bf16[64,32], index: 23, kind: input, shape index: {}]   ;;  %s6729_s24 = inlined_call_operand.vmem [shape: f32[1,32], index: 24, kind: input, shape index: {}, may-alias: {16,20,24}]   ;;  %s6730_s25 = inlined_call_operand.vmem [shape: f32[1,32], index: 25, kind: input, shape index: {}, may-alias: {17,21,25}]   ;;  %s6731_s26 = inlined_call_operand.vmem [shape: bf16[32,16], index: 26, kind: input, shape index: {}]   ;;  %s6732_s27 = inlined_call_operand.hbm [shape: f32[2,1,16], index: 27, kind: output, shape index: {}]  }
   0x1   :  { %6805 = sst [smem:[#allocation16_spill]] %s6705_s0 }
   0x2   :  { %6806 = sst [smem:[#allocation17_spill]] %s6706_s1 }
   0x3   :  { %6807 = sst [smem:[#allocation18_spill]] %s6707_s2 }
   0x4   :  { %6808 = sst [smem:[#allocation19_spill]] %s6708_s3 }
   0x5   :  { %6809 = sst [smem:[#allocation20_spill]] %s6709_s4 }
   0x6   :  { %6810 = sst [smem:[#allocation21_spill]] %s6710_s5 }
   0x7   :  { %6811 = sst [smem:[#allocation22_spill]] %s6711_s6 }
   0x8   :  { %6812 = sst [smem:[#allocation23_spill]] %s6712_s7 }
   0x9   :  { %6813 = sst [smem:[#allocation24_spill]] %s6713_s8 }
   0xa   :  { %6814 = sst [smem:[#allocation25_spill]] %s6714_s9 }
   0xb   :  { %6815 = sst [smem:[#allocation26_spill]] %s6715_s10 }
   0xc   :  { %6816 = sst [smem:[#allocation27_spill]] %s6716_s11 }
   0xd   :  { %6817 = sst [smem:[#allocation28_spill]] %s6717_s12 }
   0xe   :  { %6818 = sst [smem:[#allocation29_spill]] %s6718_s13 }
   0xf   :  { %6819 = sst [smem:[#allocation30_spill]] %s6722_s17 }
  0x10   :  { %6820 = sst [smem:[#allocation31_spill]] %s6723_s18 }
  0x11   :  { %6821 = sst [smem:[#allocation32_spill]] %s6724_s19 }
  0x12   :  { %6822 = sst [smem:[#allocation33_spill]] %s6725_s20 }
  0x13   :  { %6823 = sst [smem:[#allocation34_spill]] %s6726_s21 }
  0x14   :  { %6824 = sst [smem:[#allocation35_spill]] %s6727_s22 }
  0x15   :  { %6825 = sst [smem:[#allocation36_spill]] %s6728_s23 }
  0x16   :  { %6826 = sst [smem:[#allocation37_spill]] %s6729_s24 }
  0x17   :  { %6827 = sst [smem:[#allocation38_spill]] %s6730_s25 }
  0x18   :  { %6828 = sst [smem:[#allocation39_spill]] %s6731_s26 }
  0x19   :  { %6829 = sst [smem:[#allocation40_spill]] %s6732_s27 }
  0x1a   :  { %32 = vsyncpa [#allocation5], 0 }
  0x1b   :  { %34 = vsyncpa [#allocation5 + $0x1], 0  ;;  %s5640_s7 = smov 0   ;;  %s5642_s4 = smov 0  }
  0x1c   :  { %s5644_s8 = smov 0   ;;  %s5646_s30 = smov 0  }
  0x1d LB: > { %6830 = sst [smem:[#allocation7_spill]] %s5466_s7  ;;  %s5661_s9 = sadd.s32 4294967295, %s5478_s30   ;;  %s5478_s30 = sphi %s5646_s30, %s6983_s30   ;;  %s5474_s8 = sphi %s5644_s8, %s6986_s8   ;;  %s5470_s4 = sphi %s5642_s4, %s6985_s4   ;;  %s5466_s7 = sphi %s5640_s7, %s6984_s7  }
  0x1e   : > { %6831 = sst [smem:[#allocation8_spill]] %s5470_s4  ;;  %s4439_s5 = sadd.s32 4294967294, %s5478_s30  }
  0x1f   : > { %6832 = sst [smem:[#allocation9_spill]] %s5474_s8  ;;  %s5665_s28 = sadd.s32 1, %s5478_s30  }
  0x20   : > { %6833 = sst [smem:[#allocation10_spill]] %s5478_s30  ;;  %s619_s0 = sadd.s32 1, %s5474_s8 }
  0x21   : > { %6834 = sst [smem:[#allocation11_spill]] %s5661_s9  ;;  %s616_s10 = ssub.s32 %s5478_s30, %s5665_s28 }
  0x22   : > { %6835 = sst [smem:[#allocation12_spill]] %s5665_s28  ;;  %p629_p0 = scmp.ne.s32.totalorder %s5474_s8, %s5470_s4 }
  0x23   : > { %p617_p1 = scmp.eq.s32.totalorder %s616_s10, 0  ;;  %p630_p2 = scmp.eq.s32.totalorder %s5661_s9, 1 }
  0x24   : > { %p635_p3 = scmp.ne.s32.totalorder %s5470_s4, %s5466_s7  ;;  %p636_p4 = scmp.eq.s32.totalorder %s4439_s5, 1 }
  0x25   : > { %s5676_s29 = scalar_select %p617_p1, %s5474_s8, %s619_s0  }
  0x26   : > { %p5678_p5 = por %p630_p2, %p629_p0  ;;  %p5682_p6 = por %p636_p4, %p635_p3 }
  0x27   : > { %6836 = sst [smem:[#allocation13_spill]] %s5676_s29  ;;  %p4442_p7 = scmp.ge.s32.totalorder %s5478_s30, 1 }
  0x28   : > { %s6837_s1 = scalar_select %p5678_p5, 1, 0 }
  0x29   : > { %s6839_s6 = scalar_select %p5682_p6, 1, 0 }
  0x2a   : > { %6838 = sst [smem:[#allocation14_spill]] %s6837_s1  ;;  %p740_p8 = scmp.lt.s32.totalorder %s5478_s30, 3 }
  0x2b   : > { %6840 = sst [smem:[#allocation15_spill]] %s6839_s6 }
  0x2c   : > { %p741_p9 = pnand %p4442_p7, %p740_p8 }
  0x2d   : > { %p811_p10 = scmp.lt.s32.totalorder (!%p741_p9), %s5661_s9, 1  ;;  %s6841_s0 = sld [smem:[#allocation16_spill]] (!%p741_p9) }
  0x2e   : > { %744 = sbr.rel (%p741_p9) target bundleno = 4482 (0x1182), region = 128  ;;  %s6842_s8 = sld [smem:[#allocation18_spill]] (!%p741_p9) }
  0x2f   : > { %s6844_s5 = sld [smem:[#allocation17_spill]] (!%p741_p9)  ;;  %s6747_s3 = smov (!%p741_p9), 1  }
  0x30   : > { %s6777_s29 = smov (!%p741_p9), 115   ;;  %s6757_s7 = smov (!%p741_p9), 121  }
  0x31   : > { %s6779_s6 = smov (!%p741_p9), 113   ;;  %s6858_s1 = sld [smem:[#allocation25_spill]] (!%p741_p9) }
  0x32   : > { %s6859_s27 = smov (!%p741_p9), 1   ;;  %s6865_s30 = smov (!%p741_p9), 115  }
  0x33   : > { %s812_s11 = scalar_select %p811_p10, %s5661_s9, 1  ;;  %v5480_v39 = vmov 128.0   ;;  %vm6770_vm7 = vcmask 3072   ;;  %vm1220_vm8 = vcmask 1043976   ;;  %vm6769_vm9 = vcmask 1047556  }
  0x34   : > { %s6843_s28 = smov %s6842_s8  ;;  %v5158_v4 = vld [vmem:[%s6842_s8 + $0x38] sm:$0xff]  ;;  %5374 = vrcp.f32 %v5480_v39  ;;  %vm1217_vm10 = vcmask 527368   ;;  %vm5796_vm11 = vmor %vm6769_vm9, %vm1220_vm8  ;;  %s6753_s8 = smov 116   ;;  %vm1477_vm12 = vcmask 924672   ;;  %vm1324_vm13 = vcmask 998400  }
  0x35   : > { %s5132_s2 = sshll.u32 %s812_s11, 7  ;;  %1050 = vmatpush.bf16.msra.mxu2 %v5158_v4  ;;  %v5157_v7 = vld [vmem:[%s6843_s28 + $0x30] sm:$0xff]  ;;  %v5156_v10 = vld [vmem:[%s6843_s28 + $0x28] sm:$0xff]  ;;  %v5155_v13 = vld [vmem:[%s6843_s28 + $0x20] sm:$0xff]  ;;  %s6847_s11 = sld [smem:[#allocation20_spill]]  ;;  %vm6794_vm14 = vcmask 932864  }
  0x36   : > { %s5693_s10 = scalar_lea.vmem %s6841_s0, %s5132_s2  ;;  %v5154_v16 = vld [vmem:[%s6843_s28 + $0x18] sm:$0xff]  ;;  %v4447_v19 = vld [vmem:[%s6844_s5] sm:$0xf]  ;;  %v5134_v20 = vld [vmem:[%s6844_s5 + $0x4] sm:$0xf0]  ;;  %s6845_s2 = sld [smem:[#allocation21_spill]] }
  0x37   : > { %v5142_v0 = vld [vmem:[%s5693_s10 + $0x38] sm:$0xff]  ;;  %v5141_v2 = vld [vmem:[%s5693_s10 + $0x30] sm:$0xff]  ;;  %v5140_v5 = vld [vmem:[%s5693_s10 + $0x28] sm:$0xff]  ;;  %v4448_v25 = vor.u32 %v5134_v20, %v4447_v19  ;;  %s6755_s0 = smov 118   ;;  %vm6804_vm15 = vcmask 941056   ;;  %vm6791_vm8 = vcmask 1039360  }
  0x38   : > { %v5150_v1 = vld [vmem:[%s5693_s10 + $0x78] sm:$0xff]  ;;  %957 = vmatpush.bf16.msra.mxu0 %v5142_v0  ;;  %v5149_v3 = vld [vmem:[%s5693_s10 + $0x70] sm:$0xff]  ;;  %v5148_v6 = vld [vmem:[%s5693_s10 + $0x68] sm:$0xff]  ;;  %vm1256_vm9 = vcmask 1031168   ;;  %s6860_s9 = smov 113   ;;  %s6869_s4 = smov 120  }
  0x39   : > { %971 = vmatpush.bf16.msra.mxu1 %v5150_v1  ;;  %v5139_v8 = vld [vmem:[%s5693_s10 + $0x20] sm:$0xff]  ;;  %1051 = vmatpush.bf16.msra.mxu2 %v5157_v7  ;;  %v5138_v11 = vld [vmem:[%s5693_s10 + $0x18] sm:$0xff]  ;;  %v5137_v14 = vld [vmem:[%s5693_s10 + $0x10] sm:$0xff]  ;;  %s6882_s24 = sld [smem:[#allocation27_spill]] }
  0x3a   : > { %v5147_v9 = vld [vmem:[%s5693_s10 + $0x60] sm:$0xff]  ;;  %v5146_v12 = vld [vmem:[%s5693_s10 + $0x58] sm:$0xff]  ;;  %v5145_v15 = vld [vmem:[%s5693_s10 + $0x50] sm:$0xff]  ;;  %v5375_v40 = vpop.eup %5374  ;;  %s6885_s22 = sld [smem:[#allocation26_spill]] }
  0x3b   : > { %v5136_v17 = vld [vmem:[%s5693_s10 + $0x8] sm:$0xff]  ;;  %v5133_v21 = vld [vmem:[%s6844_s5 + $0x4] sm:$0xf]  ;;  %v5153_v27 = vld [vmem:[%s6843_s28 + $0x10] sm:$0xff]  ;;  %v1069_v41 = vmul.f32 128.0, %v5375_v40  ;;  %vm1073_vm0 = vweird.f32 %v5375_v40  ;;  %s6892_s12 = sld [smem:[#allocation28_spill]] }
  0x3c   : > { %958 = vmatpush.bf16.msra.mxu0 %v5141_v2  ;;  %v5144_v18 = vld [vmem:[%s5693_s10 + $0x48] sm:$0xff]  ;;  %v5135_v22 = vld [vmem:[%s5693_s10] sm:$0xff]  ;;  %v5166_v54 = vld [vmem:[%s6845_s2 + $0x38] sm:$0xff]  ;;  %s6893_s13 = sld [smem:[#allocation29_spill]] }
  0x3d   : > { %972 = vmatpush.bf16.msra.mxu1 %v5149_v3  ;;  %1052 = vmatpush.bf16.msra.mxu2 %v5156_v10  ;;  %v5143_v23 = vld [vmem:[%s5693_s10 + $0x40] sm:$0xff]  ;;  %v4449_v24 = vld [vmem:[%s6844_s5 + $0x8] sm:$0xf0]  ;;  %v1070_v42 = vsub.f32 1.0, %v1069_v41  ;;  %v5165_v55 = vld [vmem:[%s6845_s2 + $0x30] sm:$0xff]  ;;  %s6846_s10 = sld [smem:[#allocation19_spill]] }
  0x3e   : > { %v4452_v26 = vor.u32 %v5133_v21, %v4449_v24  ;;  %v5152_v28 = vld [vmem:[%s6843_s28 + $0x8] sm:$0xff]  ;;  %v5151_v29 = vld [vmem:[%s6843_s28] sm:$0xff]  ;;  %1190 = vmatpush.bf16.msra.mxu3 %v5166_v54  ;;  %v5162_v58 = vld [vmem:[%s6845_s2 + $0x18] sm:$0xff]  ;;  %s6749_s28 = smov 123   ;;  %s6751_s5 = smov 125  }
  0x3f   : > { %v1071_v43 = vmul.f32 %v5375_v40, %v1070_v42  ;;  %v5164_v56 = vld [vmem:[%s6845_s2 + $0x28] sm:$0xff]  ;;  %v5163_v57 = vld [vmem:[%s6845_s2 + $0x20] sm:$0xff]  ;;  %v5161_v59 = vld [vmem:[%s6845_s2 + $0x10] sm:$0xff]  ;;  %s6909_s23 = sld [smem:[#allocation30_spill]] }
  0x40   : > { %959 = vmatpush.bf16.msra.mxu0 %v5140_v5  ;;  %v5160_v60 = vld [vmem:[%s6845_s2 + $0x8] sm:$0xff]  ;;  %v5159_v63 = vld [vmem:[%s6845_s2] sm:$0xff]  ;;  %s6862_s2 = smov 122   ;;  %s6948_s19 = sld [smem:[#allocation32_spill]] }
  0x41   : > { %973 = vmatpush.bf16.msra.mxu1 %v5148_v6  ;;  %1053 = vmatpush.bf16.msra.mxu2 %v5155_v13  ;;  %v1072_v44 = vadd.f32 %v5375_v40, %v1071_v43  ;;  %v5363_v20 = vld [vmem:[%s6847_s11] ss:$0 sm:$0xff]  ;;  %s6759_s11 = smov 114   ;;  %s6978_s21 = sld [smem:[#allocation40_spill]] }
  0x42   : > { %1191 = vmatpush.bf16.msra.mxu3 %v5165_v55 }
  0x43   : > { %v1074_v45 = vsel %vm1073_vm0, %v5375_v40, %v1072_v44  ;;  %vm1341_vm0 = vcmask 990208  }
  0x44   : > { %960 = vmatpush.bf16.msra.mxu0 %v5139_v8 }
  0x45   : > { %974 = vmatpush.bf16.msra.mxu1 %v5147_v9  ;;  %1054 = vmatpush.bf16.msra.mxu2 %v5154_v16  ;;  %v5362_v16 = vld [vmem:[%s6846_s10] ss:$0 sm:$0xff]  ;;  %s6763_s10 = smov 122  }
  0x46   : > { %1192 = vmatpush.bf16.msra.mxu3 %v5164_v56 }
  0x48   : > { %961 = vmatpush.bf16.msra.mxu0 %v5138_v11 }
  0x49   : > { %975 = vmatpush.bf16.msra.mxu1 %v5146_v12  ;;  %1055 = vmatpush.bf16.msra.mxu2 %v5153_v27 }
  0x4a   : > { %1193 = vmatpush.bf16.msra.mxu3 %v5163_v57 }
  0x4c   : > { %962 = vmatpush.bf16.msra.mxu0 %v5137_v14 }
  0x4d   : > { %976 = vmatpush.bf16.msra.mxu1 %v5145_v15  ;;  %1056 = vmatpush.bf16.msra.mxu2 %v5152_v28 }
  0x4e   : > { %1194 = vmatpush.bf16.msra.mxu3 %v5162_v58 }
  0x50   : > { %963 = vmatpush.bf16.msra.mxu0 %v5136_v17 }
  0x51   : > { %977 = vmatpush.bf16.msra.mxu1 %v5144_v18  ;;  %1057 = vmatpush.bf16.msra.mxu2 %v5151_v29  ;;  %v5481_v29 = vmov 0  }
  0x52   : > { %1195 = vmatpush.bf16.msra.mxu3 %v5161_v59  ;;  %1205 = vst.msk [vmem:[#allocation2] sm:$0xf] %vm6770_vm7, %v5481_v29 }
  0x53   : > { %1206 = vst.msk [vmem:[#allocation2 + $0x8] sm:$0xf] %vm6770_vm7, %v5481_v29 }
  0x54   : > { %964 = vmatpush.bf16.msra.mxu0 %v5135_v22  ;;  %3017 = vst.msk [vmem:[#allocation2 + $0x10] sm:$0xf] %vm6770_vm7, %v5481_v29 }
  0x55   : > { %978 = vmatpush.bf16.msra.mxu1 %v5143_v23  ;;  %3018 = vst.msk [vmem:[#allocation2 + $0x18] sm:$0xf] %vm6770_vm7, %v5481_v29 }
  0x56   : > { %1196 = vmatpush.bf16.msra.mxu3 %v5160_v60 }
  0x57   : > { %965 = vmatmul.bf16.vlgmr.msra.gmra.mxu0 %v4448_v25 }
  0x58   : > { %979 = vmatmul.bf16.vlgmr.msra.gmra.mxu1 %v4452_v26 }
  0x5a   : > { %1197 = vmatpush.bf16.msra.mxu3 %v5159_v63 }
  0xd4   : > { %v966_v30 = vpop.f32.mrf.mxu0 }
  0xd5   : > { %v980_v31 = vpop.f32.mrf.mxu1 }
  0xd6   : > { %v981_v34 = vadd.f32 %v980_v31, %v966_v30 }
  0xdc   : > { %v968_v32 = vpop.f32.mrf.mxu0 }
  0xdd   : > { %v982_v33 = vpop.f32.mrf.mxu1 }
  0xde   : > { %v983_v35 = vadd.f32 %v982_v33, %v968_v32 }
  0xe0   : > { %v985_v36 = vpack.c.bf16 %v983_v35, %v981_v34 }
  0xe2   : > { %1058 = vmatmul.bf16.vlgmr.msra.gmra.mxu2 %v985_v36 }
 0x165   : > { %v1059_v37 = vpop.f32.mrf.mxu2 }
 0x166   : > { %1064 = vadd.xlane.f32.xlu0 %v1059_v37 }
 0x16d   : > { %v1061_v38 = vpop.f32.mrf.mxu2 }
 0x16e   : > { %1066 = vadd.xlane.f32.xlu0 %v1061_v38 }
 0x1d9   : > { %v1065_v46 = vpop.xlane.xlu0 %1064 }
 0x1da   : > { %v1075_v47 = vmul.f32 %v1074_v45, %v1065_v46 }
 0x1dc   : > { %v1077_v48 = vsub.f32 %v1059_v37, %v1075_v47 }
 0x1de   : > { %v1079_v49 = vmul.f32 %v1077_v48, %v1077_v48 }
 0x1e0   : > { %1081 = vadd.xlane.f32.xlu1 %v1079_v49 }
 0x1e1   : > { %v1067_v50 = vpop.xlane.xlu0 %1066 }
 0x1e2   : > { %v1076_v51 = vmul.f32 %v1074_v45, %v1067_v50 }
 0x1e4   : > { %v1078_v52 = vsub.f32 %v1061_v38, %v1076_v51 }
 0x1e6   : > { %v1080_v53 = vmul.f32 %v1078_v52, %v1078_v52 }
 0x1e8   : > { %1083 = vadd.xlane.f32.xlu1 %v1080_v53 }
 0x253   : > { %v1082_v61 = vpop.xlane.xlu1 %1081 }
 0x254   : > { %v1085_v62 = vmul.f32 %v1082_v61, %v1074_v45 }
 0x256   : > { %v1087_v0 = vadd.f32 1e-05, %v1085_v62 }
 0x258   : > { %5376 = vrsqrt.f32 %v1087_v0  ;;  %vm1095_vm2 = vweird.f32 %v1087_v0 }
 0x25b   : > { %v1084_v1 = vpop.xlane.xlu1 %1083 }
 0x25c   : > { %v1086_v2 = vmul.f32 %v1084_v1, %v1074_v45 }
 0x25e   : > { %v5377_v3 = vpop.eup %5376  ;;  %v1088_v4 = vadd.f32 1e-05, %v1086_v2 }
 0x25f   : > { %v1090_v5 = vmul.f32 %v5377_v3, %v1087_v0  ;;  %vm1096_vm1 = vweird.f32 %v5377_v3 }
 0x260   : > { %5378 = vrsqrt.f32 %v1088_v4  ;;  %vm1097_vm3 = vmor %vm1095_vm2, %vm1096_vm1  ;;  %vm1105_vm5 = vweird.f32 %v1088_v4  ;;  %vm1290_vm1 = vcmask 1014784   ;;  %vm1307_vm2 = vcmask 1006592  }
 0x261   : > { %v1091_v6 = vmul.f32 %v5377_v3, %v1090_v5 }
 0x263   : > { %v1092_v7 = vmul.f32 0.5, %v1091_v6 }
 0x265   : > { %v1093_v8 = vsub.f32 1.5, %v1092_v7 }
 0x266   : > { %v5379_v9 = vpop.eup %5378 }
 0x267   : > { %v1094_v10 = vmul.f32 %v5377_v3, %v1093_v8  ;;  %v1100_v11 = vmul.f32 %v5379_v9, %v1088_v4  ;;  %vm1106_vm4 = vweird.f32 %v5379_v9 }
 0x268   : > { %vm1107_vm6 = vmor %vm1105_vm5, %vm1106_vm4  ;;  %vm6781_vm4 = vcmask 957440   ;;  %vm6793_vm5 = vcmask 949248  }
 0x269   : > { %v1101_v12 = vmul.f32 %v5379_v9, %v1100_v11  ;;  %v1098_v13 = vsel %vm1097_vm3, %v5377_v3, %v1094_v10  ;;  %vm6792_vm3 = vcmask 1022976  }
 0x26a   : > { %v1109_v15 = vmul.f32 %v1098_v13, %v1077_v48 }
 0x26b   : > { %v1102_v14 = vmul.f32 0.5, %v1101_v12 }
 0x26c   : > { %v1115_v19 = vmul.f32 %v5362_v16, %v1109_v15 }
 0x26d   : > { %v1103_v17 = vsub.f32 1.5, %v1102_v14 }
 0x26e   : > { %v1121_v24 = vadd.f32 %v5363_v20, %v1115_v19 }
 0x26f   : > { %v1104_v18 = vmul.f32 %v5379_v9, %v1103_v17 }
 0x270   : > { %v1123_v26 = vmax.f32 %v1121_v24, 0.0 }
 0x271   : > { %v1108_v21 = vsel %vm1107_vm6, %v5379_v9, %v1104_v18  ;;  %vm1392_vm6 = vcmask 965632  }
 0x272   : > { %v1110_v22 = vmul.f32 %v1108_v21, %v1078_v52 }
 0x274   : > { %v1116_v23 = vmul.f32 %v5362_v16, %v1110_v22 }
 0x276   : > { %v1122_v25 = vadd.f32 %v5363_v20, %v1116_v23 }
 0x278   : > { %v1124_v27 = vmax.f32 %v1122_v25, 0.0 }
 0x27a   : > { %v1125_v28 = vpack.c.bf16 %v1124_v27, %v1123_v26 }
 0x27c   : > { %1198 = vmatmul.bf16.vlgmr.msra.gmra.mxu3 %v1125_v28 }
 0x2ff   : > { %v5785_v30 = vpop.f32.mrf.mxu3 }
 0x300   : > { %v1207_v31 = vpack.c.bf16 %v5785_v30, %v5785_v30 }
 0x302   : > { %1211 = vrot.lane.b32.xlu2 %v1207_v31, %s6747_s3 }
 0x307   : > { %v5790_v32 = vpop.f32.mrf.mxu3 }
 0x308   : > { %v1208_v33 = vpack.c.bf16 %v5790_v32, %v5790_v32 }
 0x30a   : > { %1213 = vrot.lane.b32.xlu2 %v1208_v33, %s6747_s3  ;;  %s6775_s3 = smov 126  }
 0x35c   : > { %v1212_v35 = vpop.permute.xlu2 %1211 }
 0x35d   : > { %1218 = vst.msk [vmem:[#allocation2] sm:$0xf] %vm1217_vm10, %v1212_v35 }
 0x35e   : > { %1223 = vst.msk [vmem:[#allocation2] sm:$0xff] %vm5796_vm11, %v5481_v29 }
 0x364   : > { %v1214_v36 = vpop.permute.xlu2 %1213 }
 0x365   : > { %v1225_v37 = vld [vmem:[#allocation2] sm:$0xf]  ;;  %1219 = vst.msk [vmem:[#allocation2 + $0x8] sm:$0xf] %vm1217_vm10, %v1214_v36 }
 0x366   : > { %v1433_v38 = vld [vmem:[#allocation2] sm:$0xff]  ;;  %1227 = vst [vmem:[#allocation3] sm:$0xf] %v1225_v37 }
 0x367   : > { %1437 = vrot.lane.b32.xlu1 %v1433_v38, %s6777_s29  ;;  %1335 = vrot.lane.b32.xlu0 %v1433_v38, %s6757_s7  ;;  %1224 = vst.msk [vmem:[#allocation2 + $0x8] sm:$0xff] %vm5796_vm11, %v5481_v29 }
 0x368   : > { %1471 = vrot.lane.b32.xlu2 %v1433_v38, %s6779_s6  ;;  %1797 = vst.msk [vmem:[#allocation2] sm:$0xf] %vm6770_vm7, %v5481_v29 }
 0x36e   : > { %v1226_v39 = vld [vmem:[#allocation2 + $0x8] sm:$0xf] }
 0x36f   : > { %1301 = vrot.lane.b32.xlu0 %v1433_v38, %s6749_s28  ;;  %1267 = vrot.lane.b32.xlu1 %v1433_v38, %s6751_s5  ;;  %1228 = vst [vmem:[#allocation3 + $0x4] sm:$0xf] %v1226_v39  ;;  %v1332_v40 = vld [vmem:[#allocation2 + $0x8] sm:$0xff]  ;;  %s6765_s28 = smov 124   ;;  %s6761_s5 = smov 119  }
 0x370   : > { %1318 = vrot.lane.b32.xlu2 %v1433_v38, %s6763_s10  ;;  %1798 = vst.msk [vmem:[#allocation2 + $0x8] sm:$0xf] %vm6770_vm7, %v5481_v29  ;;  %vm6789_vm7 = vcmask 973824  }
 0x377   : > { %1420 = vrot.lane.b32.xlu0 %v1433_v38, %s6753_s8  ;;  %1386 = vrot.lane.b32.xlu1 %v1433_v38, %s6755_s0  ;;  %s6767_s8 = smov 117   ;;  %s6773_s0 = smov 127  }
 0x378   : > { %1454 = vrot.lane.b32.xlu2 %v1433_v38, %s6759_s11 }
 0x37f   : > { %1250 = vrot.lane.b32.xlu0 %v1433_v38, %s6775_s3  ;;  %1337 = vrot.lane.b32.xlu1 %v1332_v40, %s6757_s7  ;;  %s6850_s7 = smov 125  }
 0x380   : > { %1284 = vrot.lane.b32.xlu2 %v1433_v38, %s6765_s28 }
 0x387   : > { %1369 = vrot.lane.b32.xlu0 %v1433_v38, %s6761_s5  ;;  %1456 = vrot.lane.b32.xlu1 %v1332_v40, %s6759_s11  ;;  %s6851_s11 = smov 123   ;;  %s6852_s5 = smov 118  }
 0x388   : > { %1403 = vrot.lane.b32.xlu2 %v1433_v38, %s6767_s8 }
 0x38f   : > { %1320 = vrot.lane.b32.xlu0 %v1332_v40, %s6763_s10  ;;  %1286 = vrot.lane.b32.xlu1 %v1332_v40, %s6765_s28  ;;  %s6771_s10 = smov 120   ;;  %s6853_s28 = smov 116  }
 0x390   : > { %1233 = vrot.lane.b32.xlu2 %v1433_v38, %s6773_s0 }
 0x397   : > { %1439 = vrot.lane.b32.xlu0 %v1332_v40, %s6777_s29  ;;  %1405 = vrot.lane.b32.xlu1 %v1332_v40, %s6767_s8  ;;  %s6854_s8 = smov 119   ;;  %s6856_s29 = sld [smem:[#allocation22_spill]] }
 0x398   : > { %1473 = vrot.lane.b32.xlu2 %v1332_v40, %s6779_s6  ;;  %s6864_s6 = smov 114  }
 0x39f   : > { %1269 = vrot.lane.b32.xlu0 %v1332_v40, %s6850_s7  ;;  %1235 = vrot.lane.b32.xlu1 %v1332_v40, %s6773_s0  ;;  %s6857_s0 = sld [smem:[#allocation24_spill]] }
 0x3a0   : > { %1303 = vrot.lane.b32.xlu2 %v1332_v40, %s6851_s11 }
 0x3a7   : > { %1388 = vrot.lane.b32.xlu0 %v1332_v40, %s6852_s5  ;;  %1352 = vrot.lane.b32.xlu1 %v1433_v38, %s6771_s10 }
 0x3a8   : > { %1422 = vrot.lane.b32.xlu2 %v1332_v40, %s6853_s28 }
 0x3af   : > { %1354 = vrot.lane.b32.xlu0 %v1332_v40, %s6771_s10  ;;  %s6861_s10 = smov 121  }
 0x3b0   : > { %1252 = vrot.lane.b32.xlu2 %v1332_v40, %s6775_s3  ;;  %s6855_s3 = sld [smem:[#allocation23_spill]] }
 0x3b8   : > { %1371 = vrot.lane.b32.xlu2 %v1332_v40, %s6854_s8 }
 0x3c2   : > { %v1472_v41 = vpop.permute.xlu2 %1471 }
 0x3c3   : > { %v1475_v42 = vrot.slane %v1472_v41, 4 }
 0x3c5   : > { %v1478_v43 = vsel %vm1477_vm12, %v1472_v41, %v1475_v42 }
 0x3c6   : > { %1482 = vst [vmem:[#allocation3 + $0x78] sm:$0xf] %v1478_v43 }
 0x3ca   : > { %v1319_v44 = vpop.permute.xlu2 %1318 }
 0x3cb   : > { %v1322_v45 = vrot.slane %v1319_v44, 4 }
 0x3cd   : > { %v1325_v46 = vsel %vm1324_vm13, %v1319_v44, %v1322_v45 }
 0x3ce   : > { %1329 = vst [vmem:[#allocation3 + $0x30] sm:$0xf] %v1325_v46 }
 0x3d2   : > { %v1455_v47 = vpop.permute.xlu2 %1454 }
 0x3d3   : > { %v1458_v48 = vrot.slane %v1455_v47, 4 }
 0x3d5   : > { %v1461_v49 = vsel %vm6794_vm14, %v1455_v47, %v1458_v48 }
 0x3d6   : > { %1465 = vst [vmem:[#allocation3 + $0x70] sm:$0xf] %v1461_v49 }
 0x3d9   : > { %v1438_v50 = vpop.permute.xlu1 %1437  ;;  %v1336_v51 = vpop.permute.xlu0 %1335 }
 0x3da   : > { %v1441_v52 = vrot.slane %v1438_v50, 4  ;;  %v1339_v53 = vrot.slane %v1336_v51, 4  ;;  %v1285_v54 = vpop.permute.xlu2 %1284 }
 0x3db   : > { %v1288_v55 = vrot.slane %v1285_v54, 4 }
 0x3dc   : > { %v1444_v56 = vsel %vm6804_vm15, %v1438_v50, %v1441_v52  ;;  %v1342_v57 = vsel %vm1341_vm0, %v1336_v51, %v1339_v53 }
 0x3dd   : > { %1448 = vst [vmem:[#allocation3 + $0x68] sm:$0xf] %v1444_v56  ;;  %v1291_v58 = vsel %vm1290_vm1, %v1285_v54, %v1288_v55 }
 0x3de   : > { %1346 = vst [vmem:[#allocation3 + $0x38] sm:$0xf] %v1342_v57 }
 0x3df   : > { %1295 = vst [vmem:[#allocation3 + $0x20] sm:$0xf] %v1291_v58 }
 0x3e1   : > { %v1302_v59 = vpop.permute.xlu0 %1301  ;;  %v1268_v60 = vpop.permute.xlu1 %1267 }
 0x3e2   : > { %v1305_v61 = vrot.slane %v1302_v59, 4  ;;  %v1271_v62 = vrot.slane %v1268_v60, 4  ;;  %v1404_v63 = vpop.permute.xlu2 %1403 }
 0x3e3   : > { %v1407_v0 = vrot.slane %v1404_v63, 4 }
 0x3e4   : > { %v1308_v1 = vsel %vm1307_vm2, %v1302_v59, %v1305_v61  ;;  %v1274_v2 = vsel %vm6792_vm3, %v1268_v60, %v1271_v62  ;;  %v5192_v60 = vld [vmem:[%s6855_s3 + $0x38] sm:$0xff] }
 0x3e5   : > { %1312 = vst [vmem:[#allocation3 + $0x28] sm:$0xf] %v1308_v1  ;;  %v1410_v3 = vsel %vm6781_vm4, %v1404_v63, %v1407_v0  ;;  %1717 = vmatpush.bf16.msrb.mxu2 %v5192_v60  ;;  %v5191_v1 = vld [vmem:[%s6855_s3 + $0x30] sm:$0xff] }
 0x3e6   : > { %1278 = vst [vmem:[#allocation3 + $0x18] sm:$0xf] %v1274_v2 }
 0x3e7   : > { %1414 = vst [vmem:[#allocation3 + $0x58] sm:$0xf] %v1410_v3 }
 0x3e9   : > { %v1421_v4 = vpop.permute.xlu0 %1420  ;;  %v1387_v5 = vpop.permute.xlu1 %1386  ;;  %1718 = vmatpush.bf16.msrb.mxu2 %v5191_v1 }
 0x3ea   : > { %v1424_v6 = vrot.slane %v1421_v4, 4  ;;  %v1390_v7 = vrot.slane %v1387_v5, 4  ;;  %v1234_v8 = vpop.permute.xlu2 %1233 }
 0x3eb   : > { %v1237_v9 = vrot.slane %v1234_v8, 4 }
 0x3ec   : > { %v1427_v10 = vsel %vm6793_vm5, %v1421_v4, %v1424_v6  ;;  %v1393_v11 = vsel %vm1392_vm6, %v1387_v5, %v1390_v7  ;;  %v5190_v7 = vld [vmem:[%s6855_s3 + $0x28] sm:$0xff] }
 0x3ed   : > { %1431 = vst [vmem:[#allocation3 + $0x60] sm:$0xf] %v1427_v10  ;;  %v1240_v12 = vsel %vm6791_vm8, %v1234_v8, %v1237_v9  ;;  %1719 = vmatpush.bf16.msrb.mxu2 %v5190_v7 }
 0x3ee   : > { %1397 = vst [vmem:[#allocation3 + $0x50] sm:$0xf] %v1393_v11 }
 0x3ef   : > { %1244 = vst [vmem:[#allocation3 + $0x8] sm:$0xf] %v1240_v12 }
 0x3f1   : > { %v1251_v13 = vpop.permute.xlu0 %1250  ;;  %v1338_v14 = vpop.permute.xlu1 %1337 }
 0x3f2   : > { %v1254_v15 = vrot.slane %v1251_v13, 4  ;;  %v1340_v16 = vrot.slane %v1338_v14, 4  ;;  %v1474_v17 = vpop.permute.xlu2 %1473 }
 0x3f3   : > { %v1476_v18 = vrot.slane %v1474_v17, 4 }
 0x3f4   : > { %v1257_v19 = vsel %vm1256_vm9, %v1251_v13, %v1254_v15  ;;  %v1343_v20 = vsel %vm1341_vm0, %v1338_v14, %v1340_v16  ;;  %v5189_v13 = vld [vmem:[%s6855_s3 + $0x20] sm:$0xff] }
 0x3f5   : > { %1261 = vst [vmem:[#allocation3 + $0x10] sm:$0xf] %v1257_v19  ;;  %v1479_v21 = vsel %vm1477_vm12, %v1474_v17, %v1476_v18  ;;  %1720 = vmatpush.bf16.msrb.mxu2 %v5189_v13 }
 0x3f6   : > { %1347 = vst [vmem:[#allocation3 + $0x3c] sm:$0xf] %v1343_v20 }
 0x3f7   : > { %1483 = vst [vmem:[#allocation3 + $0x7c] sm:$0xf] %v1479_v21 }
 0x3f9   : > { %v1370_v22 = vpop.permute.xlu0 %1369  ;;  %v1457_v23 = vpop.permute.xlu1 %1456 }
 0x3fa   : > { %v1373_v24 = vrot.slane %v1370_v22, 4  ;;  %v1459_v25 = vrot.slane %v1457_v23, 4  ;;  %v1304_v26 = vpop.permute.xlu2 %1303 }
 0x3fb   : > { %v1306_v27 = vrot.slane %v1304_v26, 4 }
 0x3fc   : > { %v1376_v28 = vsel %vm6789_vm7, %v1370_v22, %v1373_v24  ;;  %v1462_v31 = vsel %vm6794_vm14, %v1457_v23, %v1459_v25  ;;  %v5169_v24 = vld [vmem:[#allocation3] sm:$0xff] }
 0x3fd   : > { %1380 = vst [vmem:[#allocation3 + $0x48] sm:$0xf] %v1376_v28  ;;  %v1309_v33 = vsel %vm1307_vm2, %v1304_v26, %v1306_v27  ;;  %v5176_v35 = vld [vmem:[#allocation3 + $0x38] sm:$0xff]  ;;  %v4583_v25 = vld [vmem:[%s6856_s29] sm:$0xf] }
 0x3fe   : > { %1466 = vst [vmem:[#allocation3 + $0x74] sm:$0xf] %v1462_v31  ;;  %v5184_v36 = vld [vmem:[#allocation3 + $0x78] sm:$0xff]  ;;  %1624 = vmatpush.bf16.msrb.mxu0 %v5176_v35  ;;  %v5168_v26 = vld [vmem:[%s6856_s29 + $0x4] sm:$0xf0] }
 0x3ff   : > { %1313 = vst [vmem:[#allocation3 + $0x2c] sm:$0xf] %v1309_v33  ;;  %1638 = vmatpush.bf16.msrb.mxu1 %v5184_v36  ;;  %v4584_v28 = vor.u32 %v5168_v26, %v4583_v25  ;;  %v5167_v31 = vld [vmem:[%s6856_s29 + $0x4] sm:$0xf]  ;;  %v4585_v33 = vld [vmem:[%s6856_s29 + $0x8] sm:$0xf0] }
 0x400   : > { %v4588_v36 = vor.u32 %v5167_v31, %v4585_v33  ;;  %s6868_s29 = smov 117  }
 0x401   : > { %v1321_v37 = vpop.permute.xlu0 %1320  ;;  %v1287_v38 = vpop.permute.xlu1 %1286 }
 0x402   : > { %v1323_v39 = vrot.slane %v1321_v37, 4  ;;  %v1289_v40 = vrot.slane %v1287_v38, 4  ;;  %v1423_v41 = vpop.permute.xlu2 %1422 }
 0x403   : > { %v1425_v42 = vrot.slane %v1423_v41, 4 }
 0x404   : > { %v1326_v43 = vsel %vm1324_vm13, %v1321_v37, %v1323_v39  ;;  %v1292_v44 = vsel %vm1290_vm1, %v1287_v38, %v1289_v40  ;;  %v5188_v37 = vld [vmem:[%s6855_s3 + $0x18] sm:$0xff]  ;;  %v5187_v38 = vld [vmem:[%s6855_s3 + $0x10] sm:$0xff]  ;;  %v5186_v39 = vld [vmem:[%s6855_s3 + $0x8] sm:$0xff] }
 0x405   : > { %1330 = vst [vmem:[#allocation3 + $0x34] sm:$0xf] %v1326_v43  ;;  %v1428_v45 = vsel %vm6793_vm5, %v1423_v41, %v1425_v42  ;;  %v5183_v46 = vld [vmem:[#allocation3 + $0x70] sm:$0xff]  ;;  %1721 = vmatpush.bf16.msrb.mxu2 %v5188_v37  ;;  %v5185_v40 = vld [vmem:[%s6855_s3] sm:$0xff]  ;;  %s6867_s3 = smov 127  }
 0x406   : > { %1296 = vst [vmem:[#allocation3 + $0x24] sm:$0xf] %v1292_v44  ;;  %1639 = vmatpush.bf16.msrb.mxu1 %v5183_v46  ;;  %v5174_v57 = vld [vmem:[#allocation3 + $0x28] sm:$0xff] }
 0x407   : > { %1432 = vst [vmem:[#allocation3 + $0x64] sm:$0xf] %v1428_v45 }
 0x409   : > { %v1440_v47 = vpop.permute.xlu0 %1439  ;;  %v1406_v48 = vpop.permute.xlu1 %1405  ;;  %1722 = vmatpush.bf16.msrb.mxu2 %v5187_v38 }
 0x40a   : > { %v1442_v49 = vrot.slane %v1440_v47, 4  ;;  %v1408_v50 = vrot.slane %v1406_v48, 4  ;;  %v1253_v51 = vpop.permute.xlu2 %1252 }
 0x40b   : > { %v1255_v52 = vrot.slane %v1253_v51, 4 }
 0x40c   : > { %v1445_v53 = vsel %vm6804_vm15, %v1440_v47, %v1442_v49  ;;  %v1411_v54 = vsel %vm6781_vm4, %v1406_v48, %v1408_v50  ;;  %v5175_v55 = vld [vmem:[#allocation3 + $0x30] sm:$0xff]  ;;  %vm6788_vm4 = vcmask 982016  }
 0x40d   : > { %1449 = vst [vmem:[#allocation3 + $0x6c] sm:$0xf] %v1445_v53  ;;  %v1258_v56 = vsel %vm1256_vm9, %v1253_v51, %v1255_v52  ;;  %1625 = vmatpush.bf16.msrb.mxu0 %v5175_v55  ;;  %v5173_v4 = vld [vmem:[#allocation3 + $0x20] sm:$0xff]  ;;  %1723 = vmatpush.bf16.msrb.mxu2 %v5186_v39  ;;  %v5498_v52 = vmov 64.0  }
 0x40e   : > { %1415 = vst [vmem:[#allocation3 + $0x5c] sm:$0xf] %v1411_v54  ;;  %v5181_v8 = vld [vmem:[#allocation3 + $0x60] sm:$0xff]  ;;  %5380 = vrcp.f32 %v5498_v52 }
 0x40f   : > { %1262 = vst [vmem:[#allocation3 + $0x14] sm:$0xf] %v1258_v56 }
 0x411   : > { %v1270_v58 = vpop.permute.xlu0 %1269  ;;  %v1236_v59 = vpop.permute.xlu1 %1235  ;;  %1626 = vmatpush.bf16.msrb.mxu0 %v5174_v57  ;;  %1724 = vmatpush.bf16.msrb.mxu2 %v5185_v40 }
 0x412   : > { %v1272_v61 = vrot.slane %v1270_v58, 4  ;;  %v1238_v62 = vrot.slane %v1236_v59, 4  ;;  %v1372_v63 = vpop.permute.xlu2 %1371 }
 0x413   : > { %v1374_v0 = vrot.slane %v1372_v63, 4 }
 0x414   : > { %v1275_v2 = vsel %vm6792_vm3, %v1270_v58, %v1272_v61  ;;  %v1241_v3 = vsel %vm6791_vm8, %v1236_v59, %v1238_v62  ;;  %v5182_v5 = vld [vmem:[#allocation3 + $0x68] sm:$0xff]  ;;  %v5381_v53 = vpop.eup %5380 }
 0x415   : > { %1279 = vst [vmem:[#allocation3 + $0x1c] sm:$0xf] %v1275_v2  ;;  %v1377_v6 = vsel %vm6789_vm7, %v1372_v63, %v1374_v0  ;;  %1627 = vmatpush.bf16.msrb.mxu0 %v5173_v4  ;;  %1640 = vmatpush.bf16.msrb.mxu1 %v5182_v5  ;;  %v5180_v17 = vld [vmem:[#allocation3 + $0x58] sm:$0xff]  ;;  %v1739_v54 = vmul.f32 64.0, %v5381_v53  ;;  %vm1743_vm7 = vweird.f32 %v5381_v53 }
 0x416   : > { %1245 = vst [vmem:[#allocation3 + $0xc] sm:$0xf] %v1241_v3  ;;  %v5171_v18 = vld [vmem:[#allocation3 + $0x10] sm:$0xff] }
 0x417   : > { %1381 = vst [vmem:[#allocation3 + $0x4c] sm:$0xf] %v1377_v6  ;;  %v1740_v55 = vsub.f32 1.0, %v1739_v54 }
 0x419   : > { %v1389_v9 = vpop.permute.xlu0 %1388  ;;  %v1353_v10 = vpop.permute.xlu1 %1352  ;;  %1641 = vmatpush.bf16.msrb.mxu1 %v5181_v8  ;;  %v1741_v56 = vmul.f32 %v5381_v53, %v1740_v55 }
 0x41a   : > { %v1391_v11 = vrot.slane %v1389_v9, 4  ;;  %v1356_v12 = vrot.slane %v1353_v10, 4 }
 0x41b   : > { %v1742_v57 = vadd.f32 %v5381_v53, %v1741_v56 }
 0x41c   : > { %v1394_v14 = vsel %vm1392_vm6, %v1389_v9, %v1391_v11  ;;  %v1359_v15 = vsel %vm6788_vm4, %v1353_v10, %v1356_v12  ;;  %v5172_v16 = vld [vmem:[#allocation3 + $0x18] sm:$0xff] }
 0x41d   : > { %1398 = vst [vmem:[#allocation3 + $0x54] sm:$0xf] %v1394_v14  ;;  %1628 = vmatpush.bf16.msrb.mxu0 %v5172_v16  ;;  %1642 = vmatpush.bf16.msrb.mxu1 %v5180_v17  ;;  %v5170_v22 = vld [vmem:[#allocation3 + $0x8] sm:$0xff]  ;;  %v5910_v58 = vsel %vm1743_vm7, %v5381_v53, %v1742_v57 }
 0x41e   : > { %1363 = vst [vmem:[#allocation3 + $0x40] sm:$0xf] %v1359_v15  ;;  %v5178_v27 = vld [vmem:[#allocation3 + $0x48] sm:$0xff] }
 0x421   : > { %v1355_v19 = vpop.permute.xlu0 %1354  ;;  %1629 = vmatpush.bf16.msrb.mxu0 %v5171_v18 }
 0x422   : > { %v1357_v20 = vrot.slane %v1355_v19, 4 }
 0x424   : > { %v1360_v21 = vsel %vm6788_vm4, %v1355_v19, %v1357_v20  ;;  %v5179_v23 = vld [vmem:[#allocation3 + $0x50] sm:$0xff]  ;;  %vm6790_vm4 = vcmask 523264   ;;  %v5364_v19 = vld [vmem:[%s6857_s0] ss:$0 sm:$0xff]  ;;  %s6863_s0 = smov 124  }
 0x425   : > { %1364 = vst [vmem:[#allocation3 + $0x44] sm:$0xf] %v1360_v21  ;;  %1630 = vmatpush.bf16.msrb.mxu0 %v5170_v22  ;;  %1643 = vmatpush.bf16.msrb.mxu1 %v5179_v23  ;;  %v5365_v23 = vld [vmem:[%s6858_s1] ss:$0 sm:$0xff]  ;;  %s6866_s1 = smov 126  }
 0x429   : > { %1631 = vmatpush.bf16.msrb.mxu0 %v5169_v24  ;;  %1644 = vmatpush.bf16.msrb.mxu1 %v5178_v27 }
 0x42c   : > { %v5177_v35 = vld [vmem:[#allocation3 + $0x40] sm:$0xff]  ;;  %1632 = vmatmul.bf16.vlgmr.msrb.gmra.mxu0 %v4584_v28 }
 0x42d   : > { %1645 = vmatpush.bf16.msrb.mxu1 %v5177_v35 }
 0x430   : > { %1646 = vmatmul.bf16.vlgmr.msrb.gmra.mxu1 %v4588_v36 }
 0x4a9   : > { %v1633_v41 = vpop.f32.mrf.mxu0 }
 0x4ad   : > { %v1647_v42 = vpop.f32.mrf.mxu1 }
 0x4ae   : > { %v1648_v45 = vadd.f32 %v1647_v42, %v1633_v41 }
 0x4b1   : > { %v1635_v43 = vpop.f32.mrf.mxu0 }
 0x4b5   : > { %v1649_v44 = vpop.f32.mrf.mxu1 }
 0x4b6   : > { %v1650_v46 = vadd.f32 %v1649_v44, %v1635_v43 }
 0x4b8   : > { %v1652_v47 = vpack.c.bf16 %v1650_v46, %v1648_v45 }
 0x4ba   : > { %1725 = vmatmul.bf16.vlgmr.msrb.gmra.mxu2 %v1652_v47 }
 0x53d   : > { %v1726_v48 = vpop.f32.mrf.mxu2 }
 0x53e   : > { %v1732_v49 = vsel %vm6790_vm4, %v1726_v48, 0.0 }
 0x53f   : > { %1733 = vadd.xlane.f32.xlu2 %v1732_v49 }
 0x545   : > { %v1728_v50 = vpop.f32.mrf.mxu2 }
 0x546   : > { %v1735_v51 = vsel %vm6790_vm4, %v1728_v50, 0.0 }
 0x547   : > { %1736 = vadd.xlane.f32.xlu1 %v1735_v51 }
 0x5b2   : > { %v1734_v59 = vpop.xlane.xlu2 %1733 }
 0x5b3   : > { %v1745_v60 = vmul.f32 %v5910_v58, %v1734_v59 }
 0x5b5   : > { %v1747_v61 = vsub.f32 %v1726_v48, %v1745_v60 }
 0x5b7   : > { %v1749_v62 = vmul.f32 %v1747_v61, %v1747_v61 }
 0x5b9   : > { %v1751_v63 = vsel %vm6790_vm4, %v1749_v62, 0.0 }
 0x5ba   : > { %1752 = vadd.xlane.f32.xlu0 %v1751_v63  ;;  %v1737_v0 = vpop.xlane.xlu1 %1736 }
 0x5bb   : > { %v1746_v1 = vmul.f32 %v5910_v58, %v1737_v0 }
 0x5bd   : > { %v1748_v2 = vsub.f32 %v1728_v50, %v1746_v1 }
 0x5bf   : > { %v1750_v3 = vmul.f32 %v1748_v2, %v1748_v2 }
 0x5c1   : > { %v1754_v4 = vsel %vm6790_vm4, %v1750_v3, 0.0 }
 0x5c2   : > { %1755 = vadd.xlane.f32.xlu2 %v1754_v4 }
 0x62d   : > { %v1753_v5 = vpop.xlane.xlu0 %1752 }
 0x62e   : > { %v1757_v6 = vmul.f32 %v1753_v5, %v5910_v58 }
 0x630   : > { %v1759_v7 = vadd.f32 1e-05, %v1757_v6 }
 0x632   : > { %5382 = vrsqrt.f32 %v1759_v7  ;;  %vm1767_vm4 = vweird.f32 %v1759_v7 }
 0x635   : > { %v1756_v8 = vpop.xlane.xlu2 %1755 }
 0x636   : > { %v1758_v9 = vmul.f32 %v1756_v8, %v5910_v58 }
 0x638   : > { %v5383_v10 = vpop.eup %5382  ;;  %v1760_v11 = vadd.f32 1e-05, %v1758_v9 }
 0x639   : > { %v1762_v12 = vmul.f32 %v5383_v10, %v1759_v7  ;;  %vm1768_vm7 = vweird.f32 %v5383_v10 }
 0x63a   : > { %5384 = vrsqrt.f32 %v1760_v11  ;;  %vm1769_vm8 = vmor %vm1767_vm4, %vm1768_vm7  ;;  %vm1777_vm5 = vweird.f32 %v1760_v11  ;;  %vm6872_vm4 = vcmask 1022976   ;;  %vm6875_vm7 = vcmask 957440  }
 0x63b   : > { %v1763_v13 = vmul.f32 %v5383_v10, %v1762_v12 }
 0x63d   : > { %v1764_v14 = vmul.f32 0.5, %v1763_v13 }
 0x63f   : > { %v1765_v15 = vsub.f32 1.5, %v1764_v14 }
 0x640   : > { %v5385_v16 = vpop.eup %5384 }
 0x641   : > { %v1766_v17 = vmul.f32 %v5383_v10, %v1765_v15  ;;  %v1772_v18 = vmul.f32 %v5385_v16, %v1760_v11  ;;  %vm1778_vm3 = vweird.f32 %v5385_v16 }
 0x642   : > { %vm1779_vm14 = vmor %vm1777_vm5, %vm1778_vm3  ;;  %vm6871_vm3 = vcmask 949248  }
 0x643   : > { %v1773_v20 = vmul.f32 %v5385_v16, %v1772_v18  ;;  %v1770_v21 = vsel %vm1769_vm8, %v5383_v10, %v1766_v17  ;;  %vm6874_vm8 = vcmask 1039360  }
 0x644   : > { %v1781_v22 = vmul.f32 %v1770_v21, %v1747_v61 }
 0x645   : > { %v1774_v24 = vmul.f32 0.5, %v1773_v20 }
 0x646   : > { %v1787_v25 = vmul.f32 %v5364_v19, %v1781_v22 }
 0x647   : > { %v1775_v26 = vsub.f32 1.5, %v1774_v24 }
 0x648   : > { %v1793_v27 = vadd.f32 %v5365_v23, %v1787_v25 }
 0x649   : > { %v1776_v28 = vmul.f32 %v5385_v16, %v1775_v26 }
 0x64a   : > { %v1795_v31 = vmax.f32 %v1793_v27, 0.0 }
 0x64b   : > { %v1780_v33 = vsel %vm1779_vm14, %v5385_v16, %v1776_v28  ;;  %vm6870_vm14 = vcmask 932864  }
 0x64c   : > { %v1799_v35 = vpack.c.bf16 %v1795_v31, %v1795_v31  ;;  %v1782_v36 = vmul.f32 %v1780_v33, %v1748_v2  ;;  %vm6873_vm5 = vmmov %vm6870_vm14 }
 0x64e   : > { %1803 = vrot.lane.b32.xlu1 %v1799_v35, %s6859_s27  ;;  %v1788_v37 = vmul.f32 %v5364_v19, %v1782_v36 }
 0x650   : > { %v1794_v38 = vadd.f32 %v5365_v23, %v1788_v37 }
 0x652   : > { %v1796_v39 = vmax.f32 %v1794_v38, 0.0 }
 0x654   : > { %v1800_v40 = vpack.c.bf16 %v1796_v39, %v1796_v39 }
 0x656   : > { %1805 = vrot.lane.b32.xlu0 %v1800_v40, %s6859_s27 }
 0x6c0   : > { %v1804_v41 = vpop.permute.xlu1 %1803 }
 0x6c1   : > { %1809 = vst.msk [vmem:[#allocation2] sm:$0xf] %vm1217_vm10, %v1804_v41 }
 0x6c2   : > { %1811 = vst.msk [vmem:[#allocation2] sm:$0xff] %vm5796_vm11, %v5481_v29 }
 0x6c8   : > { %v1806_v42 = vpop.permute.xlu0 %1805 }
 0x6c9   : > { %1810 = vst.msk [vmem:[#allocation2 + $0x8] sm:$0xf] %vm1217_vm10, %v1806_v42  ;;  %v2041_v43 = vld [vmem:[#allocation2] sm:$0xff] }
 0x6ca   : > { %1812 = vst.msk [vmem:[#allocation2 + $0x8] sm:$0xff] %vm5796_vm11, %v5481_v29  ;;  %2045 = vrot.lane.b32.xlu0 %v2041_v43, %s6860_s9  ;;  %1917 = vrot.lane.b32.xlu2 %v2041_v43, %s6861_s10  ;;  %v1813_v40 = vld [vmem:[#allocation2] sm:$0xf] }
 0x6cb   : > { %1901 = vrot.lane.b32.xlu1 %v2041_v43, %s6862_s2  ;;  %1815 = vst [vmem:[#allocation3] sm:$0xf] %v1813_v40 }
 0x6d1   : > { %v2042_v44 = vld [vmem:[#allocation2 + $0x8] sm:$0xff] }
 0x6d2   : > { %1885 = vrot.lane.b32.xlu2 %v2041_v43, %s6851_s11  ;;  %1869 = vrot.lane.b32.xlu0 %v2041_v43, %s6863_s0  ;;  %v1814_v41 = vld [vmem:[#allocation2 + $0x8] sm:$0xf] }
 0x6d3   : > { %2029 = vrot.lane.b32.xlu1 %v2041_v43, %s6864_s6  ;;  %1816 = vst [vmem:[#allocation3 + $0x4] sm:$0xf] %v1814_v41  ;;  %v5193_v41 = vld [vmem:[%s6885_s22 + $0x4] sm:$0xf] }
 0x6da   : > { %2013 = vrot.lane.b32.xlu2 %v2041_v43, %s6865_s30  ;;  %1997 = vrot.lane.b32.xlu0 %v2041_v43, %s6853_s28 }
 0x6db   : > { %1853 = vrot.lane.b32.xlu1 %v2041_v43, %s6850_s7 }
 0x6e2   : > { %1837 = vrot.lane.b32.xlu2 %v2041_v43, %s6866_s1  ;;  %1821 = vrot.lane.b32.xlu0 %v2041_v43, %s6867_s3 }
 0x6e3   : > { %1981 = vrot.lane.b32.xlu1 %v2041_v43, %s6868_s29 }
 0x6ea   : > { %1965 = vrot.lane.b32.xlu2 %v2041_v43, %s6852_s5  ;;  %1919 = vrot.lane.b32.xlu0 %v2042_v44, %s6861_s10 }
 0x6eb   : > { %2047 = vrot.lane.b32.xlu1 %v2042_v44, %s6860_s9 }
 0x6f2   : > { %1903 = vrot.lane.b32.xlu2 %v2042_v44, %s6862_s2  ;;  %1887 = vrot.lane.b32.xlu0 %v2042_v44, %s6851_s11 }
 0x6f3   : > { %1871 = vrot.lane.b32.xlu1 %v2042_v44, %s6863_s0 }
 0x6fa   : > { %2031 = vrot.lane.b32.xlu2 %v2042_v44, %s6864_s6  ;;  %2015 = vrot.lane.b32.xlu0 %v2042_v44, %s6865_s30 }
 0x6fb   : > { %1999 = vrot.lane.b32.xlu1 %v2042_v44, %s6853_s28 }
 0x702   : > { %1855 = vrot.lane.b32.xlu2 %v2042_v44, %s6850_s7  ;;  %1839 = vrot.lane.b32.xlu0 %v2042_v44, %s6866_s1 }
 0x703   : > { %1823 = vrot.lane.b32.xlu1 %v2042_v44, %s6867_s3 }
 0x70a   : > { %1983 = vrot.lane.b32.xlu2 %v2042_v44, %s6868_s29  ;;  %1967 = vrot.lane.b32.xlu0 %v2042_v44, %s6852_s5 }
 0x70b   : > { %1949 = vrot.lane.b32.xlu1 %v2041_v43, %s6854_s8 }
 0x712   : > { %1933 = vrot.lane.b32.xlu0 %v2041_v43, %s6869_s4  ;;  %1951 = vrot.lane.b32.xlu2 %v2042_v44, %s6854_s8 }
 0x713   : > { %1935 = vrot.lane.b32.xlu1 %v2042_v44, %s6869_s4 }
 0x724   : > { %v1918_v45 = vpop.permute.xlu2 %1917 }
 0x725   : > { %v1921_v46 = vrot.slane %v1918_v45, 4 }
 0x727   : > { %v1923_v47 = vsel %vm1341_vm0, %v1918_v45, %v1921_v46 }
 0x728   : > { %1927 = vst [vmem:[#allocation3 + $0x38] sm:$0xf] %v1923_v47 }
 0x72c   : > { %v1886_v48 = vpop.permute.xlu2 %1885 }
 0x72d   : > { %v1889_v49 = vrot.slane %v1886_v48, 4 }
 0x72f   : > { %v1891_v50 = vsel %vm1307_vm2, %v1886_v48, %v1889_v49 }
 0x730   : > { %1895 = vst [vmem:[#allocation3 + $0x28] sm:$0xf] %v1891_v50 }
 0x734   : > { %v2014_v51 = vpop.permute.xlu2 %2013 }
 0x735   : > { %v2017_v52 = vrot.slane %v2014_v51, 4 }
 0x737   : > { %v2019_v53 = vsel %vm6804_vm15, %v2014_v51, %v2017_v52 }
 0x738   : > { %2023 = vst [vmem:[#allocation3 + $0x68] sm:$0xf] %v2019_v53 }
 0x73c   : > { %v2046_v54 = vpop.permute.xlu0 %2045  ;;  %v1838_v55 = vpop.permute.xlu2 %1837 }
 0x73d   : > { %v2049_v56 = vrot.slane %v2046_v54, 4  ;;  %v1902_v57 = vpop.permute.xlu1 %1901  ;;  %v1841_v59 = vrot.slane %v1838_v55, 4 }
 0x73e   : > { %v1905_v60 = vrot.slane %v1902_v57, 4 }
 0x73f   : > { %v2051_v61 = vsel %vm1477_vm12, %v2046_v54, %v2049_v56  ;;  %v1843_v62 = vsel %vm1256_vm9, %v1838_v55, %v1841_v59 }
 0x740   : > { %2055 = vst [vmem:[#allocation3 + $0x78] sm:$0xf] %v2051_v61  ;;  %v1907_v63 = vsel %vm1324_vm13, %v1902_v57, %v1905_v60 }
 0x741   : > { %1911 = vst [vmem:[#allocation3 + $0x30] sm:$0xf] %v1907_v63 }
 0x742   : > { %1847 = vst [vmem:[#allocation3 + $0x10] sm:$0xf] %v1843_v62 }
 0x744   : > { %v1870_v0 = vpop.permute.xlu0 %1869  ;;  %v1966_v1 = vpop.permute.xlu2 %1965 }
 0x745   : > { %v2030_v2 = vpop.permute.xlu1 %2029  ;;  %v1873_v3 = vrot.slane %v1870_v0, 4  ;;  %v1969_v4 = vrot.slane %v1966_v1, 4 }
 0x746   : > { %v2033_v5 = vrot.slane %v2030_v2, 4 }
 0x747   : > { %v1875_v6 = vsel %vm1290_vm1, %v1870_v0, %v1873_v3  ;;  %v1971_v7 = vsel %vm1392_vm6, %v1966_v1, %v1969_v4 }
 0x748   : > { %v2035_v8 = vsel %vm6870_vm14, %v2030_v2, %v2033_v5  ;;  %1879 = vst [vmem:[#allocation3 + $0x20] sm:$0xf] %v1875_v6  ;;  %vm6876_vm14 = vmmov %vm6872_vm4  ;;  %v5218_v6 = vld [vmem:[%s6882_s24 + $0x38] sm:$0xff] }
 0x749   : > { %2039 = vst [vmem:[#allocation3 + $0x70] sm:$0xf] %v2035_v8  ;;  %2290 = vmatpush.bf16.msra.mxu1 %v5218_v6 }
 0x74a   : > { %1975 = vst [vmem:[#allocation3 + $0x50] sm:$0xf] %v1971_v7 }
 0x74c   : > { %v1998_v9 = vpop.permute.xlu0 %1997  ;;  %v1904_v10 = vpop.permute.xlu2 %1903 }
 0x74d   : > { %v2001_v11 = vrot.slane %v1998_v9, 4  ;;  %v1854_v12 = vpop.permute.xlu1 %1853  ;;  %v1906_v13 = vrot.slane %v1904_v10, 4 }
 0x74e   : > { %v1857_v14 = vrot.slane %v1854_v12, 4 }
 0x74f   : > { %v2003_v15 = vsel %vm6871_vm3, %v1998_v9, %v2001_v11  ;;  %v1908_v16 = vsel %vm1324_vm13, %v1904_v10, %v1906_v13  ;;  %vm6877_vm3 = vcmask 3072   ;;  %v5217_v10 = vld [vmem:[%s6882_s24 + $0x30] sm:$0xff] }
 0x750   : > { %2007 = vst [vmem:[#allocation3 + $0x60] sm:$0xf] %v2003_v15  ;;  %v1859_v17 = vsel %vm6872_vm4, %v1854_v12, %v1857_v14  ;;  %vm6878_vm4 = vmmov %vm6877_vm3  ;;  %2291 = vmatpush.bf16.msra.mxu1 %v5217_v10  ;;  %v5216_v14 = vld [vmem:[%s6882_s24 + $0x28] sm:$0xff] }
 0x751   : > { %1863 = vst [vmem:[#allocation3 + $0x18] sm:$0xf] %v1859_v17 }
 0x752   : > { %1912 = vst [vmem:[#allocation3 + $0x34] sm:$0xf] %v1908_v16 }
 0x753   : > { %2364 = vst.msk [vmem:[#allocation2] sm:$0xf] %vm6877_vm3, %v5481_v29 }
 0x754   : > { %v2032_v18 = vpop.permute.xlu2 %2031  ;;  %v1822_v19 = vpop.permute.xlu0 %1821  ;;  %2365 = vst.msk [vmem:[#allocation2 + $0x8] sm:$0xf] %vm6878_vm4, %v5481_v29  ;;  %2292 = vmatpush.bf16.msra.mxu1 %v5216_v14  ;;  %vm6886_vm4 = vcmask 982016  }
 0x755   : > { %v1982_v20 = vpop.permute.xlu1 %1981  ;;  %v2034_v21 = vrot.slane %v2032_v18, 4  ;;  %v1825_v22 = vrot.slane %v1822_v19, 4 }
 0x756   : > { %v1985_v23 = vrot.slane %v1982_v20, 4 }
 0x757   : > { %v2036_v24 = vsel %vm6873_vm5, %v2032_v18, %v2034_v21  ;;  %v1827_v25 = vsel %vm6874_vm8, %v1822_v19, %v1825_v22  ;;  %vm6879_vm5 = vmmov %vm6875_vm7  ;;  %vm6880_vm8 = vcmask 973824   ;;  %v5215_v22 = vld [vmem:[%s6882_s24 + $0x20] sm:$0xff] }
 0x758   : > { %v1987_v26 = vsel %vm6875_vm7, %v1982_v20, %v1985_v23  ;;  %2040 = vst [vmem:[#allocation3 + $0x74] sm:$0xf] %v2036_v24  ;;  %vm6881_vm7 = vcmask 949248   ;;  %vm6884_vm3 = vmmov %vm6880_vm8  ;;  %2293 = vmatpush.bf16.msra.mxu1 %v5215_v22 }
 0x759   : > { %1991 = vst [vmem:[#allocation3 + $0x58] sm:$0xf] %v1987_v26  ;;  %v5201_v59 = vld [vmem:[#allocation3 + $0x30] sm:$0xff] }
 0x75a   : > { %1831 = vst [vmem:[#allocation3 + $0x8] sm:$0xf] %v1827_v25 }
 0x75c   : > { %v1856_v27 = vpop.permute.xlu2 %1855  ;;  %v1920_v28 = vpop.permute.xlu0 %1919 }
 0x75d   : > { %v2048_v31 = vpop.permute.xlu1 %2047  ;;  %v1858_v33 = vrot.slane %v1856_v27, 4  ;;  %v1922_v35 = vrot.slane %v1920_v28, 4 }
 0x75e   : > { %v2050_v36 = vrot.slane %v2048_v31, 4 }
 0x75f   : > { %v1860_v37 = vsel %vm6876_vm14, %v1856_v27, %v1858_v33  ;;  %v1924_v38 = vsel %vm1341_vm0, %v1920_v28, %v1922_v35  ;;  %v5209_v54 = vld [vmem:[#allocation3 + $0x70] sm:$0xff]  ;;  %vm6883_vm14 = vcmask 1039360   ;;  %v5195_v28 = vld [vmem:[#allocation3] sm:$0xff]  ;;  %v5194_v33 = vld [vmem:[%s6885_s22 + $0x4] sm:$0xf0] }
 0x760   : > { %v2052_v39 = vsel %vm1477_vm12, %v2048_v31, %v2050_v36  ;;  %1864 = vst [vmem:[#allocation3 + $0x1c] sm:$0xf] %v1860_v37  ;;  %v4687_v31 = vld [vmem:[%s6885_s22] sm:$0xf] }
 0x761   : > { %2056 = vst [vmem:[#allocation3 + $0x7c] sm:$0xf] %v2052_v39  ;;  %v4688_v39 = vor.u32 %v5194_v33, %v4687_v31 }
 0x762   : > { %1928 = vst [vmem:[#allocation3 + $0x3c] sm:$0xf] %v1924_v38 }
 0x764   : > { %v1984_v42 = vpop.permute.xlu2 %1983  ;;  %v1888_v43 = vpop.permute.xlu0 %1887 }
 0x765   : > { %v1872_v44 = vpop.permute.xlu1 %1871  ;;  %v1986_v45 = vrot.slane %v1984_v42, 4  ;;  %v1890_v46 = vrot.slane %v1888_v43, 4 }
 0x766   : > { %v1874_v47 = vrot.slane %v1872_v44, 4 }
 0x767   : > { %v1988_v48 = vsel %vm6879_vm5, %v1984_v42, %v1986_v45  ;;  %v1892_v49 = vsel %vm1307_vm2, %v1888_v43, %v1890_v46  ;;  %v5198_v12 = vld [vmem:[#allocation3 + $0x18] sm:$0xff]  ;;  %vm6887_vm5 = vmmov %vm6886_vm4  ;;  %v4689_v42 = vld [vmem:[%s6885_s22 + $0x8] sm:$0xf0] }
 0x768   : > { %v1876_v50 = vsel %vm1290_vm1, %v1872_v44, %v1874_v47  ;;  %1992 = vst [vmem:[#allocation3 + $0x5c] sm:$0xf] %v1988_v48  ;;  %v5210_v51 = vld [vmem:[#allocation3 + $0x78] sm:$0xff]  ;;  %v4692_v44 = vor.u32 %v5193_v41, %v4689_v42  ;;  %v5213_v46 = vld [vmem:[%s6882_s24 + $0x10] sm:$0xff]  ;;  %v5212_v47 = vld [vmem:[%s6882_s24 + $0x8] sm:$0xff] }
 0x769   : > { %1880 = vst [vmem:[#allocation3 + $0x24] sm:$0xf] %v1876_v50  ;;  %v5202_v52 = vld [vmem:[#allocation3 + $0x38] sm:$0xff]  ;;  %2211 = vmatpush.bf16.msra.mxu0 %v5210_v51  ;;  %v5211_v48 = vld [vmem:[%s6882_s24] sm:$0xff] }
 0x76a   : > { %1896 = vst [vmem:[#allocation3 + $0x2c] sm:$0xf] %v1892_v49  ;;  %2197 = vmatpush.bf16.msrb.mxu3 %v5202_v52  ;;  %v5214_v45 = vld [vmem:[%s6882_s24 + $0x18] sm:$0xff] }
 0x76b   : > { %2294 = vmatpush.bf16.msra.mxu1 %v5214_v45 }
 0x76c   : > { %v2016_v53 = vpop.permute.xlu0 %2015  ;;  %v1952_v55 = vpop.permute.xlu2 %1951 }
 0x76d   : > { %v2000_v56 = vpop.permute.xlu1 %1999  ;;  %v2018_v57 = vrot.slane %v2016_v53, 4  ;;  %v1954_v60 = vrot.slane %v1952_v55, 4  ;;  %2212 = vmatpush.bf16.msra.mxu0 %v5209_v54 }
 0x76e   : > { %v2002_v61 = vrot.slane %v2000_v56, 4  ;;  %2198 = vmatpush.bf16.msrb.mxu3 %v5201_v59 }
 0x76f   : > { %v2020_v62 = vsel %vm6804_vm15, %v2016_v53, %v2018_v57  ;;  %v1956_v63 = vsel %vm6880_vm8, %v1952_v55, %v1954_v60  ;;  %v5206_v21 = vld [vmem:[#allocation3 + $0x58] sm:$0xff]  ;;  %2295 = vmatpush.bf16.msra.mxu1 %v5213_v46  ;;  %vm6888_vm8 = vcmask 523264  }
 0x770   : > { %v2004_v0 = vsel %vm6881_vm7, %v2000_v56, %v2002_v61  ;;  %2024 = vst [vmem:[#allocation3 + $0x6c] sm:$0xf] %v2020_v62  ;;  %v5199_v5 = vld [vmem:[#allocation3 + $0x20] sm:$0xff]  ;;  %vm6889_vm7 = vmmov %vm6888_vm8 }
 0x771   : > { %2008 = vst [vmem:[#allocation3 + $0x64] sm:$0xf] %v2004_v0  ;;  %v5200_v1 = vld [vmem:[#allocation3 + $0x28] sm:$0xff] }
 0x772   : > { %1960 = vst [vmem:[#allocation3 + $0x4c] sm:$0xf] %v1956_v63  ;;  %2199 = vmatpush.bf16.msrb.mxu3 %v5200_v1 }
 0x773   : > { %2296 = vmatpush.bf16.msra.mxu1 %v5212_v47 }
 0x774   : > { %v1840_v2 = vpop.permute.xlu0 %1839 }
 0x775   : > { %v1824_v3 = vpop.permute.xlu1 %1823  ;;  %v1842_v4 = vrot.slane %v1840_v2, 4 }
 0x776   : > { %v1826_v7 = vrot.slane %v1824_v3, 4  ;;  %2200 = vmatpush.bf16.msrb.mxu3 %v5199_v5 }
 0x777   : > { %v1844_v8 = vsel %vm1256_vm9, %v1840_v2, %v1842_v4  ;;  %v5208_v9 = vld [vmem:[#allocation3 + $0x68] sm:$0xff]  ;;  %2297 = vmatpush.bf16.msra.mxu1 %v5211_v48 }
 0x778   : > { %v1828_v11 = vsel %vm6883_vm14, %v1824_v3, %v1826_v7  ;;  %1848 = vst [vmem:[#allocation3 + $0x14] sm:$0xf] %v1844_v8  ;;  %2213 = vmatpush.bf16.msra.mxu0 %v5208_v9  ;;  %v5207_v13 = vld [vmem:[#allocation3 + $0x60] sm:$0xff]  ;;  %vm6890_vm14 = vmmov %vm6889_vm7 }
 0x779   : > { %1832 = vst [vmem:[#allocation3 + $0xc] sm:$0xf] %v1828_v11 }
 0x77a   : > { %2201 = vmatpush.bf16.msrb.mxu3 %v5198_v12 }
 0x77c   : > { %v1968_v15 = vpop.permute.xlu0 %1967  ;;  %2214 = vmatpush.bf16.msra.mxu0 %v5207_v13 }
 0x77d   : > { %v1950_v16 = vpop.permute.xlu1 %1949  ;;  %v1970_v17 = vrot.slane %v1968_v15, 4 }
 0x77e   : > { %v1953_v18 = vrot.slane %v1950_v16, 4 }
 0x77f   : > { %v1972_v19 = vsel %vm1392_vm6, %v1968_v15, %v1970_v17  ;;  %v5197_v20 = vld [vmem:[#allocation3 + $0x10] sm:$0xff] }
 0x780   : > { %v1955_v23 = vsel %vm6884_vm3, %v1950_v16, %v1953_v18  ;;  %1976 = vst [vmem:[#allocation3 + $0x54] sm:$0xf] %v1972_v19  ;;  %2202 = vmatpush.bf16.msrb.mxu3 %v5197_v20  ;;  %2215 = vmatpush.bf16.msra.mxu0 %v5206_v21  ;;  %v5196_v24 = vld [vmem:[#allocation3 + $0x8] sm:$0xff]  ;;  %vm6891_vm3 = vmmov %vm6889_vm7  ;;  %v5366_v21 = vld [vmem:[%s6892_s12] ss:$0 sm:$0xff] }
 0x781   : > { %1959 = vst [vmem:[#allocation3 + $0x48] sm:$0xf] %v1955_v23 }
 0x784   : > { %v1934_v25 = vpop.permute.xlu0 %1933  ;;  %2203 = vmatpush.bf16.msrb.mxu3 %v5196_v24  ;;  %v5367_v24 = vld [vmem:[%s6893_s13] ss:$0 sm:$0xff]  ;;  %s6967_s13 = sld [smem:[#allocation39_spill]] }
 0x785   : > { %v1936_v26 = vpop.permute.xlu1 %1935  ;;  %v1937_v27 = vrot.slane %v1934_v25, 4 }
 0x786   : > { %v1938_v35 = vrot.slane %v1936_v26, 4 }
 0x787   : > { %v1939_v36 = vsel %vm6886_vm4, %v1934_v25, %v1937_v27  ;;  %v5205_v37 = vld [vmem:[#allocation3 + $0x50] sm:$0xff] }
 0x788   : > { %v1940_v38 = vsel %vm6887_vm5, %v1936_v26, %v1938_v35  ;;  %1943 = vst [vmem:[#allocation3 + $0x40] sm:$0xf] %v1939_v36  ;;  %2204 = vmatpush.bf16.msrb.mxu3 %v5195_v28  ;;  %2216 = vmatpush.bf16.msra.mxu0 %v5205_v37  ;;  %v5204_v40 = vld [vmem:[#allocation3 + $0x48] sm:$0xff] }
 0x789   : > { %1944 = vst [vmem:[#allocation3 + $0x44] sm:$0xf] %v1940_v38 }
 0x78b   : > { %2205 = vmatmul.bf16.vlgmr.msrb.gmra.mxu3 %v4688_v39 }
 0x78c   : > { %2217 = vmatpush.bf16.msra.mxu0 %v5204_v40 }
 0x790   : > { %v5203_v43 = vld [vmem:[#allocation3 + $0x40] sm:$0xff] }
 0x791   : > { %2218 = vmatpush.bf16.msra.mxu0 %v5203_v43 }
 0x794   : > { %2219 = vmatmul.bf16.vlgmr.msra.gmra.mxu0 %v4692_v44 }
 0x80e   : > { %v2206_v49 = vpop.f32.mrf.mxu3 }
 0x811   : > { %v2220_v50 = vpop.f32.mrf.mxu0 }
 0x812   : > { %v2221_v53 = vadd.f32 %v2220_v50, %v2206_v49 }
 0x816   : > { %v2208_v51 = vpop.f32.mrf.mxu3 }
 0x819   : > { %v2222_v52 = vpop.f32.mrf.mxu0 }
 0x81a   : > { %v2223_v54 = vadd.f32 %v2222_v52, %v2208_v51 }
 0x81c   : > { %v2225_v55 = vpack.c.bf16 %v2223_v54, %v2221_v53 }
 0x81e   : > { %2298 = vmatmul.bf16.vlgmr.msra.gmra.mxu1 %v2225_v55 }
 0x89b   : > { %v2299_v56 = vpop.f32.mrf.mxu1 }
 0x89c   : > { %v2304_v57 = vsel %vm6888_vm8, %v2299_v56, 0.0 }
 0x89d   : > { %2305 = vadd.xlane.f32.xlu2 %v2304_v57 }
 0x8a3   : > { %v2301_v59 = vpop.f32.mrf.mxu1 }
 0x8a4   : > { %v2307_v60 = vsel %vm6889_vm7, %v2301_v59, 0.0 }
 0x8a5   : > { %2308 = vadd.xlane.f32.xlu0 %v2307_v60 }
 0x910   : > { %v2306_v61 = vpop.xlane.xlu2 %2305 }
 0x911   : > { %v2310_v62 = vmul.f32 %v2306_v61, %v5910_v58 }
 0x913   : > { %v2312_v63 = vsub.f32 %v2299_v56, %v2310_v62 }
 0x915   : > { %v2314_v0 = vmul.f32 %v2312_v63, %v2312_v63 }
 0x917   : > { %v2316_v1 = vsel %vm6890_vm14, %v2314_v0, 0.0 }
 0x918   : > { %2317 = vadd.xlane.f32.xlu1 %v2316_v1  ;;  %v2309_v2 = vpop.xlane.xlu0 %2308 }
 0x919   : > { %v2311_v3 = vmul.f32 %v2309_v2, %v5910_v58 }
 0x91b   : > { %v2313_v4 = vsub.f32 %v2301_v59, %v2311_v3 }
 0x91d   : > { %v2315_v5 = vmul.f32 %v2313_v4, %v2313_v4 }
 0x91f   : > { %v2319_v6 = vsel %vm6891_vm3, %v2315_v5, 0.0 }
 0x920   : > { %2320 = vadd.xlane.f32.xlu2 %v2319_v6 }
 0x98b   : > { %v2318_v7 = vpop.xlane.xlu1 %2317 }
 0x98c   : > { %v2322_v8 = vmul.f32 %v2318_v7, %v5910_v58 }
 0x98e   : > { %v2324_v9 = vadd.f32 1e-05, %v2322_v8 }
 0x990   : > { %5386 = vrsqrt.f32 %v2324_v9  ;;  %vm2332_vm5 = vweird.f32 %v2324_v9 }
 0x993   : > { %v2321_v10 = vpop.xlane.xlu2 %2320 }
 0x994   : > { %v2323_v11 = vmul.f32 %v2321_v10, %v5910_v58 }
 0x996   : > { %v5387_v12 = vpop.eup %5386  ;;  %v2325_v13 = vadd.f32 1e-05, %v2323_v11 }
 0x997   : > { %v2327_v14 = vmul.f32 %v5387_v12, %v2324_v9  ;;  %vm2333_vm4 = vweird.f32 %v5387_v12 }
 0x998   : > { %5388 = vrsqrt.f32 %v2325_v13  ;;  %vm2334_vm8 = vmor %vm2332_vm5, %vm2333_vm4  ;;  %vm2342_vm14 = vweird.f32 %v2325_v13  ;;  %vm6896_vm4 = vcmask 949248   ;;  %vm6897_vm5 = vcmask 957440  }
 0x999   : > { %v2328_v15 = vmul.f32 %v5387_v12, %v2327_v14 }
 0x99b   : > { %v2329_v16 = vmul.f32 0.5, %v2328_v15 }
 0x99d   : > { %v2330_v17 = vsub.f32 1.5, %v2329_v16 }
 0x99e   : > { %v5389_v18 = vpop.eup %5388 }
 0x99f   : > { %v2331_v19 = vmul.f32 %v5387_v12, %v2330_v17  ;;  %v2337_v20 = vmul.f32 %v5389_v18, %v2325_v13  ;;  %vm2343_vm7 = vweird.f32 %v5389_v18 }
 0x9a0   : > { %vm2344_vm3 = vmor %vm2342_vm14, %vm2343_vm7  ;;  %vm6899_vm7 = vcmask 1039360   ;;  %vm6900_vm14 = vcmask 973824  }
 0x9a1   : > { %v2335_v22 = vsel %vm2334_vm8, %v5387_v12, %v2331_v19  ;;  %v2338_v23 = vmul.f32 %v5389_v18, %v2337_v20 }
 0x9a2   : > { %v2346_v58 = vmul.f32 %v2335_v22, %v2312_v63 }
 0x9a3   : > { %v2339_v25 = vmul.f32 0.5, %v2338_v23 }
 0x9a4   : > { %v2352_v26 = vmul.f32 %v5366_v21, %v2346_v58 }
 0x9a5   : > { %v2340_v27 = vsub.f32 1.5, %v2339_v25 }
 0x9a6   : > { %v2358_v28 = vadd.f32 %v5367_v24, %v2352_v26 }
 0x9a7   : > { %v2341_v31 = vmul.f32 %v5389_v18, %v2340_v27 }
 0x9a8   : > { %v2360_v33 = vadd.f32 %v2358_v28, %v5785_v30 }
 0x9a9   : > { %v2345_v35 = vsel %vm2344_vm3, %v5389_v18, %v2341_v31  ;;  %vm6901_vm3 = vmmov %vm6897_vm5 }
 0x9aa   : > { %v2347_v36 = vmul.f32 %v2345_v35, %v2313_v4  ;;  %v2362_v37 = vmax.f32 %v2360_v33, 0.0 }
 0x9ac   : > { %v2366_v38 = vpack.c.bf16 %v2362_v37, %v2362_v37  ;;  %v2353_v39 = vmul.f32 %v5366_v21, %v2347_v36 }
 0x9ae   : > { %2370 = vrot.lane.b32.xlu0 %v2366_v38, %s6859_s27  ;;  %v2359_v40 = vadd.f32 %v5367_v24, %v2353_v39  ;;  %v4115_v44 = vunpack.c.l.b16 %v2366_v38 }
 0x9b0   : > { %v2361_v41 = vadd.f32 %v2359_v40, %v5790_v32 }
 0x9b2   : > { %v2363_v42 = vmax.f32 %v2361_v41, 0.0 }
 0x9b4   : > { %v2367_v43 = vpack.c.bf16 %v2363_v42, %v2363_v42 }
 0x9b6   : > { %2372 = vrot.lane.b32.xlu1 %v2367_v43, %s6859_s27  ;;  %v4116_v45 = vunpack.c.l.b16 %v2367_v43 }
 0x9b8   : > { %v6052_v46 = vpack.c.b16 %v4116_v45, %v4115_v44 }
 0xa20   : > { %v2371_v47 = vpop.permute.xlu0 %2370 }
 0xa21   : > { %2376 = vst.msk [vmem:[#allocation2] sm:$0xf] %vm1217_vm10, %v2371_v47 }
 0xa22   : > { %2378 = vst.msk [vmem:[#allocation2] sm:$0xff] %vm5796_vm11, %v5481_v29 }
 0xa28   : > { %v2373_v30 = vpop.permute.xlu1 %2372 }
 0xa29   : > { %2377 = vst.msk [vmem:[#allocation2 + $0x8] sm:$0xf] %vm1217_vm10, %v2373_v30  ;;  %v2608_v48 = vld [vmem:[#allocation2] sm:$0xff]  ;;  %vm6894_vm10 = vcmask 932864  }
 0xa2a   : > { %2379 = vst.msk [vmem:[#allocation2 + $0x8] sm:$0xff] %vm5796_vm11, %v5481_v29  ;;  %2612 = vrot.lane.b32.xlu1 %v2608_v48, %s6860_s9  ;;  %2596 = vrot.lane.b32.xlu0 %v2608_v48, %s6864_s6  ;;  %vm6895_vm11 = vcmask 1022976   ;;  %vm6898_vm8 = vmmov %vm6894_vm10 }
 0xa2b   : > { %2484 = vrot.lane.b32.xlu2 %v2608_v48, %s6861_s10 }
 0xa31   : > { %v2481_v32 = vld [vmem:[#allocation2 + $0x8] sm:$0xff] }
 0xa32   : > { %2452 = vrot.lane.b32.xlu1 %v2608_v48, %s6851_s11  ;;  %2436 = vrot.lane.b32.xlu0 %v2608_v48, %s6863_s0 }
 0xa33   : > { %2468 = vrot.lane.b32.xlu2 %v2608_v48, %s6862_s2 }
 0xa3a   : > { %2564 = vrot.lane.b32.xlu1 %v2608_v48, %s6853_s28  ;;  %2548 = vrot.lane.b32.xlu0 %v2608_v48, %s6868_s29 }
 0xa3b   : > { %2580 = vrot.lane.b32.xlu2 %v2608_v48, %s6865_s30 }
 0xa42   : > { %2404 = vrot.lane.b32.xlu1 %v2608_v48, %s6866_s1  ;;  %2388 = vrot.lane.b32.xlu0 %v2608_v48, %s6867_s3 }
 0xa43   : > { %2420 = vrot.lane.b32.xlu2 %v2608_v48, %s6850_s7 }
 0xa4a   : > { %2516 = vrot.lane.b32.xlu1 %v2608_v48, %s6854_s8  ;;  %2486 = vrot.lane.b32.xlu0 %v2481_v32, %s6861_s10 }
 0xa4b   : > { %2532 = vrot.lane.b32.xlu2 %v2608_v48, %s6852_s5 }
 0xa52   : > { %2470 = vrot.lane.b32.xlu1 %v2481_v32, %s6862_s2  ;;  %2614 = vrot.lane.b32.xlu0 %v2481_v32, %s6860_s9 }
 0xa53   : > { %2598 = vrot.lane.b32.xlu2 %v2481_v32, %s6864_s6 }
 0xa5a   : > { %2582 = vrot.lane.b32.xlu1 %v2481_v32, %s6865_s30  ;;  %2454 = vrot.lane.b32.xlu0 %v2481_v32, %s6851_s11 }
 0xa5b   : > { %2438 = vrot.lane.b32.xlu2 %v2481_v32, %s6863_s0 }
 0xa62   : > { %2422 = vrot.lane.b32.xlu1 %v2481_v32, %s6850_s7  ;;  %2566 = vrot.lane.b32.xlu0 %v2481_v32, %s6853_s28 }
 0xa63   : > { %2550 = vrot.lane.b32.xlu2 %v2481_v32, %s6868_s29 }
 0xa6a   : > { %2534 = vrot.lane.b32.xlu1 %v2481_v32, %s6852_s5  ;;  %2406 = vrot.lane.b32.xlu0 %v2481_v32, %s6866_s1 }
 0xa6b   : > { %2390 = vrot.lane.b32.xlu2 %v2481_v32, %s6867_s3 }
 0xa72   : > { %2518 = vrot.lane.b32.xlu0 %v2481_v32, %s6854_s8  ;;  %2502 = vrot.lane.b32.xlu1 %v2481_v32, %s6869_s4 }
 0xa73   : > { %2500 = vrot.lane.b32.xlu2 %v2608_v48, %s6869_s4 }
 0xa85   : > { %v2485_v34 = vpop.permute.xlu2 %2484 }
 0xa86   : > { %v2488_v49 = vrot.slane %v2485_v34, 4 }
 0xa88   : > { %v2490_v50 = vsel %vm1341_vm0, %v2485_v34, %v2488_v49 }
 0xa89   : > { %2494 = vst [vmem:[#allocation3 + $0x38] sm:$0xf] %v2490_v50  ;;  %v2380_v50 = vld [vmem:[#allocation2] sm:$0xf] }
 0xa8a   : > { %2382 = vst [vmem:[#allocation3] sm:$0xf] %v2380_v50  ;;  %v5240_v50 = vld [vmem:[%s6720_s15 + $0x8] sm:$0xff] }
 0xa8d   : > { %v2469_v51 = vpop.permute.xlu2 %2468 }
 0xa8e   : > { %v2472_v52 = vrot.slane %v2469_v51, 4 }
 0xa90   : > { %v2474_v53 = vsel %vm1324_vm13, %v2469_v51, %v2472_v52  ;;  %v2381_v51 = vld [vmem:[#allocation2 + $0x8] sm:$0xf] }
 0xa91   : > { %2478 = vst [vmem:[#allocation3 + $0x30] sm:$0xf] %v2474_v53 }
 0xa92   : > { %2383 = vst [vmem:[#allocation3 + $0x4] sm:$0xf] %v2381_v51  ;;  %v5239_v51 = vld [vmem:[%s6720_s15] sm:$0xff] }
 0xa95   : > { %v2581_v54 = vpop.permute.xlu2 %2580 }
 0xa96   : > { %v2584_v55 = vrot.slane %v2581_v54, 4 }
 0xa98   : > { %v2586_v56 = vsel %vm6804_vm15, %v2581_v54, %v2584_v55 }
 0xa99   : > { %2590 = vst [vmem:[#allocation3 + $0x68] sm:$0xf] %v2586_v56 }
 0xa9c   : > { %v2613_v57 = vpop.permute.xlu1 %2612  ;;  %v2597_v59 = vpop.permute.xlu0 %2596 }
 0xa9d   : > { %v2616_v60 = vrot.slane %v2613_v57, 4  ;;  %v2600_v61 = vrot.slane %v2597_v59, 4  ;;  %v2421_v62 = vpop.permute.xlu2 %2420 }
 0xa9e   : > { %v2424_v63 = vrot.slane %v2421_v62, 4 }
 0xa9f   : > { %v2618_v0 = vsel %vm1477_vm12, %v2613_v57, %v2616_v60  ;;  %v2602_v1 = vsel %vm6894_vm10, %v2597_v59, %v2600_v61  ;;  %vm6902_vm10 = vmmov %vm6899_vm7 }
 0xaa0   : > { %2622 = vst [vmem:[#allocation3 + $0x78] sm:$0xf] %v2618_v0  ;;  %v2426_v2 = vsel %vm6895_vm11, %v2421_v62, %v2424_v63  ;;  %vm6903_vm11 = vcmask 3072  }
 0xaa1   : > { %2606 = vst [vmem:[#allocation3 + $0x70] sm:$0xf] %v2602_v1 }
 0xaa2   : > { %2430 = vst [vmem:[#allocation3 + $0x18] sm:$0xf] %v2426_v2 }
 0xaa3   : > { %3015 = vst.msk [vmem:[#allocation2] sm:$0xf] %vm6903_vm11, %v5481_v29 }
 0xaa4   : > { %v2453_v3 = vpop.permute.xlu1 %2452  ;;  %v2437_v4 = vpop.permute.xlu0 %2436 }
 0xaa5   : > { %v2456_v5 = vrot.slane %v2453_v3, 4  ;;  %v2440_v6 = vrot.slane %v2437_v4, 4  ;;  %v2533_v7 = vpop.permute.xlu2 %2532 }
 0xaa6   : > { %v2536_v8 = vrot.slane %v2533_v7, 4 }
 0xaa7   : > { %v2458_v9 = vsel %vm1307_vm2, %v2453_v3, %v2456_v5  ;;  %v2442_v10 = vsel %vm1290_vm1, %v2437_v4, %v2440_v6 }
 0xaa8   : > { %2462 = vst [vmem:[#allocation3 + $0x28] sm:$0xf] %v2458_v9  ;;  %v2538_v11 = vsel %vm1392_vm6, %v2533_v7, %v2536_v8 }
 0xaa9   : > { %2446 = vst [vmem:[#allocation3 + $0x20] sm:$0xf] %v2442_v10 }
 0xaaa   : > { %2542 = vst [vmem:[#allocation3 + $0x50] sm:$0xf] %v2538_v11 }
 0xaac   : > { %v2565_v12 = vpop.permute.xlu1 %2564  ;;  %v2549_v13 = vpop.permute.xlu0 %2548 }
 0xaad   : > { %v2568_v14 = vrot.slane %v2565_v12, 4  ;;  %v2552_v15 = vrot.slane %v2549_v13, 4  ;;  %v2599_v16 = vpop.permute.xlu2 %2598 }
 0xaae   : > { %v2601_v17 = vrot.slane %v2599_v16, 4 }
 0xaaf   : > { %v2570_v18 = vsel %vm6896_vm4, %v2565_v12, %v2568_v14  ;;  %v2554_v19 = vsel %vm6897_vm5, %v2549_v13, %v2552_v15  ;;  %vm6904_vm4 = vmmov %vm6903_vm11  ;;  %vm6905_vm5 = vcmask 982016  }
 0xab0   : > { %2574 = vst [vmem:[#allocation3 + $0x60] sm:$0xf] %v2570_v18  ;;  %v2603_v20 = vsel %vm6898_vm8, %v2599_v16, %v2601_v17  ;;  %vm6906_vm8 = vcmask 1022976  }
 0xab1   : > { %2558 = vst [vmem:[#allocation3 + $0x58] sm:$0xf] %v2554_v19 }
 0xab2   : > { %2607 = vst [vmem:[#allocation3 + $0x74] sm:$0xf] %v2603_v20 }
 0xab3   : > { %3016 = vst.msk [vmem:[#allocation2 + $0x8] sm:$0xf] %vm6904_vm4, %v5481_v29 }
 0xab4   : > { %v2405_v21 = vpop.permute.xlu1 %2404  ;;  %v2389_v22 = vpop.permute.xlu0 %2388 }
 0xab5   : > { %v2439_v23 = vpop.permute.xlu2 %2438  ;;  %v2408_v58 = vrot.slane %v2405_v21, 4  ;;  %v2392_v24 = vrot.slane %v2389_v22, 4 }
 0xab6   : > { %v2441_v25 = vrot.slane %v2439_v23, 4 }
 0xab7   : > { %v2410_v26 = vsel %vm1256_vm9, %v2405_v21, %v2408_v58  ;;  %v2394_v27 = vsel %vm6899_vm7, %v2389_v22, %v2392_v24  ;;  %vm6907_vm7 = vcmask 949248  }
 0xab8   : > { %v2443_v28 = vsel %vm1290_vm1, %v2439_v23, %v2441_v25  ;;  %2414 = vst [vmem:[#allocation3 + $0x10] sm:$0xf] %v2410_v26  ;;  %v5246_v26 = vld [vmem:[%s6720_s15 + $0x38] sm:$0xff] }
 0xab9   : > { %2447 = vst [vmem:[#allocation3 + $0x24] sm:$0xf] %v2443_v28  ;;  %v5237_v4 = vld [vmem:[#allocation3 + $0x70] sm:$0xff]  ;;  %2880 = vmatpush.bf16.msrb.mxu0 %v5246_v26 }
 0xaba   : > { %2398 = vst [vmem:[#allocation3 + $0x8] sm:$0xf] %v2394_v27  ;;  %v5245_v27 = vld [vmem:[%s6720_s15 + $0x30] sm:$0xff] }
 0xabc   : > { %v2517_v31 = vpop.permute.xlu1 %2516  ;;  %v2487_v33 = vpop.permute.xlu0 %2486 }
 0xabd   : > { %v2551_v35 = vpop.permute.xlu2 %2550  ;;  %v2520_v36 = vrot.slane %v2517_v31, 4  ;;  %v2489_v37 = vrot.slane %v2487_v33, 4  ;;  %2881 = vmatpush.bf16.msrb.mxu0 %v5245_v27 }
 0xabe   : > { %v2553_v38 = vrot.slane %v2551_v35, 4 }
 0xabf   : > { %v2522_v39 = vsel %vm6900_vm14, %v2517_v31, %v2520_v36  ;;  %v2491_v40 = vsel %vm1341_vm0, %v2487_v33, %v2489_v37  ;;  %v5223_v31 = vld [vmem:[#allocation3] sm:$0xff]  ;;  %v5244_v37 = vld [vmem:[%s6720_s15 + $0x28] sm:$0xff] }
 0xac0   : > { %v2555_v41 = vsel %vm6901_vm3, %v2551_v35, %v2553_v38  ;;  %2526 = vst [vmem:[#allocation3 + $0x48] sm:$0xf] %v2522_v39  ;;  %v5227_v11 = vld [vmem:[#allocation3 + $0x20] sm:$0xff]  ;;  %vm6908_vm3 = vmmov %vm6905_vm5  ;;  %v5220_v35 = vld [vmem:[%s6719_s14 + $0x4] sm:$0xf0] }
 0xac1   : > { %2559 = vst [vmem:[#allocation3 + $0x5c] sm:$0xf] %v2555_v41  ;;  %v4791_v33 = vld [vmem:[%s6719_s14] sm:$0xf]  ;;  %v5219_v39 = vld [vmem:[%s6719_s14 + $0x4] sm:$0xf]  ;;  %2882 = vmatpush.bf16.msrb.mxu0 %v5244_v37 }
 0xac2   : > { %2495 = vst [vmem:[#allocation3 + $0x3c] sm:$0xf] %v2491_v40  ;;  %v4792_v38 = vor.u32 %v5220_v35, %v4791_v33  ;;  %v4793_v40 = vld [vmem:[%s6719_s14 + $0x8] sm:$0xf0] }
 0xac4   : > { %v2471_v42 = vpop.permute.xlu1 %2470  ;;  %v2615_v43 = vpop.permute.xlu0 %2614 }
 0xac5   : > { %v2391_v44 = vpop.permute.xlu2 %2390  ;;  %v2473_v45 = vrot.slane %v2471_v42, 4  ;;  %v2617_v47 = vrot.slane %v2615_v43, 4 }
 0xac6   : > { %v2393_v30 = vrot.slane %v2391_v44, 4 }
 0xac7   : > { %v2475_v48 = vsel %vm1324_vm13, %v2471_v42, %v2473_v45  ;;  %v2619_v32 = vsel %vm1477_vm12, %v2615_v43, %v2617_v47  ;;  %v5243_v42 = vld [vmem:[%s6720_s15 + $0x20] sm:$0xff]  ;;  %v4796_v43 = vor.u32 %v5219_v39, %v4793_v40  ;;  %v5222_v45 = vld [vmem:[%s6719_s14 + $0x14] sm:$0xf0] }
 0xac8   : > { %v2395_v34 = vsel %vm6902_vm10, %v2391_v44, %v2393_v30  ;;  %2479 = vst [vmem:[#allocation3 + $0x34] sm:$0xf] %v2475_v48  ;;  %v5234_v20 = vld [vmem:[#allocation3 + $0x58] sm:$0xff]  ;;  %2883 = vmatpush.bf16.msrb.mxu0 %v5243_v42  ;;  %v4799_v44 = vld [vmem:[%s6719_s14 + $0x10] sm:$0xf]  ;;  %vm6803_vm10 = vcmask 261120  }
 0xac9   : > { %2399 = vst [vmem:[#allocation3 + $0xc] sm:$0xf] %v2395_v34  ;;  %v5230_v49 = vld [vmem:[#allocation3 + $0x38] sm:$0xff]  ;;  %v4800_v47 = vor.u32 %v5222_v45, %v4799_v44  ;;  %v5221_v30 = vld [vmem:[%s6719_s14 + $0x14] sm:$0xf] }
 0xaca   : > { %2623 = vst [vmem:[#allocation3 + $0x7c] sm:$0xf] %v2619_v32  ;;  %2776 = vmatpush.bf16.msra.mxu2 %v5230_v49  ;;  %v4801_v48 = vld [vmem:[%s6719_s14 + $0x18] sm:$0xf0]  ;;  %v5241_v49 = vld [vmem:[%s6720_s15 + $0x10] sm:$0xff] }
 0xacb   : > { %v4804_v32 = vor.u32 %v5221_v30, %v4801_v48  ;;  %v5242_v34 = vld [vmem:[%s6720_s15 + $0x18] sm:$0xff] }
 0xacc   : > { %v2583_v52 = vpop.permute.xlu1 %2582  ;;  %v2455_v53 = vpop.permute.xlu0 %2454  ;;  %2884 = vmatpush.bf16.msrb.mxu0 %v5242_v34  ;;  %v5368_v34 = vld [vmem:[%s6721_s16] ss:$0 sm:$0xff] }
 0xacd   : > { %v2585_v54 = vrot.slane %v2583_v52, 4  ;;  %v2457_v55 = vrot.slane %v2455_v53, 4  ;;  %v2501_v56 = vpop.permute.xlu2 %2500 }
 0xace   : > { %v2504_v57 = vrot.slane %v2501_v56, 4 }
 0xacf   : > { %v2587_v59 = vsel %vm6804_vm15, %v2583_v52, %v2585_v54  ;;  %v2459_v60 = vsel %vm1307_vm2, %v2455_v53, %v2457_v55  ;;  %v5229_v61 = vld [vmem:[#allocation3 + $0x30] sm:$0xff] }
 0xad0   : > { %2591 = vst [vmem:[#allocation3 + $0x6c] sm:$0xf] %v2587_v59  ;;  %v2506_v62 = vsel %vm6905_vm5, %v2501_v56, %v2504_v57  ;;  %2777 = vmatpush.bf16.msra.mxu2 %v5229_v61  ;;  %v5224_v28 = vld [vmem:[#allocation3 + $0x8] sm:$0xff]  ;;  %2885 = vmatpush.bf16.msrb.mxu0 %v5241_v49 }
 0xad1   : > { %2463 = vst [vmem:[#allocation3 + $0x2c] sm:$0xf] %v2459_v60  ;;  %v5238_v63 = vld [vmem:[#allocation3 + $0x78] sm:$0xff] }
 0xad2   : > { %2510 = vst [vmem:[#allocation3 + $0x40] sm:$0xf] %v2506_v62  ;;  %2795 = vmatpush.bf16.msra.mxu3 %v5238_v63 }
 0xad4   : > { %v2423_v0 = vpop.permute.xlu1 %2422  ;;  %v2567_v1 = vpop.permute.xlu0 %2566  ;;  %2886 = vmatpush.bf16.msrb.mxu0 %v5240_v50 }
 0xad5   : > { %v2425_v2 = vrot.slane %v2423_v0, 4  ;;  %v2569_v3 = vrot.slane %v2567_v1, 4 }
 0xad6   : > { %2796 = vmatpush.bf16.msra.mxu3 %v5237_v4 }
 0xad7   : > { %v2427_v5 = vsel %vm6906_vm8, %v2423_v0, %v2425_v2  ;;  %v2571_v6 = vsel %vm6907_vm7, %v2567_v1, %v2569_v3  ;;  %v5236_v7 = vld [vmem:[#allocation3 + $0x68] sm:$0xff] }
 0xad8   : > { %2431 = vst [vmem:[#allocation3 + $0x1c] sm:$0xf] %v2427_v5  ;;  %v5228_v8 = vld [vmem:[#allocation3 + $0x28] sm:$0xff]  ;;  %2887 = vmatpush.bf16.msrb.mxu0 %v5239_v51  ;;  %v5369_v51 = vld [vmem:[%s6909_s23] ss:$0 sm:$0xff] }
 0xad9   : > { %2575 = vst [vmem:[#allocation3 + $0x64] sm:$0xf] %v2571_v6  ;;  %2778 = vmatpush.bf16.msra.mxu2 %v5228_v8 }
 0xada   : > { %2797 = vmatpush.bf16.msra.mxu3 %v5236_v7 }
 0xadc   : > { %v2535_v9 = vpop.permute.xlu1 %2534  ;;  %v2407_v10 = vpop.permute.xlu0 %2406 }
 0xadd   : > { %v2537_v12 = vrot.slane %v2535_v9, 4  ;;  %v2409_v13 = vrot.slane %v2407_v10, 4  ;;  %2779 = vmatpush.bf16.msra.mxu2 %v5227_v11  ;;  %v5499_v11 = vmov 32.0  }
 0xade   : > { %5390 = vrcp.f32 %v5499_v11 }
 0xadf   : > { %v2539_v14 = vsel %vm1392_vm6, %v2535_v9, %v2537_v12  ;;  %v2411_v15 = vsel %vm1256_vm9, %v2407_v10, %v2409_v13  ;;  %v5226_v16 = vld [vmem:[#allocation3 + $0x18] sm:$0xff] }
 0xae0   : > { %2543 = vst [vmem:[#allocation3 + $0x54] sm:$0xf] %v2539_v14  ;;  %v5235_v17 = vld [vmem:[#allocation3 + $0x60] sm:$0xff] }
 0xae1   : > { %2415 = vst [vmem:[#allocation3 + $0x14] sm:$0xf] %v2411_v15  ;;  %2780 = vmatpush.bf16.msra.mxu2 %v5226_v16  ;;  %2798 = vmatpush.bf16.msra.mxu3 %v5235_v17 }
 0xae4   : > { %v2519_v18 = vpop.permute.xlu0 %2518  ;;  %v2503_v19 = vpop.permute.xlu1 %2502 }
 0xae5   : > { %v2521_v21 = vrot.slane %v2519_v18, 4  ;;  %v2505_v22 = vrot.slane %v2503_v19, 4  ;;  %2799 = vmatpush.bf16.msra.mxu3 %v5234_v20  ;;  %v5391_v12 = vpop.eup %5390 }
 0xae6   : > { %v2913_v13 = vmul.f32 32.0, %v5391_v12  ;;  %vm2917_vm11 = vweird.f32 %v5391_v12 }
 0xae7   : > { %v2523_v23 = vsel %vm6900_vm14, %v2519_v18, %v2521_v21  ;;  %v2507_v58 = vsel %vm6908_vm3, %v2503_v19, %v2505_v22  ;;  %v5233_v24 = vld [vmem:[#allocation3 + $0x50] sm:$0xff] }
 0xae8   : > { %2527 = vst [vmem:[#allocation3 + $0x4c] sm:$0xf] %v2523_v23  ;;  %v5225_v25 = vld [vmem:[#allocation3 + $0x10] sm:$0xff]  ;;  %v2914_v14 = vsub.f32 1.0, %v2913_v13 }
 0xae9   : > { %2511 = vst [vmem:[#allocation3 + $0x44] sm:$0xf] %v2507_v58  ;;  %2781 = vmatpush.bf16.msra.mxu2 %v5225_v25  ;;  %2800 = vmatpush.bf16.msra.mxu3 %v5233_v24 }
 0xaea   : > { %v2915_v15 = vmul.f32 %v5391_v12, %v2914_v14 }
 0xaec   : > { %v2916_v16 = vadd.f32 %v5391_v12, %v2915_v15 }
 0xaed   : > { %2782 = vmatpush.bf16.msra.mxu2 %v5224_v28 }
 0xaee   : > { %v6178_v17 = vsel %vm2917_vm11, %v5391_v12, %v2916_v16 }
 0xaef   : > { %v5232_v36 = vld [vmem:[#allocation3 + $0x48] sm:$0xff] }
 0xaf0   : > { %2801 = vmatpush.bf16.msra.mxu3 %v5232_v36  ;;  %v5231_v41 = vld [vmem:[#allocation3 + $0x40] sm:$0xff] }
 0xaf1   : > { %2783 = vmatpush.bf16.msra.mxu2 %v5223_v31 }
 0xaf4   : > { %2784 = vmatmul.bf16.vlgmr.msra.gmra.mxu2 %v4792_v38  ;;  %2802 = vmatpush.bf16.msra.mxu3 %v5231_v41 }
 0xaf7   : > { %2803 = vmatmul.bf16.vlgmr.msra.gmra.mxu3 %v4796_v43 }
 0xb04   : > { %2789 = vmatmul.bf16.gmra.mxu2 %v4800_v47 }
 0xb07   : > { %2808 = vmatmul.bf16.gmra.mxu3 %v4804_v32 }
 0xb77   : > { %v2785_v52 = vpop.f32.mrf.mxu2 }
 0xb7a   : > { %v2804_v53 = vpop.f32.mrf.mxu3 }
 0xb7b   : > { %v2805_v56 = vadd.f32 %v2804_v53, %v2785_v52 }
 0xb7f   : > { %v2787_v54 = vpop.f32.mrf.mxu2 }
 0xb82   : > { %v2806_v55 = vpop.f32.mrf.mxu3 }
 0xb83   : > { %v2807_v57 = vadd.f32 %v2806_v55, %v2787_v54 }
 0xb85   : > { %v2814_v59 = vpack.c.bf16 %v2807_v57, %v2805_v56 }
 0xb87   : > { %2888 = vmatmul.bf16.vlgmr.msrb.gmra.mxu0 %v2814_v59  ;;  %v2790_v60 = vpop.f32.mrf.mxu2 }
 0xb8a   : > { %v2809_v61 = vpop.f32.mrf.mxu3 }
 0xb8b   : > { %v2810_v0 = vadd.f32 %v2809_v61, %v2790_v60 }
 0xb8f   : > { %v2792_v62 = vpop.f32.mrf.mxu2 }
 0xb92   : > { %v2811_v63 = vpop.f32.mrf.mxu3 }
 0xb93   : > { %v2812_v1 = vadd.f32 %v2811_v63, %v2792_v62 }
 0xb95   : > { %v2815_v2 = vpack.c.bf16 %v2812_v1, %v2810_v0 }
 0xb97   : > { %2893 = vmatmul.bf16.gmra.mxu0 %v2815_v2 }
 0xc04   : > { %v2889_v3 = vpop.f32.mrf.mxu0 }
 0xc05   : > { %v2900_v4 = vsel %vm6803_vm10, %v2889_v3, 0.0 }
 0xc06   : > { %2901 = vadd.xlane.f32.xlu1 %v2900_v4 }
 0xc0c   : > { %v2891_v5 = vpop.f32.mrf.mxu0 }
 0xc0d   : > { %v2903_v9 = vsel %vm6803_vm10, %v2891_v5, 0.0 }
 0xc14   : > { %v2894_v6 = vpop.f32.mrf.mxu0 }
 0xc15   : > { %v2906_v7 = vsel %vm6803_vm10, %v2894_v6, 0.0 }
 0xc16   : > { %2907 = vadd.xlane.f32.xlu0 %v2906_v7 }
 0xc1c   : > { %v2896_v8 = vpop.f32.mrf.mxu0 }
 0xc1d   : > { %v2909_v10 = vsel %vm6803_vm10, %v2896_v8, 0.0 }
 0xc1e   : > { %2904 = vadd.xlane.f32.xlu0 %v2903_v9  ;;  %2910 = vadd.xlane.f32.xlu2 %v2909_v10 }
 0xc79   : > { %v2902_v18 = vpop.xlane.xlu1 %2901 }
 0xc7a   : > { %v2919_v19 = vmul.f32 %v6178_v17, %v2902_v18 }
 0xc7c   : > { %v2923_v20 = vsub.f32 %v2889_v3, %v2919_v19 }
 0xc7e   : > { %v2927_v21 = vmul.f32 %v2923_v20, %v2923_v20 }
 0xc80   : > { %v2931_v22 = vsel %vm6803_vm10, %v2927_v21, 0.0 }
 0xc81   : > { %2932 = vadd.xlane.f32.xlu0 %v2931_v22 }
 0xc89   : > { %v2908_v23 = vpop.xlane.xlu0 %2907 }
 0xc8a   : > { %v2921_v27 = vmul.f32 %v6178_v17, %v2908_v23 }
 0xc8c   : > { %v6193_v36 = vsub.f32 %v2894_v6, %v2921_v27 }
 0xc8e   : > { %v2929_v39 = vmul.f32 %v6193_v36, %v6193_v36 }
 0xc90   : > { %v2937_v40 = vsel %vm6803_vm10, %v2929_v39, 0.0 }
 0xc91   : > { %v2905_v58 = vpop.xlane.xlu0 %2904  ;;  %v2911_v24 = vpop.xlane.xlu2 %2910 }
 0xc92   : > { %v2920_v25 = vmul.f32 %v6178_v17, %v2905_v58  ;;  %v2922_v26 = vmul.f32 %v6178_v17, %v2911_v24 }
 0xc94   : > { %v6185_v28 = vsub.f32 %v2891_v5, %v2920_v25  ;;  %v6187_v31 = vsub.f32 %v2896_v8, %v2922_v26 }
 0xc96   : > { %v2928_v33 = vmul.f32 %v6185_v28, %v6185_v28  ;;  %v2930_v35 = vmul.f32 %v6187_v31, %v6187_v31 }
 0xc98   : > { %v2934_v37 = vsel %vm6803_vm10, %v2928_v33, 0.0  ;;  %v2940_v38 = vsel %vm6803_vm10, %v2930_v35, 0.0 }
 0xc99   : > { %2935 = vadd.xlane.f32.xlu2 %v2934_v37  ;;  %2941 = vadd.xlane.f32.xlu1 %v2940_v38 }
 0xca1   : > { %2938 = vadd.xlane.f32.xlu2 %v2937_v40 }
 0xcf4   : > { %v2933_v41 = vpop.xlane.xlu0 %2932 }
 0xcf5   : > { %v2943_v42 = vmul.f32 %v2933_v41, %v6178_v17 }
 0xcf7   : > { %v2947_v43 = vadd.f32 1e-05, %v2943_v42 }
 0xcf9   : > { %5392 = vrsqrt.f32 %v2947_v43  ;;  %vm2957_vm5 = vweird.f32 %v2947_v43 }
 0xcff   : > { %v5393_v44 = vpop.eup %5392 }
 0xd00   : > { %v2952_v45 = vmul.f32 %v5393_v44, %v2947_v43  ;;  %vm2958_vm4 = vweird.f32 %v5393_v44 }
 0xd01   : > { %vm2959_vm8 = vmor %vm2957_vm5, %vm2958_vm4 }
 0xd02   : > { %v2953_v47 = vmul.f32 %v5393_v44, %v2952_v45 }
 0xd04   : > { %v2954_v30 = vmul.f32 0.5, %v2953_v47 }
 0xd06   : > { %v2955_v48 = vsub.f32 1.5, %v2954_v30 }
 0xd08   : > { %v2956_v32 = vmul.f32 %v5393_v44, %v2955_v48 }
 0xd0a   : > { %v2960_v49 = vsel %vm2959_vm8, %v5393_v44, %v2956_v32 }
 0xd0b   : > { %v2991_v50 = vmul.f32 %v2960_v49, %v2923_v20 }
 0xd0c   : > { %v2942_v52 = vpop.xlane.xlu1 %2941  ;;  %v2936_v53 = vpop.xlane.xlu2 %2935 }
 0xd0d   : > { %v2946_v54 = vmul.f32 %v2942_v52, %v6178_v17  ;;  %v2944_v55 = vmul.f32 %v2936_v53, %v6178_v17  ;;  %v2999_v56 = vmul.f32 %v5368_v34, %v2991_v50 }
 0xd0f   : > { %v2950_v57 = vadd.f32 1e-05, %v2946_v54  ;;  %v2948_v59 = vadd.f32 1e-05, %v2944_v55  ;;  %v3007_v60 = vadd.f32 %v5369_v51, %v2999_v56 }
 0xd11   : > { %5394 = vrsqrt.f32 %v2950_v57  ;;  %v3011_v61 = vmax.f32 %v3007_v60, 0.0  ;;  %vm2987_vm3 = vweird.f32 %v2950_v57  ;;  %vm2967_vm4 = vweird.f32 %v2948_v59 }
 0xd12   : > { %5396 = vrsqrt.f32 %v2948_v59 }
 0xd13   : > { %v3019_v62 = vpack.c.bf16 %v3011_v61, %v3011_v61 }
 0xd14   : > { %v2939_v63 = vpop.xlane.xlu2 %2938 }
 0xd15   : > { %v2945_v0 = vmul.f32 %v2939_v63, %v6178_v17  ;;  %3027 = vrot.lane.b32.xlu2 %v3019_v62, %s6859_s27 }
 0xd17   : > { %v5395_v1 = vpop.eup %5394  ;;  %v2949_v2 = vadd.f32 1e-05, %v2945_v0 }
 0xd18   : > { %v5397_v3 = vpop.eup %5396  ;;  %v2982_v4 = vmul.f32 %v5395_v1, %v2950_v57  ;;  %vm2988_vm7 = vweird.f32 %v5395_v1 }
 0xd19   : > { %v2962_v5 = vmul.f32 %v5397_v3, %v2948_v59  ;;  %5398 = vrsqrt.f32 %v2949_v2  ;;  %vm2968_vm14 = vweird.f32 %v5397_v3  ;;  %vm2989_vm11 = vmor %vm2987_vm3, %vm2988_vm7  ;;  %vm2977_vm10 = vweird.f32 %v2949_v2 }
 0xd1a   : > { %v2983_v6 = vmul.f32 %v5395_v1, %v2982_v4  ;;  %vm2969_vm5 = vmor %vm2967_vm4, %vm2968_vm14  ;;  %vm3044_vm7 = vcmask 1043720   ;;  %vm6913_vm3 = vcmask 1022976   ;;  %vm6915_vm4 = vcmask 973824  }
 0xd1b   : > { %v2963_v7 = vmul.f32 %v5397_v3, %v2962_v5 }
 0xd1c   : > { %v2984_v8 = vmul.f32 0.5, %v2983_v6 }
 0xd1d   : > { %v2964_v9 = vmul.f32 0.5, %v2963_v7 }
 0xd1e   : > { %v2985_v10 = vsub.f32 1.5, %v2984_v8 }
 0xd1f   : > { %v5399_v11 = vpop.eup %5398  ;;  %v2965_v12 = vsub.f32 1.5, %v2964_v9 }
 0xd20   : > { %v2986_v13 = vmul.f32 %v5395_v1, %v2985_v10  ;;  %v2972_v14 = vmul.f32 %v5399_v11, %v2949_v2  ;;  %vm2978_vm8 = vweird.f32 %v5399_v11 }
 0xd21   : > { %v2966_v15 = vmul.f32 %v5397_v3, %v2965_v12  ;;  %vm2979_vm15 = vmor %vm2977_vm10, %vm2978_vm8  ;;  %vm3039_vm10 = vcmask 265224  }
 0xd22   : > { %v2990_v16 = vsel %vm2989_vm11, %v5395_v1, %v2986_v13  ;;  %v2973_v18 = vmul.f32 %v5399_v11, %v2972_v14  ;;  %vm6914_vm11 = vcmask 957440   ;;  %vm6917_vm8 = vmmov %vm6913_vm3 }
 0xd23   : > { %v2970_v19 = vsel %vm2969_vm5, %v5397_v3, %v2966_v15  ;;  %v2994_v22 = vmul.f32 %v2990_v16, %v6187_v31  ;;  %vm6916_vm5 = vmmov %vm6914_vm11 }
 0xd24   : > { %v2974_v20 = vmul.f32 0.5, %v2973_v18  ;;  %v2992_v21 = vmul.f32 %v2970_v19, %v6185_v28 }
 0xd25   : > { %v3002_v26 = vmul.f32 %v5368_v34, %v2994_v22 }
 0xd26   : > { %v2975_v23 = vsub.f32 1.5, %v2974_v20  ;;  %v3000_v58 = vmul.f32 %v5368_v34, %v2992_v21 }
 0xd27   : > { %v3010_v38 = vadd.f32 %v5369_v51, %v3002_v26 }
 0xd28   : > { %v2976_v24 = vmul.f32 %v5399_v11, %v2975_v23  ;;  %v3008_v25 = vadd.f32 %v5369_v51, %v3000_v58 }
 0xd29   : > { %v3014_v40 = vmax.f32 %v3010_v38, 0.0 }
 0xd2a   : > { %v2980_v27 = vsel %vm2979_vm15, %v5399_v11, %v2976_v24  ;;  %v3012_v33 = vmax.f32 %v3008_v25, 0.0  ;;  %vm6910_vm15 = vcmask 1047556  }
 0xd2b   : > { %v2993_v35 = vmul.f32 %v2980_v27, %v6193_v36  ;;  %v3022_v42 = vpack.c.bf16 %v3014_v40, %v3014_v40  ;;  %vm6218_vm14 = vmor %vm6910_vm15, %vm3044_vm7 }
 0xd2c   : > { %v3020_v37 = vpack.c.bf16 %v3012_v33, %v3012_v33  ;;  %vm6918_vm7 = vmmov %vm6916_vm5 }
 0xd2d   : > { %v3001_v39 = vmul.f32 %v5368_v34, %v2993_v35  ;;  %vm6920_vm15 = vmmov %vm6915_vm4 }
 0xd2e   : > { %3029 = vrot.lane.b32.xlu0 %v3020_v37, %s6859_s27 }
 0xd2f   : > { %v3009_v28 = vadd.f32 %v5369_v51, %v3001_v39 }
 0xd31   : > { %v3013_v31 = vmax.f32 %v3009_v28, 0.0 }
 0xd33   : > { %v3021_v41 = vpack.c.bf16 %v3013_v31, %v3013_v31 }
 0xd35   : > { %3031 = vrot.lane.b32.xlu1 %v3021_v41, %s6859_s27 }
 0xd36   : > { %3033 = vrot.lane.b32.xlu0 %v3022_v42, %s6859_s27  ;;  %s6937_s27 = sld [smem:[#allocation36_spill]] }
 0xd6f   : > { %v3028_v36 = vpop.permute.xlu2 %3027 }
 0xd70   : > { %3040 = vst.msk [vmem:[#allocation2] sm:$0xf] %vm3039_vm10, %v3028_v36 }
 0xd71   : > { %3046 = vst.msk [vmem:[#allocation2] sm:$0xff] %vm6218_vm14, %v5481_v29 }
 0xd78   : > { %v6226_v44 = vld [vmem:[#allocation2] sm:$0xff] }
 0xd79   : > { %3258 = vrot.lane.b32.xlu0 %v6226_v44, %s6861_s10  ;;  %3226 = vrot.lane.b32.xlu1 %v6226_v44, %s6862_s2 }
 0xd7a   : > { %3194 = vrot.lane.b32.xlu2 %v6226_v44, %s6851_s11 }
 0xd81   : > { %3162 = vrot.lane.b32.xlu0 %v6226_v44, %s6863_s0  ;;  %3354 = vrot.lane.b32.xlu1 %v6226_v44, %s6852_s5 }
 0xd82   : > { %3130 = vrot.lane.b32.xlu2 %v6226_v44, %s6850_s7 }
 0xd89   : > { %3386 = vrot.lane.b32.xlu0 %v6226_v44, %s6868_s29  ;;  %3322 = vrot.lane.b32.xlu1 %v6226_v44, %s6854_s8 }
 0xd8a   : > { %3098 = vrot.lane.b32.xlu2 %v6226_v44, %s6866_s1 }
 0xd91   : > { %3514 = vrot.lane.b32.xlu0 %v6226_v44, %s6860_s9 }
 0xda0   : > { %v3030_v45 = vpop.permute.xlu0 %3029 }
 0xda1   : > { %3041 = vst.msk [vmem:[#allocation2 + $0x8] sm:$0xf] %vm3039_vm10, %v3030_v45 }
 0xda2   : > { %3047 = vst.msk [vmem:[#allocation2 + $0x8] sm:$0xff] %vm6218_vm14, %v5481_v29 }
 0xda7   : > { %v3032_v47 = vpop.permute.xlu1 %3031 }
 0xda8   : > { %v3034_v30 = vpop.permute.xlu0 %3033  ;;  %3042 = vst.msk [vmem:[#allocation2 + $0x10] sm:$0xf] %vm3039_vm10, %v3032_v47 }
 0xda9   : > { %3043 = vst.msk [vmem:[#allocation2 + $0x18] sm:$0xf] %vm3039_vm10, %v3034_v30  ;;  %v6254_v48 = vld [vmem:[#allocation2 + $0x8] sm:$0xff]  ;;  %vm6919_vm10 = vcmask 1039360  }
 0xdaa   : > { %3049 = vst.msk [vmem:[#allocation2 + $0x18] sm:$0xff] %vm6218_vm14, %v5481_v29  ;;  %3260 = vrot.lane.b32.xlu1 %v6254_v48, %s6861_s10  ;;  %3196 = vrot.lane.b32.xlu0 %v6254_v48, %s6851_s11 }
 0xdab   : > { %3048 = vst.msk [vmem:[#allocation2 + $0x10] sm:$0xff] %vm6218_vm14, %v5481_v29  ;;  %3228 = vrot.lane.b32.xlu2 %v6254_v48, %s6862_s2  ;;  %vm6921_vm14 = vcmask 932864  }
 0xdb1   : > { %v3053_v32 = vld [vmem:[#allocation2 + $0x18] sm:$0xf] }
 0xdb2   : > { %3057 = vst [vmem:[#allocation3 + $0xc] sm:$0xf] %v3053_v32  ;;  %v3052_v34 = vld [vmem:[#allocation2 + $0x10] sm:$0xf]  ;;  %3164 = vrot.lane.b32.xlu1 %v6254_v48, %s6863_s0  ;;  %3132 = vrot.lane.b32.xlu0 %v6254_v48, %s6850_s7  ;;  %v6300_v51 = vld [vmem:[#allocation2 + $0x18] sm:$0xff] }
 0xdb3   : > { %3056 = vst [vmem:[#allocation3 + $0x8] sm:$0xf] %v3052_v34  ;;  %3356 = vrot.lane.b32.xlu2 %v6254_v48, %s6852_s5  ;;  %v6274_v49 = vld [vmem:[#allocation2 + $0x10] sm:$0xff] }
 0xdba   : > { %3388 = vrot.lane.b32.xlu1 %v6254_v48, %s6868_s29  ;;  %3100 = vrot.lane.b32.xlu0 %v6254_v48, %s6866_s1 }
 0xdbb   : > { %3230 = vrot.lane.b32.xlu2 %v6274_v49, %s6862_s2 }
 0xdc2   : > { %3516 = vrot.lane.b32.xlu1 %v6254_v48, %s6860_s9  ;;  %3198 = vrot.lane.b32.xlu0 %v6274_v49, %s6851_s11 }
 0xdc3   : > { %3390 = vrot.lane.b32.xlu2 %v6274_v49, %s6868_s29 }
 0xdca   : > { %3262 = vrot.lane.b32.xlu1 %v6274_v49, %s6861_s10  ;;  %3518 = vrot.lane.b32.xlu0 %v6274_v49, %s6860_s9 }
 0xdcb   : > { %3102 = vrot.lane.b32.xlu2 %v6274_v49, %s6866_s1 }
 0xdd2   : > { %3166 = vrot.lane.b32.xlu1 %v6274_v49, %s6863_s0  ;;  %3486 = vrot.lane.b32.xlu0 %v6274_v49, %s6864_s6 }
 0xdd3   : > { %3070 = vrot.lane.b32.xlu2 %v6274_v49, %s6867_s3 }
 0xdd4   : > { %v3195_v29 = vpop.permute.xlu2 %3194 }
 0xdd5   : > { %v3202_v50 = vrot.slane %v3195_v29, 4 }
 0xdd7   : > { %v3206_v52 = vsel %vm1307_vm2, %v3195_v29, %v3202_v50 }
 0xdd8   : > { %3214 = vst [vmem:[#allocation3 + $0x50] sm:$0xf] %v3206_v52 }
 0xdda   : > { %3134 = vrot.lane.b32.xlu1 %v6274_v49, %s6850_s7  ;;  %3232 = vrot.lane.b32.xlu0 %v6300_v51, %s6862_s2  ;;  %s6973_s2 = sld [smem:[#allocation38_spill]] }
 0xddb   : > { %3264 = vrot.lane.b32.xlu2 %v6300_v51, %s6861_s10 }
 0xddc   : > { %v3131_v53 = vpop.permute.xlu2 %3130 }
 0xddd   : > { %v3138_v54 = vrot.slane %v3131_v53, 4 }
 0xddf   : > { %v3142_v55 = vsel %vm6913_vm3, %v3131_v53, %v3138_v54 }
 0xde0   : > { %3150 = vst [vmem:[#allocation3 + $0x30] sm:$0xf] %v3142_v55 }
 0xde2   : > { %3358 = vrot.lane.b32.xlu1 %v6274_v49, %s6852_s5  ;;  %3482 = vrot.lane.b32.xlu0 %v6226_v44, %s6864_s6 }
 0xde3   : > { %3324 = vrot.lane.b32.xlu2 %v6254_v48, %s6854_s8 }
 0xde4   : > { %v3099_v56 = vpop.permute.xlu2 %3098 }
 0xde5   : > { %v3106_v57 = vrot.slane %v3099_v56, 4 }
 0xde7   : > { %v3110_v59 = vsel %vm1256_vm9, %v3099_v56, %v3106_v57 }
 0xde8   : > { %3118 = vst [vmem:[#allocation3 + $0x20] sm:$0xf] %v3110_v59 }
 0xdea   : > { %3326 = vrot.lane.b32.xlu1 %v6274_v49, %s6854_s8  ;;  %3068 = vrot.lane.b32.xlu0 %v6254_v48, %s6867_s3 }
 0xdeb   : > { %3066 = vrot.lane.b32.xlu2 %v6226_v44, %s6867_s3  ;;  %v3259_v60 = vpop.permute.xlu0 %3258  ;;  %v3227_v61 = vpop.permute.xlu1 %3226 }
 0xdec   : > { %v3266_v62 = vrot.slane %v3259_v60, 4  ;;  %v3234_v63 = vrot.slane %v3227_v61, 4 }
 0xdee   : > { %v3270_v0 = vsel %vm1341_vm0, %v3259_v60, %v3266_v62  ;;  %v3238_v1 = vsel %vm1324_vm13, %v3227_v61, %v3234_v63 }
 0xdef   : > { %3278 = vst [vmem:[#allocation3 + $0x70] sm:$0xf] %v3270_v0 }
 0xdf0   : > { %3246 = vst [vmem:[#allocation3 + $0x60] sm:$0xf] %v3238_v1 }
 0xdf2   : > { %3200 = vrot.lane.b32.xlu1 %v6300_v51, %s6851_s11  ;;  %3454 = vrot.lane.b32.xlu0 %v6274_v49, %s6865_s30  ;;  %s5436_s11 = scalar_lea.hbm %s6978_s21, 2 }
 0xdf3   : > { %3168 = vrot.lane.b32.xlu2 %v6300_v51, %s6863_s0  ;;  %v3163_v2 = vpop.permute.xlu0 %3162  ;;  %v3355_v3 = vpop.permute.xlu1 %3354  ;;  %s6975_s0 = sld [smem:[#allocation8_spill]] }
 0xdf4   : > { %v3170_v4 = vrot.slane %v3163_v2, 4  ;;  %v3362_v5 = vrot.slane %v3355_v3, 4 }
 0xdf6   : > { %v3174_v6 = vsel %vm1290_vm1, %v3163_v2, %v3170_v4  ;;  %v3366_v7 = vsel %vm1392_vm6, %v3355_v3, %v3362_v5 }
 0xdf7   : > { %3182 = vst [vmem:[#allocation3 + $0x40] sm:$0xf] %v3174_v6 }
 0xdf8   : > { %3374 = vst [vmem:[#allocation3 + $0xa0] sm:$0xf] %v3366_v7 }
 0xdfa   : > { %3484 = vrot.lane.b32.xlu1 %v6254_v48, %s6864_s6  ;;  %3392 = vrot.lane.b32.xlu0 %v6300_v51, %s6868_s29  ;;  %s6972_s29 = sld [smem:[#allocation34_spill]] }
 0xdfb   : > { %3290 = vrot.lane.b32.xlu2 %v6226_v44, %s6869_s4  ;;  %v3387_v8 = vpop.permute.xlu0 %3386  ;;  %v3323_v9 = vpop.permute.xlu1 %3322 }
 0xdfc   : > { %v3394_v10 = vrot.slane %v3387_v8, 4  ;;  %v3330_v11 = vrot.slane %v3323_v9, 4 }
 0xdfe   : > { %v3398_v12 = vsel %vm6914_vm11, %v3387_v8, %v3394_v10  ;;  %v3334_v13 = vsel %vm6915_vm4, %v3323_v9, %v3330_v11  ;;  %vm6923_vm11 = vmmov %vm6921_vm14  ;;  %vm6924_vm4 = vcmask 982016  }
 0xdff   : > { %3406 = vst [vmem:[#allocation3 + $0xb0] sm:$0xf] %v3398_v12 }
 0xe00   : > { %3342 = vst [vmem:[#allocation3 + $0x90] sm:$0xf] %v3334_v13 }
 0xe02   : > { %3294 = vrot.lane.b32.xlu1 %v6274_v49, %s6869_s4  ;;  %3292 = vrot.lane.b32.xlu0 %v6254_v48, %s6869_s4 }
 0xe03   : > { %3136 = vrot.lane.b32.xlu2 %v6300_v51, %s6850_s7  ;;  %v3515_v14 = vpop.permute.xlu0 %3514  ;;  %s6935_s7 = sld [smem:[#allocation31_spill]] }
 0xe04   : > { %v3522_v15 = vrot.slane %v3515_v14, 4 }
 0xe05   : > { %v3229_v16 = vpop.permute.xlu2 %3228 }
 0xe06   : > { %v3235_v18 = vrot.slane %v3229_v16, 4  ;;  %v3526_v19 = vsel %vm1477_vm12, %v3515_v14, %v3522_v15 }
 0xe07   : > { %3534 = vst [vmem:[#allocation3 + $0xf0] sm:$0xf] %v3526_v19 }
 0xe08   : > { %v3239_v20 = vsel %vm1324_vm13, %v3229_v16, %v3235_v18 }
 0xe09   : > { %3247 = vst [vmem:[#allocation3 + $0x64] sm:$0xf] %v3239_v20 }
 0xe0a   : > { %3450 = vrot.lane.b32.xlu1 %v6226_v44, %s6865_s30  ;;  %3104 = vrot.lane.b32.xlu0 %v6300_v51, %s6866_s1 }
 0xe0b   : > { %3360 = vrot.lane.b32.xlu2 %v6300_v51, %s6852_s5  ;;  %s6971_s5 = sld [smem:[#allocation37_spill]] }
 0xe0d   : > { %v3357_v21 = vpop.permute.xlu2 %3356 }
 0xe0e   : > { %v3363_v22 = vrot.slane %v3357_v21, 4 }
 0xe10   : > { %v3367_v23 = vsel %vm1392_vm6, %v3357_v21, %v3363_v22 }
 0xe11   : > { %3375 = vst [vmem:[#allocation3 + $0xa4] sm:$0xf] %v3367_v23 }
 0xe12   : > { %3520 = vrot.lane.b32.xlu1 %v6300_v51, %s6860_s9  ;;  %3072 = vrot.lane.b32.xlu0 %v6300_v51, %s6867_s3 }
 0xe13   : > { %3328 = vrot.lane.b32.xlu2 %v6300_v51, %s6854_s8 }
 0xe15   : > { %v3231_v58 = vpop.permute.xlu2 %3230 }
 0xe16   : > { %v3236_v24 = vrot.slane %v3231_v58, 4 }
 0xe18   : > { %v3240_v25 = vsel %vm1324_vm13, %v3231_v58, %v3236_v24 }
 0xe19   : > { %3248 = vst [vmem:[#allocation3 + $0x68] sm:$0xf] %v3240_v25 }
 0xe1a   : > { %3488 = vrot.lane.b32.xlu1 %v6300_v51, %s6864_s6  ;;  %3422 = vrot.lane.b32.xlu0 %v6274_v49, %s6853_s28  ;;  %s6977_s6 = sld [smem:[#allocation11_spill]] }
 0xe1b   : > { %3296 = vrot.lane.b32.xlu2 %v6300_v51, %s6869_s4  ;;  %s6970_s4 = sld [smem:[#allocation33_spill]] }
 0xe1c   : > { %v3261_v26 = vpop.permute.xlu1 %3260  ;;  %v3197_v27 = vpop.permute.xlu0 %3196 }
 0xe1d   : > { %v3267_v33 = vrot.slane %v3261_v26, 4  ;;  %v3203_v35 = vrot.slane %v3197_v27, 4  ;;  %v3391_v37 = vpop.permute.xlu2 %3390 }
 0xe1e   : > { %v3396_v38 = vrot.slane %v3391_v37, 4 }
 0xe1f   : > { %v3271_v39 = vsel %vm1341_vm0, %v3261_v26, %v3267_v33  ;;  %v3207_v28 = vsel %vm1307_vm2, %v3197_v27, %v3203_v35 }
 0xe20   : > { %3279 = vst [vmem:[#allocation3 + $0x74] sm:$0xf] %v3271_v39  ;;  %v3400_v40 = vsel %vm6916_vm5, %v3391_v37, %v3396_v38  ;;  %vm6927_vm5 = vmmov %vm6913_vm3  ;;  %s4380_s12 = scalar_lea.hbm %s6978_s21, %s6977_s6 }
 0xe21   : > { %3215 = vst [vmem:[#allocation3 + $0x54] sm:$0xf] %v3207_v28  ;;  %s4384_s23 = sshll.u32 %s4380_s12, 4  ;;  %s4385_s23 = int_to_ptr.hbm [resolvable:$true] %s4384_s23 }
 0xe22   : > { %3408 = vst [vmem:[#allocation3 + $0xb8] sm:$0xf] %v3400_v40  ;;  %3456 = vrot.lane.b32.xlu1 %v6300_v51, %s6865_s30  ;;  %3420 = vrot.lane.b32.xlu0 %v6254_v48, %s6853_s28  ;;  %s5430_s3 = sshra.s32 %s4385_s23, 4  ;;  %s5431_s3 = int_to_ptr.hbm [resolvable:$true] %s5430_s3 }
 0xe23   : > { %3452 = vrot.lane.b32.xlu2 %v6254_v48, %s6865_s30  ;;  %s6949_s30 = sld [smem:[#allocation35_spill]]  ;;  %p5437_p0 = scmp.lt.s32.totalorder %s5431_s3, %s6978_s21 }
 0xe24   : > { %v3165_v31 = vpop.permute.xlu1 %3164  ;;  %v3133_v41 = vpop.permute.xlu0 %3132 }
 0xe25   : > { %v3171_v42 = vrot.slane %v3165_v31, 4  ;;  %v3139_v43 = vrot.slane %v3133_v41, 4  ;;  %v3103_v36 = vpop.permute.xlu2 %3102 }
 0xe26   : > { %v3108_v45 = vrot.slane %v3103_v36, 4 }
 0xe27   : > { %v3175_v47 = vsel %vm1290_vm1, %v3165_v31, %v3171_v42  ;;  %v3143_v30 = vsel %vm6917_vm8, %v3133_v41, %v3139_v43  ;;  %v5269_v20 = vld [vmem:[#allocation3 + $0x70] sm:$0xff]  ;;  %vm6928_vm8 = vcmask 941056  }
 0xe28   : > { %3183 = vst [vmem:[#allocation3 + $0x44] sm:$0xf] %v3175_v47  ;;  %v3112_v32 = vsel %vm1256_vm9, %v3103_v36, %v3108_v45  ;;  %v5267_v47 = vld [vmem:[#allocation3 + $0x60] sm:$0xff] }
 0xe29   : > { %3151 = vst [vmem:[#allocation3 + $0x34] sm:$0xf] %v3143_v30  ;;  %s6950_s1 = smov %s6949_s30 }
 0xe2a   : > { %3120 = vst [vmem:[#allocation3 + $0x28] sm:$0xf] %v3112_v32  ;;  %3424 = vrot.lane.b32.xlu1 %v6300_v51, %s6853_s28 }
 0xe2b   : > { %3418 = vrot.lane.b32.xlu2 %v6226_v44, %s6853_s28  ;;  %s6936_s28 = smov %s6935_s7 }
 0xe2c   : > { %v3389_v48 = vpop.permute.xlu1 %3388  ;;  %v3101_v34 = vpop.permute.xlu0 %3100 }
 0xe2d   : > { %v3395_v49 = vrot.slane %v3389_v48, 4  ;;  %v3107_v29 = vrot.slane %v3101_v34, 4  ;;  %v3071_v50 = vpop.permute.xlu2 %3070 }
 0xe2e   : > { %v3076_v52 = vrot.slane %v3071_v50, 4 }
 0xe2f   : > { %v3399_v53 = vsel %vm6918_vm7, %v3389_v48, %v3395_v49  ;;  %v3111_v54 = vsel %vm1256_vm9, %v3101_v34, %v3107_v29  ;;  %vm6929_vm7 = vmmov %vm6923_vm11 }
 0xe30   : > { %3407 = vst [vmem:[#allocation3 + $0xb4] sm:$0xf] %v3399_v53  ;;  %v3080_v55 = vsel %vm6919_vm10, %v3071_v50, %v3076_v52 }
 0xe31   : > { %3119 = vst [vmem:[#allocation3 + $0x24] sm:$0xf] %v3111_v54 }
 0xe32   : > { %3088 = vst [vmem:[#allocation3 + $0x18] sm:$0xf] %v3080_v55 }
 0xe34   : > { %v3517_v56 = vpop.permute.xlu1 %3516  ;;  %v3199_v51 = vpop.permute.xlu0 %3198 }
 0xe35   : > { %v3523_v57 = vrot.slane %v3517_v56, 4  ;;  %v3204_v59 = vrot.slane %v3199_v51, 4  ;;  %v3265_v44 = vpop.permute.xlu2 %3264 }
 0xe36   : > { %v3269_v60 = vrot.slane %v3265_v44, 4 }
 0xe37   : > { %v3527_v61 = vsel %vm1477_vm12, %v3517_v56, %v3523_v57  ;;  %v3208_v62 = vsel %vm1307_vm2, %v3199_v51, %v3204_v59 }
 0xe38   : > { %3535 = vst [vmem:[#allocation3 + $0xf4] sm:$0xf] %v3527_v61  ;;  %v3273_v63 = vsel %vm1341_vm0, %v3265_v44, %v3269_v60 }
 0xe39   : > { %3216 = vst [vmem:[#allocation3 + $0x58] sm:$0xf] %v3208_v62 }
 0xe3a   : > { %3281 = vst [vmem:[#allocation3 + $0x7c] sm:$0xf] %v3273_v63 }
 0xe3c   : > { %v3263_v0 = vpop.permute.xlu1 %3262  ;;  %v3519_v1 = vpop.permute.xlu0 %3518 }
 0xe3d   : > { %v3268_v2 = vrot.slane %v3263_v0, 4  ;;  %v3524_v3 = vrot.slane %v3519_v1, 4  ;;  %v3325_v4 = vpop.permute.xlu2 %3324 }
 0xe3e   : > { %v3331_v5 = vrot.slane %v3325_v4, 4 }
 0xe3f   : > { %v3272_v6 = vsel %vm1341_vm0, %v3263_v0, %v3268_v2  ;;  %v3528_v7 = vsel %vm1477_vm12, %v3519_v1, %v3524_v3  ;;  %vm6922_vm0 = vmmov %vm6919_vm10  ;;  %v5261_v2 = vld [vmem:[#allocation3 + $0x30] sm:$0xff]  ;;  %vm6930_vm10 = vcmask 957440  }
 0xe40   : > { %3280 = vst [vmem:[#allocation3 + $0x78] sm:$0xf] %v3272_v6  ;;  %v3335_v8 = vsel %vm6920_vm15, %v3325_v4, %v3331_v5 }
 0xe41   : > { %3536 = vst [vmem:[#allocation3 + $0xf8] sm:$0xf] %v3528_v7 }
 0xe42   : > { %3343 = vst [vmem:[#allocation3 + $0x94] sm:$0xf] %v3335_v8  ;;  %v5265_v8 = vld [vmem:[#allocation3 + $0x50] sm:$0xff] }
 0xe44   : > { %v3167_v9 = vpop.permute.xlu1 %3166  ;;  %v3487_v10 = vpop.permute.xlu0 %3486 }
 0xe45   : > { %v3172_v11 = vrot.slane %v3167_v9, 4  ;;  %v3492_v12 = vrot.slane %v3487_v10, 4  ;;  %v3067_v13 = vpop.permute.xlu2 %3066 }
 0xe46   : > { %v3074_v14 = vrot.slane %v3067_v13, 4 }
 0xe47   : > { %v3176_v15 = vsel %vm1290_vm1, %v3167_v9, %v3172_v11  ;;  %v3496_v16 = vsel %vm6921_vm14, %v3487_v10, %v3492_v12  ;;  %v5270_v18 = vld [vmem:[#allocation3 + $0x78] sm:$0xff]  ;;  %vm6934_vm14 = vmmov %vm6924_vm4 }
 0xe48   : > { %3184 = vst [vmem:[#allocation3 + $0x48] sm:$0xf] %v3176_v15  ;;  %v3078_v19 = vsel %vm6922_vm0, %v3067_v13, %v3074_v14  ;;  %3861 = vmatpush.bf16.msrb.mxu2 %v5270_v18  ;;  %v3050_v14 = vld [vmem:[#allocation2] sm:$0xf] }
 0xe49   : > { %3504 = vst [vmem:[#allocation3 + $0xe8] sm:$0xf] %v3496_v16  ;;  %v3051_v16 = vld [vmem:[#allocation2 + $0x8] sm:$0xf] }
 0xe4a   : > { %3086 = vst [vmem:[#allocation3 + $0x10] sm:$0xf] %v3078_v19 }
 0xe4b   : > { %3054 = vst [vmem:[#allocation3] sm:$0xf] %v3050_v14 }
 0xe4c   : > { %v3135_v21 = vpop.permute.xlu1 %3134  ;;  %v3233_v22 = vpop.permute.xlu0 %3232  ;;  %3862 = vmatpush.bf16.msrb.mxu2 %v5269_v20  ;;  %3055 = vst [vmem:[#allocation3 + $0x4] sm:$0xf] %v3051_v16 }
 0xe4d   : > { %v3140_v23 = vrot.slane %v3135_v21, 4  ;;  %v3237_v58 = vrot.slane %v3233_v22, 4  ;;  %v3169_v24 = vpop.permute.xlu2 %3168 }
 0xe4e   : > { %v3173_v25 = vrot.slane %v3169_v24, 4 }
 0xe4f   : > { %v3144_v26 = vsel %vm6913_vm3, %v3135_v21, %v3140_v23  ;;  %v3241_v27 = vsel %vm1324_vm13, %v3233_v22, %v3237_v58  ;;  %vm6925_vm13 = vmmov %vm6920_vm15  ;;  %v5247_v23 = vld [vmem:[%s6935_s7 + $0x4] sm:$0xf]  ;;  %v4905_v58 = vld [vmem:[%s6936_s28 + $0x10] sm:$0xf0]  ;;  %s5432_s7 = scalar_lea.hbm %s5431_s3, 1 }
 0xe50   : > { %3152 = vst [vmem:[#allocation3 + $0x38] sm:$0xf] %v3144_v26  ;;  %v3177_v33 = vsel %vm1290_vm1, %v3169_v24, %v3173_v25  ;;  %vm6926_vm1 = vmmov %vm6922_vm0  ;;  %v5298_v24 = vld [vmem:[%s6937_s27 + $0x18] sm:$0xff]  ;;  %v5263_v25 = vld [vmem:[#allocation3 + $0x40] sm:$0xff]  ;;  %p5433_p11 = scmp.ne.s32.totalorder %s5431_s3, %s5432_s7  ;;  %p5438_p1 = scmp.lt.s32.totalorder %s5436_s11, %s5432_s7 }
 0xe51   : > { %3249 = vst [vmem:[#allocation3 + $0x6c] sm:$0xf] %v3241_v27  ;;  %vm6933_vm15 = vmmov %vm6924_vm4 }
 0xe52   : > { %3185 = vst [vmem:[#allocation3 + $0x4c] sm:$0xf] %v3177_v33  ;;  %v5277_v33 = vld [vmem:[#allocation3 + $0xb0] sm:$0xff]  ;;  %vm6938_vm0 = vmmov %vm6928_vm8  ;;  %p5434_p12 = pnand %p5433_p11, %p5678_p5  ;;  %p5439_p2 = por %p5438_p1, %p5437_p0 }
 0xe53   : > { %vm6939_vm3 = vmmov %vm6938_vm0 }
 0xe54   : > { %v3359_v35 = vpop.permute.xlu1 %3358  ;;  %v3483_v37 = vpop.permute.xlu0 %3482  ;;  %p5435_p13 = pneg %p5434_p12 }
 0xe55   : > { %v3364_v38 = vrot.slane %v3359_v35, 4  ;;  %v3490_v39 = vrot.slane %v3483_v37, 4  ;;  %v3291_v28 = vpop.permute.xlu2 %3290 }
 0xe56   : > { %v3298_v40 = vrot.slane %v3291_v28, 4  ;;  %p5440_p3 = pnand %p5439_p2, %p5435_p13 }
 0xe57   : > { %v3368_v31 = vsel %vm1392_vm6, %v3359_v35, %v3364_v38  ;;  %v3494_v41 = vsel %vm6923_vm11, %v3483_v37, %v3490_v39  ;;  %v4908_v35 = vor.u32 %v5247_v23, %v4905_v58  ;;  %vm6941_vm11 = vcmask 949248  }
 0xe58   : > { %3376 = vst [vmem:[#allocation3 + $0xa8] sm:$0xf] %v3368_v31  ;;  %v3302_v42 = vsel %vm6924_vm4, %v3291_v28, %v3298_v40  ;;  %v5268_v43 = vld [vmem:[#allocation3 + $0x68] sm:$0xff]  ;;  %v5297_v40 = vld [vmem:[%s6937_s27 + $0x10] sm:$0xff] }
 0xe59   : > { %3502 = vst [vmem:[#allocation3 + $0xe0] sm:$0xf] %v3494_v41  ;;  %3863 = vmatpush.bf16.msrb.mxu2 %v5268_v43  ;;  %v5264_v20 = vld [vmem:[#allocation3 + $0x48] sm:$0xff] }
 0xe5a   : > { %3310 = vst [vmem:[#allocation3 + $0x80] sm:$0xf] %v3302_v42 }
 0xe5c   : > { %v3327_v36 = vpop.permute.xlu1 %3326  ;;  %v3069_v45 = vpop.permute.xlu0 %3068 }
 0xe5d   : > { %v3332_v30 = vrot.slane %v3327_v36, 4  ;;  %v3075_v32 = vrot.slane %v3069_v45, 4  ;;  %v3137_v48 = vpop.permute.xlu2 %3136  ;;  %3864 = vmatpush.bf16.msrb.mxu2 %v5267_v47 }
 0xe5e   : > { %v3141_v34 = vrot.slane %v3137_v48, 4 }
 0xe5f   : > { %v3336_v49 = vsel %vm6925_vm13, %v3327_v36, %v3332_v30  ;;  %v3079_v29 = vsel %vm6926_vm1, %v3069_v45, %v3075_v32  ;;  %v5296_v36 = vld [vmem:[%s6937_s27 + $0x8] sm:$0xff]  ;;  %v5275_v30 = vld [vmem:[#allocation3 + $0xa0] sm:$0xff] }
 0xe60   : > { %3344 = vst [vmem:[#allocation3 + $0x98] sm:$0xf] %v3336_v49  ;;  %v3145_v50 = vsel %vm6927_vm5, %v3137_v48, %v3141_v34 }
 0xe61   : > { %3087 = vst [vmem:[#allocation3 + $0x14] sm:$0xf] %v3079_v29 }
 0xe62   : > { %3153 = vst [vmem:[#allocation3 + $0x3c] sm:$0xf] %v3145_v50 }
 0xe64   : > { %v3201_v52 = vpop.permute.xlu1 %3200  ;;  %v3455_v53 = vpop.permute.xlu0 %3454 }
 0xe65   : > { %v3205_v54 = vrot.slane %v3201_v52, 4  ;;  %v3460_v55 = vrot.slane %v3455_v53, 4  ;;  %v3361_v56 = vpop.permute.xlu2 %3360 }
 0xe66   : > { %v3365_v51 = vrot.slane %v3361_v56, 4 }
 0xe67   : > { %v3209_v57 = vsel %vm1307_vm2, %v3201_v52, %v3205_v54  ;;  %v3464_v59 = vsel %vm6928_vm8, %v3455_v53, %v3460_v55  ;;  %vm6931_vm2 = vmmov %vm6925_vm13  ;;  %v5295_v52 = vld [vmem:[%s6937_s27] sm:$0xff]  ;;  %vm6947_vm8 = vcmask 523264  }
 0xe68   : > { %3217 = vst [vmem:[#allocation3 + $0x5c] sm:$0xf] %v3209_v57  ;;  %v3369_v44 = vsel %vm1392_vm6, %v3361_v56, %v3365_v51  ;;  %vm6932_vm6 = vmmov %vm6924_vm4  ;;  %v5251_v56 = vld [vmem:[%s6936_s28 + $0x24] sm:$0xf]  ;;  %v4921_v51 = vld [vmem:[%s6936_s28 + $0x30] sm:$0xf0] }
 0xe69   : > { %3472 = vst [vmem:[#allocation3 + $0xd8] sm:$0xf] %v3464_v59  ;;  %v5262_v60 = vld [vmem:[#allocation3 + $0x38] sm:$0xff]  ;;  %v5259_v59 = vld [vmem:[#allocation3 + $0x20] sm:$0xff]  ;;  %vm6943_vm4 = vmmov %vm6941_vm11 }
 0xe6a   : > { %3377 = vst [vmem:[#allocation3 + $0xac] sm:$0xf] %v3369_v44  ;;  %3842 = vmatpush.bf16.msrb.mxu1 %v5262_v60  ;;  %v5273_v44 = vld [vmem:[#allocation3 + $0x90] sm:$0xff]  ;;  %v4924_v60 = vor.u32 %v5251_v56, %v4921_v51  ;;  %vm6944_vm13 = vmmov %vm6938_vm0 }
 0xe6c   : > { %v3485_v61 = vpop.permute.xlu1 %3484  ;;  %v3393_v62 = vpop.permute.xlu0 %3392 }
 0xe6d   : > { %v3491_v63 = vrot.slane %v3485_v61, 4  ;;  %v3397_v0 = vrot.slane %v3393_v62, 4  ;;  %v3329_v1 = vpop.permute.xlu2 %3328 }
 0xe6e   : > { %v3333_v3 = vrot.slane %v3329_v1, 4  ;;  %3843 = vmatpush.bf16.msrb.mxu1 %v5261_v2 }
 0xe6f   : > { %v3495_v4 = vsel %vm6929_vm7, %v3485_v61, %v3491_v63  ;;  %v3401_v5 = vsel %vm6930_vm10, %v3393_v62, %v3397_v0  ;;  %v5266_v6 = vld [vmem:[#allocation3 + $0x58] sm:$0xff]  ;;  %vm6951_vm10 = vcmask 261120  }
 0xe70   : > { %3503 = vst [vmem:[#allocation3 + $0xe4] sm:$0xf] %v3495_v4  ;;  %v3337_v7 = vsel %vm6931_vm2, %v3329_v1, %v3333_v3  ;;  %3865 = vmatpush.bf16.msrb.mxu2 %v5266_v6  ;;  %v5250_v6 = vld [vmem:[%s6936_s28 + $0x14] sm:$0xf0]  ;;  %vm6952_vm2 = vmmov %vm6951_vm10 }
 0xe71   : > { %3409 = vst [vmem:[#allocation3 + $0xbc] sm:$0xf] %v3401_v5  ;;  %v5276_v42 = vld [vmem:[#allocation3 + $0xa8] sm:$0xff] }
 0xe72   : > { %3345 = vst [vmem:[#allocation3 + $0x9c] sm:$0xf] %v3337_v7  ;;  %v4911_v5 = vld [vmem:[%s6936_s28 + $0x8] sm:$0xf]  ;;  %v5285_v7 = vld [vmem:[#allocation3 + $0xf0] sm:$0xff] }
 0xe74   : > { %v3295_v9 = vpop.permute.xlu1 %3294  ;;  %v3293_v10 = vpop.permute.xlu0 %3292  ;;  %3866 = vmatpush.bf16.msrb.mxu2 %v5265_v8 }
 0xe75   : > { %v3300_v11 = vrot.slane %v3295_v9, 4  ;;  %v3299_v12 = vrot.slane %v3293_v10, 4  ;;  %v3297_v13 = vpop.permute.xlu2 %3296 }
 0xe76   : > { %v3301_v15 = vrot.slane %v3297_v13, 4 }
 0xe77   : > { %v3304_v18 = vsel %vm6932_vm6, %v3295_v9, %v3300_v11  ;;  %v3303_v19 = vsel %vm6933_vm15, %v3293_v10, %v3299_v12  ;;  %v5257_v9 = vld [vmem:[#allocation3 + $0x10] sm:$0xff]  ;;  %v5283_v23 = vld [vmem:[#allocation3 + $0xe0] sm:$0xff]  ;;  %vm6953_vm6 = vmmov %vm6952_vm2 }
 0xe78   : > { %3312 = vst [vmem:[#allocation3 + $0x88] sm:$0xf] %v3304_v18  ;;  %v5278_v21 = vld [vmem:[#allocation3 + $0xb8] sm:$0xff]  ;;  %v3305_v22 = vsel %vm6934_vm14, %v3297_v13, %v3301_v15  ;;  %3867 = vmatpush.bf16.msrb.mxu2 %v5264_v20  ;;  %v4912_v13 = vor.u32 %v5250_v6, %v4911_v5  ;;  %v5256_v15 = vld [vmem:[#allocation3 + $0x8] sm:$0xff]  ;;  %v5255_v20 = vld [vmem:[#allocation3] sm:$0xff] }
 0xe79   : > { %3311 = vst [vmem:[#allocation3 + $0x84] sm:$0xf] %v3303_v19  ;;  %3880 = vmatpush.bf16.msrb.mxu3 %v5278_v21  ;;  %v5274_v54 = vld [vmem:[#allocation3 + $0x98] sm:$0xff]  ;;  %v4903_v21 = vld [vmem:[%s6936_s28] sm:$0xf]  ;;  %vm6954_vm15 = vmmov %vm6952_vm2 }
 0xe7a   : > { %3313 = vst [vmem:[#allocation3 + $0x8c] sm:$0xf] %v3305_v22  ;;  %v5249_v22 = vld [vmem:[%s6936_s28 + $0xc] sm:$0xf0]  ;;  %vm6955_vm14 = vmmov %vm6952_vm2 }
 0xe7c   : > { %v3451_v26 = vpop.permute.xlu1 %3450  ;;  %v3105_v27 = vpop.permute.xlu0 %3104  ;;  %3868 = vmatpush.bf16.msrb.mxu2 %v5263_v25  ;;  %v4904_v25 = vor.u32 %v5249_v22, %v4903_v21 }
 0xe7d   : > { %v3458_v37 = vrot.slane %v3451_v26, 4  ;;  %v3109_v38 = vrot.slane %v3105_v27, 4  ;;  %v3453_v39 = vpop.permute.xlu2 %3452  ;;  %3881 = vmatpush.bf16.msrb.mxu3 %v5277_v33  ;;  %v4927_v33 = vld [vmem:[%s6936_s28 + $0x28] sm:$0xf] }
 0xe7e   : > { %v3459_v28 = vrot.slane %v3453_v39, 4 }
 0xe7f   : > { %v3462_v31 = vsel %vm6938_vm0, %v3451_v26, %v3458_v37  ;;  %v3113_v41 = vsel %vm1256_vm9, %v3105_v27, %v3109_v38  ;;  %3869 = vmatmul.bf16.vlgmr.msrb.gmra.mxu2 %v4908_v35  ;;  %vm6940_vm9 = vmmov %vm6926_vm1  ;;  %v5254_v35 = vld [vmem:[%s6936_s28 + $0x34] sm:$0xf0] }
 0xe80   : > { %4149 = vmatpush.bf16.msra.mxu2 %v5298_v24  ;;  %3470 = vst [vmem:[#allocation3 + $0xd0] sm:$0xf] %v3462_v31  ;;  %v3463_v43 = vsel %vm6939_vm3, %v3453_v39, %v3459_v28  ;;  %v5271_v10 = vld [vmem:[#allocation3 + $0x80] sm:$0xff]  ;;  %vm6945_vm1 = vmmov %vm6943_vm4  ;;  %v4928_v38 = vor.u32 %v5254_v35, %v4927_v33  ;;  %v4913_v28 = vld [vmem:[%s6936_s28 + $0x18] sm:$0xf0] }
 0xe81   : > { %3121 = vst [vmem:[#allocation3 + $0x2c] sm:$0xf] %v3113_v41  ;;  %3882 = vmatpush.bf16.msrb.mxu3 %v5276_v42  ;;  %v5272_v4 = vld [vmem:[#allocation3 + $0x88] sm:$0xff]  ;;  %vm6946_vm5 = vmmov %vm6945_vm1  ;;  %v5253_v31 = vld [vmem:[%s6936_s28 + $0x2c] sm:$0xf0] }
 0xe82   : > { %3471 = vst [vmem:[#allocation3 + $0xd4] sm:$0xf] %v3463_v43  ;;  %vm6956_vm0 = vmmov %vm6952_vm2 }
 0xe83   : > { %vm6957_vm3 = vmmov %vm6956_vm0 }
 0xe84   : > { %4150 = vmatpush.bf16.msra.mxu2 %v5297_v40  ;;  %v3521_v45 = vpop.permute.xlu1 %3520  ;;  %v3073_v47 = vpop.permute.xlu0 %3072  ;;  %v4919_v40 = vld [vmem:[%s6936_s28 + $0x20] sm:$0xf] }
 0xe85   : > { %v3525_v32 = vrot.slane %v3521_v45, 4  ;;  %v3077_v48 = vrot.slane %v3073_v47, 4  ;;  %v3419_v34 = vpop.permute.xlu2 %3418  ;;  %3883 = vmatpush.bf16.msrb.mxu3 %v5275_v30  ;;  %v4920_v43 = vor.u32 %v5253_v31, %v4919_v40  ;;  %v5294_v30 = vld [vmem:[%s6948_s19 + $0x38] sm:$0xff] }
 0xe86   : > { %v3426_v49 = vrot.slane %v3419_v34, 4 }
 0xe87   : > { %v3529_v29 = vsel %vm1477_vm12, %v3521_v45, %v3525_v32  ;;  %v3081_v50 = vsel %vm6940_vm9, %v3073_v47, %v3077_v48  ;;  %vm6942_vm12 = vmmov %vm6929_vm7  ;;  %v4929_v45 = vld [vmem:[%s6936_s28 + $0x38] sm:$0xf0]  ;;  %v5293_v32 = vld [vmem:[%s6948_s19 + $0x30] sm:$0xff]  ;;  %vm4174_vm7 = vcmask 130048  }
 0xe88   : > { %4151 = vmatpush.bf16.msra.mxu2 %v5296_v36  ;;  %3537 = vst [vmem:[#allocation3 + $0xfc] sm:$0xf] %v3529_v29  ;;  %v5260_v53 = vld [vmem:[#allocation3 + $0x28] sm:$0xff]  ;;  %v3430_v55 = vsel %vm6941_vm11, %v3419_v34, %v3426_v49  ;;  %v5291_v49 = vld [vmem:[%s6948_s19 + $0x20] sm:$0xff]  ;;  %v5290_v29 = vld [vmem:[%s6948_s19 + $0x18] sm:$0xff] }
 0xe89   : > { %3089 = vst [vmem:[#allocation3 + $0x1c] sm:$0xf] %v3081_v50  ;;  %3844 = vmatpush.bf16.msrb.mxu1 %v5260_v53  ;;  %3884 = vmatpush.bf16.msrb.mxu3 %v5274_v54  ;;  %v5281_v37 = vld [vmem:[#allocation3 + $0xd0] sm:$0xff]  ;;  %v5252_v36 = vld [vmem:[%s6936_s28 + $0x2c] sm:$0xf]  ;;  %vm6958_vm9 = vmmov %vm6956_vm0 }
 0xe8a   : > { %3438 = vst [vmem:[#allocation3 + $0xc0] sm:$0xf] %v3430_v55  ;;  %v4932_v47 = vor.u32 %v5252_v36, %v4929_v45  ;;  %v5292_v48 = vld [vmem:[%s6948_s19 + $0x28] sm:$0xff]  ;;  %v5287_v55 = vld [vmem:[%s6948_s19] sm:$0xff]  ;;  %vm6959_vm11 = vmmov %vm6956_vm0 }
 0xe8b   : > { %v5288_v53 = vld [vmem:[%s6948_s19 + $0x8] sm:$0xff] }
 0xe8c   : > { %4152 = vmatpush.bf16.msra.mxu2 %v5295_v52  ;;  %v3489_v57 = vpop.permute.xlu1 %3488  ;;  %v3423_v61 = vpop.permute.xlu0 %3422  ;;  %v5289_v52 = vld [vmem:[%s6948_s19 + $0x10] sm:$0xff] }
 0xe8d   : > { %v3493_v62 = vrot.slane %v3489_v57, 4  ;;  %v3428_v63 = vrot.slane %v3423_v61, 4  ;;  %3845 = vmatpush.bf16.msrb.mxu1 %v5259_v59  ;;  %3885 = vmatpush.bf16.msrb.mxu3 %v5273_v44 }
 0xe8f   : > { %v3497_v0 = vsel %vm6942_vm12, %v3489_v57, %v3493_v62  ;;  %v5286_v1 = vld [vmem:[#allocation3 + $0xf8] sm:$0xff]  ;;  %v3432_v2 = vsel %vm6943_vm4, %v3423_v61, %v3428_v63  ;;  %3874 = vmatmul.bf16.gmra.mxu2 %v4924_v60  ;;  %vm6960_vm12 = vmmov %vm6956_vm0 }
 0xe90   : > { %3505 = vst [vmem:[#allocation3 + $0xec] sm:$0xf] %v3497_v0  ;;  %v5258_v3 = vld [vmem:[#allocation3 + $0x18] sm:$0xff]  ;;  %3899 = vmatpush.bf16.msra.mxu0 %v5286_v1  ;;  %v5299_v0 = vld [vmem:[%s6949_s30] sm:$0xff]  ;;  %vm6961_vm4 = vmmov %vm6956_vm0  ;;  %s809_s30 = sand.u32 1, %s6975_s0  }
 0xe91   : > { %3440 = vst [vmem:[#allocation3 + $0xc8] sm:$0xf] %v3432_v2  ;;  %3846 = vmatpush.bf16.msrb.mxu1 %v5258_v3  ;;  %3886 = vmatpush.bf16.msrb.mxu3 %v5272_v4  ;;  %s810_s17 = scalar_lea.vmem [#allocation4], %s809_s30 }
 0xe92   : > { %s4382_s18 = sshll.u32 %s810_s17, 4  ;;  %s4383_s18 = int_to_ptr.vmem [resolvable:$true] %s4382_s18 }
 0xe94   : > { %v3457_v8 = vpop.permute.xlu1 %3456  ;;  %v3421_v11 = vpop.permute.xlu0 %3420  ;;  %3900 = vmatpush.bf16.msra.mxu0 %v5285_v7 }
 0xe95   : > { %v3461_v12 = vrot.slane %v3457_v8, 4  ;;  %v3427_v14 = vrot.slane %v3421_v11, 4  ;;  %3847 = vmatpush.bf16.msrb.mxu1 %v5257_v9  ;;  %3887 = vmatpush.bf16.msrb.mxu3 %v5271_v10 }
 0xe97   : > { %v3465_v16 = vsel %vm6944_vm13, %v3457_v8, %v3461_v12  ;;  %v5284_v18 = vld [vmem:[#allocation3 + $0xe8] sm:$0xff]  ;;  %v3431_v19 = vsel %vm6945_vm1, %v3421_v11, %v3427_v14  ;;  %vm6962_vm13 = vmmov %vm6956_vm0 }
 0xe98   : > { %3473 = vst [vmem:[#allocation3 + $0xdc] sm:$0xf] %v3465_v16  ;;  %3901 = vmatpush.bf16.msra.mxu0 %v5284_v18  ;;  %3888 = vmatmul.bf16.vlgmr.msrb.gmra.mxu3 %v4912_v13  ;;  %v5300_v13 = vld [vmem:[%s6950_s1 + $0x8] sm:$0xff]  ;;  %vm6963_vm1 = vmmov %vm6956_vm0 }
 0xe99   : > { %3439 = vst [vmem:[#allocation3 + $0xc4] sm:$0xf] %v3431_v19  ;;  %3848 = vmatpush.bf16.msrb.mxu1 %v5256_v15 }
 0xe9c   : > { %v3425_v58 = vpop.permute.xlu1 %3424  ;;  %3902 = vmatpush.bf16.msra.mxu0 %v5283_v23 }
 0xe9d   : > { %v3429_v24 = vrot.slane %v3425_v58, 4  ;;  %3849 = vmatpush.bf16.msrb.mxu1 %v5255_v20 }
 0xe9f   : > { %v3433_v26 = vsel %vm6946_vm5, %v3425_v58, %v3429_v24  ;;  %v5282_v27 = vld [vmem:[#allocation3 + $0xd8] sm:$0xff]  ;;  %5109 = vmatmul.msk.bf16.vlgmr.msra.gmra.mxu2 %vm6947_vm8, %v6052_v46  ;;  %v5248_v46 = vld [vmem:[%s6936_s28 + $0xc] sm:$0xf]  ;;  %vm6964_vm5 = vmmov %vm6956_vm0 }
 0xea0   : > { %3441 = vst [vmem:[#allocation3 + $0xcc] sm:$0xf] %v3433_v26  ;;  %3850 = vmatmul.bf16.vlgmr.msrb.gmra.mxu1 %v4904_v25  ;;  %3903 = vmatpush.bf16.msra.mxu0 %v5282_v27  ;;  %v5279_v41 = vld [vmem:[#allocation3 + $0xc0] sm:$0xff]  ;;  %v4916_v42 = vor.u32 %v5248_v46, %v4913_v28  ;;  %vm6965_vm8 = vmmov %vm6956_vm0 }
 0xea1   : > { %3984 = vmatpush.bf16.msra.mxu1 %v5294_v30 }
 0xea4   : > { %3904 = vmatpush.bf16.msra.mxu0 %v5281_v37 }
 0xea5   : > { %3985 = vmatpush.bf16.msra.mxu1 %v5293_v32 }
 0xea7   : > { %v5280_v39 = vld [vmem:[#allocation3 + $0xc8] sm:$0xff] }
 0xea8   : > { %3905 = vmatpush.bf16.msra.mxu0 %v5280_v39  ;;  %3893 = vmatmul.bf16.gmra.mxu3 %v4928_v38 }
 0xea9   : > { %3986 = vmatpush.bf16.msra.mxu1 %v5292_v48 }
 0xeac   : > { %3906 = vmatpush.bf16.msra.mxu0 %v5279_v41 }
 0xead   : > { %3987 = vmatpush.bf16.msra.mxu1 %v5291_v49 }
 0xeaf   : > { %3907 = vmatmul.bf16.vlgmr.msra.gmra.mxu0 %v4916_v42 }
 0xeb0   : > { %3855 = vmatmul.bf16.gmra.mxu1 %v4920_v43 }
 0xeb1   : > { %3988 = vmatpush.bf16.msra.mxu1 %v5290_v29 }
 0xeb5   : > { %3989 = vmatpush.bf16.msra.mxu1 %v5289_v52 }
 0xeb9   : > { %3990 = vmatpush.bf16.msra.mxu1 %v5288_v53 }
 0xebd   : > { %3991 = vmatpush.bf16.msra.mxu1 %v5287_v55 }
 0xebf   : > { %3912 = vmatmul.bf16.gmra.mxu0 %v4932_v47 }
 0xf02   : > { %v3870_v34 = vpop.f32.mrf.mxu2 }
 0xf0a   : > { %v3872_v50 = vpop.f32.mrf.mxu2 }
 0xf12   : > { %v3875_v54 = vpop.f32.mrf.mxu2 }
 0xf1a   : > { %v3877_v56 = vpop.f32.mrf.mxu2 }
 0xf1b   : > { %v3889_v57 = vpop.f32.mrf.mxu3 }
 0xf1d   : > { %v3851_v51 = vpop.f32.mrf.mxu1 }
 0xf1e   : > { %v3871_v1 = vadd.f32 %v3870_v34, %v3851_v51 }
 0xf20   : > { %v3890_v4 = vadd.f32 %v3889_v57, %v3871_v1 }
 0xf22   : > { %v4154_v59 = vpop.f32.mrf.mxu2 }
 0xf23   : > { %v3891_v62 = vpop.f32.mrf.mxu3 }
 0xf25   : > { %v3853_v44 = vpop.f32.mrf.mxu1 }
 0xf26   : > { %v3873_v2 = vadd.f32 %v3872_v50, %v3853_v44 }
 0xf28   : > { %v3892_v5 = vadd.f32 %v3891_v62, %v3873_v2 }
 0xf2a   : > { %v4156_v60 = vpop.f32.mrf.mxu2 }
 0xf2b   : > { %v4163_v61 = vpack.c.bf16 %v4156_v60, %v4154_v59  ;;  %v3894_v9 = vpop.f32.mrf.mxu3 }
 0xf2c   : > { %v3908_v63 = vpop.f32.mrf.mxu0 }
 0xf2d   : > { %4188 = vmatpush.bf16.msra.mxu3 %v4163_v61  ;;  %v3856_v3 = vpop.f32.mrf.mxu1  ;;  %v3909_v7 = vadd.f32 %v3908_v63, %v3890_v4 }
 0xf2e   : > { %v3876_v14 = vadd.f32 %v3875_v54, %v3856_v3 }
 0xf30   : > { %5118 = vmatmul.msk.bf16.vlgmr.msra.gmra.mxu3 %vm4174_vm7, %v5299_v0  ;;  %v3895_v18 = vadd.f32 %v3894_v9, %v3876_v14 }
 0xf33   : > { %v3896_v16 = vpop.f32.mrf.mxu3 }
 0xf34   : > { %v3910_v6 = vpop.f32.mrf.mxu0 }
 0xf35   : > { %v3911_v8 = vadd.f32 %v3910_v6, %v3892_v5  ;;  %v3858_v11 = vpop.f32.mrf.mxu1 }
 0xf36   : > { %v3878_v15 = vadd.f32 %v3877_v56, %v3858_v11 }
 0xf37   : > { %v3918_v10 = vpack.c.bf16 %v3911_v8, %v3909_v7 }
 0xf38   : > { %v3897_v19 = vadd.f32 %v3896_v16, %v3878_v15 }
 0xf39   : > { %3992 = vmatmul.bf16.vlgmr.msra.gmra.mxu1 %v3918_v10 }
 0xf3c   : > { %v3913_v12 = vpop.f32.mrf.mxu0 }
 0xf3d   : > { %v3914_v21 = vadd.f32 %v3913_v12, %v3895_v18 }
 0xf40   : > { %5119 = vmatmul.msk.bf16.gmra.mxu3 %vm4174_vm7, %v5300_v13 }
 0xf44   : > { %v3915_v20 = vpop.f32.mrf.mxu0 }
 0xf45   : > { %v3916_v22 = vadd.f32 %v3915_v20, %v3897_v19 }
 0xf47   : > { %v3919_v23 = vpack.c.bf16 %v3916_v22, %v3914_v21 }
 0xf49   : > { %3997 = vmatmul.bf16.gmra.mxu1 %v3919_v23  ;;  %v5302_v23 = vld [vmem:[%s6967_s13 + $0x8] sm:$0xff] }
 0xf4a   : > { %4342 = vmatpush.bf16.msrb.mxu2 %v5302_v23 }
 0xfb3   : > { %v4190_v58 = vpop.f32.mrf.mxu3 }
 0xfb4   : > { %v4200_v24 = vsel %vm6951_vm10, %v4190_v58, 0.0  ;;  %vm6966_vm10 = vmmov %vm6956_vm0 }
 0xfb5   : > { %4201 = vadd.xlane.f32.xlu0 %v4200_v24 }
 0xfb6   : > { %v3993_v25 = vpop.f32.mrf.mxu1 }
 0xfb7   : > { %v4003_v26 = vsel %vm6952_vm2, %v3993_v25, 0.0 }
 0xfb8   : > { %4004 = vadd.xlane.f32.xlu1 %v4003_v26  ;;  %v5301_v26 = vld [vmem:[%s6967_s13] sm:$0xff] }
 0xfb9   : > { %4343 = vmatpush.bf16.msrb.mxu2 %v5301_v26 }
 0xfbb   : > { %v4192_v27 = vpop.f32.mrf.mxu3 }
 0xfbc   : > { %v4203_v35 = vsel %vm6953_vm6, %v4192_v27, 0.0 }
 0xfbe   : > { %v3995_v33 = vpop.f32.mrf.mxu1 }
 0xfbf   : > { %v4006_v37 = vsel %vm6954_vm15, %v3995_v33, 0.0 }
 0xfc0   : > { %4204 = vadd.xlane.f32.xlu1 %v4203_v35  ;;  %4007 = vadd.xlane.f32.xlu2 %v4006_v37 }
 0xfc3   : > { %v4195_v38 = vpop.f32.mrf.mxu3 }
 0xfc4   : > { %v4206_v39 = vsel %vm6955_vm14, %v4195_v38, 0.0 }
 0xfc6   : > { %v3998_v46 = vpop.f32.mrf.mxu1 }
 0xfc7   : > { %v4009_v28 = vsel %vm6956_vm0, %v3998_v46, 0.0 }
 0xfc8   : > { %4207 = vadd.xlane.f32.xlu1 %v4206_v39  ;;  %4010 = vadd.xlane.f32.xlu2 %v4009_v28 }
 0xfcb   : > { %v4197_v40 = vpop.f32.mrf.mxu3 }
 0xfcc   : > { %v4209_v42 = vsel %vm6958_vm9, %v4197_v40, 0.0 }
 0xfce   : > { %v4000_v31 = vpop.f32.mrf.mxu1 }
 0xfcf   : > { %v4012_v41 = vsel %vm6957_vm3, %v4000_v31, 0.0 }
 0xfd0   : > { %4210 = vadd.xlane.f32.xlu2 %v4209_v42  ;;  %4013 = vadd.xlane.f32.xlu0 %v4012_v41 }
0x1028   : > { %v4202_v43 = vpop.xlane.xlu0 %4201 }
0x1029   : > { %v4212_v36 = vmul.f32 %v4202_v43, %v6178_v17 }
0x102b   : > { %v6529_v45 = vsub.f32 %v4190_v58, %v4212_v36  ;;  %v4005_v47 = vpop.xlane.xlu1 %4004 }
0x102c   : > { %v4015_v30 = vmul.f32 %v4005_v47, %v6178_v17 }
0x102d   : > { %v4220_v32 = vmul.f32 %v6529_v45, %v6529_v45 }
0x102e   : > { %v6534_v48 = vsub.f32 %v3993_v25, %v4015_v30 }
0x102f   : > { %v4224_v34 = vsel %vm6959_vm11, %v4220_v32, 0.0 }
0x1030   : > { %4225 = vadd.xlane.f32.xlu2 %v4224_v34  ;;  %v4023_v49 = vmul.f32 %v6534_v48, %v6534_v48 }
0x1032   : > { %v4027_v29 = vsel %vm6960_vm12, %v4023_v49, 0.0 }
0x1033   : > { %v4205_v50 = vpop.xlane.xlu1 %4204  ;;  %v4008_v52 = vpop.xlane.xlu2 %4007  ;;  %4028 = vadd.xlane.f32.xlu0 %v4027_v29 }
0x1034   : > { %v4213_v53 = vmul.f32 %v4205_v50, %v6178_v17  ;;  %v4016_v54 = vmul.f32 %v4008_v52, %v6178_v17 }
0x1036   : > { %v6542_v55 = vsub.f32 %v4192_v27, %v4213_v53  ;;  %v6544_v56 = vsub.f32 %v3995_v33, %v4016_v54 }
0x1038   : > { %v4024_v51 = vmul.f32 %v6544_v56, %v6544_v56  ;;  %v4221_v57 = vmul.f32 %v6542_v55, %v6542_v55 }
0x103a   : > { %v4030_v59 = vsel %vm6961_vm4, %v4024_v51, 0.0  ;;  %v4227_v44 = vsel %vm6962_vm13, %v4221_v57, 0.0 }
0x103b   : > { %v4208_v60 = vpop.xlane.xlu1 %4207  ;;  %4031 = vadd.xlane.f32.xlu1 %v4030_v59  ;;  %v4011_v61 = vpop.xlane.xlu2 %4010  ;;  %4228 = vadd.xlane.f32.xlu0 %v4227_v44 }
0x103c   : > { %v4214_v62 = vmul.f32 %v4208_v60, %v6178_v17  ;;  %v4017_v63 = vmul.f32 %v4011_v61, %v6178_v17  ;;  %v6607_v61 = vld [vmem:[%s6970_s4] ss:$0 sm:$0xff]  ;;  %s4372_s4 = scalar_lea.sflag [#allocation5], %s809_s30 }
0x103e   : > { %v6554_v0 = vsub.f32 %v4195_v38, %v4214_v62  ;;  %v6556_v1 = vsub.f32 %v3998_v46, %v4017_v63 }
0x1040   : > { %v4025_v2 = vmul.f32 %v6556_v1, %v6556_v1  ;;  %v4222_v3 = vmul.f32 %v6554_v0, %v6554_v0 }
0x1042   : > { %v4033_v4 = vsel %vm6963_vm1, %v4025_v2, 0.0  ;;  %v4230_v5 = vsel %vm6964_vm5, %v4222_v3, 0.0 }
0x1043   : > { %4034 = vadd.xlane.f32.xlu1 %v4033_v4  ;;  %v4211_v6 = vpop.xlane.xlu2 %4210  ;;  %4231 = vadd.xlane.f32.xlu0 %v4230_v5  ;;  %v4014_v7 = vpop.xlane.xlu0 %4013  ;;  %v6613_v5 = vld [vmem:[%s6971_s5] ss:$0 sm:$0xff] }
0x1044   : > { %v4215_v8 = vmul.f32 %v4211_v6, %v6178_v17  ;;  %v4018_v9 = vmul.f32 %v4014_v7, %v6178_v17 }
0x1046   : > { %v6566_v10 = vsub.f32 %v4197_v40, %v4215_v8  ;;  %v6568_v11 = vsub.f32 %v4000_v31, %v4018_v9 }
0x1048   : > { %v4223_v12 = vmul.f32 %v6566_v10, %v6566_v10  ;;  %v4026_v13 = vmul.f32 %v6568_v11, %v6568_v11 }
0x104a   : > { %v4233_v14 = vsel %vm6965_vm8, %v4223_v12, 0.0  ;;  %v4036_v15 = vsel %vm6966_vm10, %v4026_v13, 0.0 }
0x104b   : > { %4234 = vadd.xlane.f32.xlu1 %v4233_v14  ;;  %4037 = vadd.xlane.f32.xlu2 %v4036_v15 }
0x10a3   : > { %v4226_v16 = vpop.xlane.xlu2 %4225 }
0x10a4   : > { %v4236_v18 = vmul.f32 %v4226_v16, %v6178_v17 }
0x10a6   : > { %v4240_v19 = vadd.f32 1e-05, %v4236_v18  ;;  %v4029_v20 = vpop.xlane.xlu0 %4028 }
0x10a7   : > { %v4039_v21 = vmul.f32 %v4029_v20, %v6178_v17 }
0x10a8   : > { %5400 = vrsqrt.f32 %v4240_v19  ;;  %vm4250_vm15 = vweird.f32 %v4240_v19 }
0x10a9   : > { %v4043_v22 = vadd.f32 1e-05, %v4039_v21  ;;  %v6633_v21 = vld [vmem:[%s6973_s2] ss:$0 sm:$0xff] }
0x10ab   : > { %5402 = vrsqrt.f32 %v4043_v22  ;;  %vm4053_vm0 = vweird.f32 %v4043_v22 }
0x10ae   : > { %v5401_v58 = vpop.eup %5400  ;;  %v4032_v24 = vpop.xlane.xlu1 %4031 }
0x10af   : > { %v4229_v25 = vpop.xlane.xlu0 %4228  ;;  %v4245_v27 = vmul.f32 %v5401_v58, %v4240_v19  ;;  %v4040_v33 = vmul.f32 %v4032_v24, %v6178_v17  ;;  %vm4251_vm2 = vweird.f32 %v5401_v58 }
0x10b0   : > { %v4237_v35 = vmul.f32 %v4229_v25, %v6178_v17  ;;  %vm6595_vm14 = vmor %vm4250_vm15, %vm4251_vm2 }
0x10b1   : > { %v5403_v37 = vpop.eup %5402  ;;  %v4246_v38 = vmul.f32 %v5401_v58, %v4245_v27  ;;  %v4044_v39 = vadd.f32 1e-05, %v4040_v33 }
0x10b2   : > { %v6586_v46 = vadd.f32 1e-05, %v4237_v35  ;;  %v4048_v28 = vmul.f32 %v5403_v37, %v4043_v22  ;;  %vm4054_vm6 = vweird.f32 %v5403_v37 }
0x10b3   : > { %v4247_v40 = vmul.f32 0.5, %v4246_v38  ;;  %5404 = vrsqrt.f32 %v4044_v39  ;;  %vm4055_vm3 = vmor %vm4053_vm0, %vm4054_vm6  ;;  %vm4063_vm12 = vweird.f32 %v4044_v39 }
0x10b4   : > { %v4049_v31 = vmul.f32 %v5403_v37, %v4048_v28  ;;  %5406 = vrsqrt.f32 %v6586_v46  ;;  %vm4260_vm4 = vweird.f32 %v6586_v46 }
0x10b5   : > { %v4248_v41 = vsub.f32 1.5, %v4247_v40 }
0x10b6   : > { %v4050_v42 = vmul.f32 0.5, %v4049_v31  ;;  %v4035_v43 = vpop.xlane.xlu1 %4034 }
0x10b7   : > { %v4232_v36 = vpop.xlane.xlu0 %4231  ;;  %v4041_v47 = vmul.f32 %v4035_v43, %v6178_v17  ;;  %v4249_v32 = vmul.f32 %v5401_v58, %v4248_v41 }
0x10b8   : > { %v4238_v30 = vmul.f32 %v4232_v36, %v6178_v17  ;;  %v4051_v34 = vsub.f32 1.5, %v4050_v42 }
0x10b9   : > { %v5405_v49 = vpop.eup %5404  ;;  %v6591_v29 = vadd.f32 1e-05, %v4041_v47  ;;  %v4253_v59 = vsel %vm6595_vm14, %v5401_v58, %v4249_v32 }
0x10ba   : > { %v6593_v50 = vadd.f32 1e-05, %v4238_v30  ;;  %v5407_v52 = vpop.eup %5406  ;;  %v4052_v54 = vmul.f32 %v5403_v37, %v4051_v34  ;;  %v4058_v51 = vmul.f32 %v5405_v49, %v4044_v39  ;;  %v4284_v6 = vmul.f32 %v4253_v59, %v6529_v45 }
0x10bb   : > { %v4255_v57 = vmul.f32 %v5407_v52, %v6586_v46  ;;  %5408 = vrsqrt.f32 %v6591_v29  ;;  %vm4064_vm9 = vweird.f32 %v5405_v49  ;;  %vm4261_vm11 = vweird.f32 %v5407_v52 }
0x10bc   : > { %v4056_v44 = vsel %vm4055_vm3, %v5403_v37, %v4052_v54  ;;  %v4059_v60 = vmul.f32 %v5405_v49, %v4058_v51  ;;  %5410 = vrsqrt.f32 %v6593_v50  ;;  %v4292_v22 = vmul.f32 %v6613_v5, %v4284_v6  ;;  %vm4065_vm13 = vmor %vm4063_vm12, %vm4064_vm9 }
0x10bd   : > { %v4087_v62 = vmul.f32 %v4056_v44, %v6534_v48  ;;  %v4256_v63 = vmul.f32 %v5407_v52, %v4255_v57  ;;  %v6621_v48 = vld [vmem:[%s6972_s29] ss:$0 sm:$0xff]  ;;  %vm4262_vm1 = vmor %vm4260_vm4, %vm4261_vm11  ;;  %vm4073_vm10 = vweird.f32 %v6591_v29  ;;  %vm4270_vm6 = vweird.f32 %v6593_v50 }
0x10be   : > { %v4060_v2 = vmul.f32 0.5, %v4059_v60  ;;  %v4235_v3 = vpop.xlane.xlu1 %4234  ;;  %v4038_v4 = vpop.xlane.xlu2 %4037  ;;  %v4300_v39 = vadd.f32 %v6633_v21, %v4292_v22  ;;  %vm6974_vm9 = vcmask 261120  }
0x10bf   : > { %v4257_v7 = vmul.f32 0.5, %v4256_v63  ;;  %v4239_v8 = vmul.f32 %v4235_v3, %v6178_v17  ;;  %v4042_v9 = vmul.f32 %v4038_v4, %v6178_v17  ;;  %v4095_v14 = vmul.f32 %v6607_v61, %v4087_v62 }
0x10c0   : > { %v4061_v12 = vsub.f32 1.5, %v4060_v2 }
0x10c1   : > { %v5409_v13 = vpop.eup %5408  ;;  %v4258_v15 = vsub.f32 1.5, %v4257_v7  ;;  %v6624_v16 = vadd.f32 1e-05, %v4239_v8  ;;  %v6626_v45 = vadd.f32 1e-05, %v4042_v9  ;;  %v4103_v26 = vadd.f32 %v6621_v48, %v4095_v14 }
0x10c2   : > { %v5411_v18 = vpop.eup %5410  ;;  %v4062_v19 = vmul.f32 %v5405_v49, %v4061_v12  ;;  %v4068_v20 = vmul.f32 %v5409_v13, %v6591_v29  ;;  %vm4074_vm5 = vweird.f32 %v5409_v13 }
0x10c3   : > { %v4259_v23 = vmul.f32 %v5407_v52, %v4258_v15  ;;  %v4265_v58 = vmul.f32 %v5411_v18, %v6593_v50  ;;  %5412 = vrsqrt.f32 %v6624_v16  ;;  %vm4271_vm8 = vweird.f32 %v5411_v18  ;;  %vm4075_vm2 = vmor %vm4073_vm10, %vm4074_vm5 }
0x10c4   : > { %v4066_v24 = vsel %vm4065_vm13, %v5405_v49, %v4062_v19  ;;  %v4069_v25 = vmul.f32 %v5409_v13, %v4068_v20  ;;  %5414 = vrsqrt.f32 %v6626_v45  ;;  %vm4272_vm15 = vmor %vm4270_vm6, %vm4271_vm8  ;;  %vm4280_vm3 = vweird.f32 %v6624_v16 }
0x10c5   : > { %v4088_v27 = vmul.f32 %v4066_v24, %v6544_v56  ;;  %v4263_v33 = vsel %vm4262_vm1, %v5407_v52, %v4259_v23  ;;  %v4266_v35 = vmul.f32 %v5411_v18, %v4265_v58  ;;  %v4304_v56 = vadd.f32 %v4300_v39, %v4103_v26  ;;  %vm6976_vm13 = vmmov %vm6974_vm9 }
0x10c6   : > { %v4285_v37 = vmul.f32 %v4263_v33, %v6542_v55  ;;  %v4070_v38 = vmul.f32 0.5, %v4069_v25  ;;  %vm4083_vm12 = vweird.f32 %v6626_v45  ;;  %vm4369_vm1 = vcmask 122880  }
0x10c7   : > { %v4096_v46 = vmul.f32 %v6607_v61, %v4088_v27  ;;  %v4267_v28 = vmul.f32 0.5, %v4266_v35  ;;  %v4308_v57 = vmax.f32 %v4304_v56, 0.0 }
0x10c8   : > { %v4293_v40 = vmul.f32 %v6613_v5, %v4285_v37  ;;  %v4071_v31 = vsub.f32 1.5, %v4070_v38 }
0x10c9   : > { %v5413_v41 = vpop.eup %5412  ;;  %v4104_v42 = vadd.f32 %v6621_v48, %v4096_v46  ;;  %v4268_v43 = vsub.f32 1.5, %v4267_v28 }
0x10ca   : > { %v5415_v36 = vpop.eup %5414  ;;  %v4301_v47 = vadd.f32 %v6633_v21, %v4293_v40  ;;  %v4072_v55 = vmul.f32 %v5409_v13, %v4071_v31  ;;  %v4275_v30 = vmul.f32 %v5413_v41, %v6624_v16  ;;  %vm4281_vm14 = vweird.f32 %v5413_v41 }
0x10cb   : > { %v4269_v32 = vmul.f32 %v5411_v18, %v4268_v43  ;;  %v4078_v34 = vmul.f32 %v5415_v36, %v6626_v45  ;;  %vm4084_vm0 = vweird.f32 %v5415_v36  ;;  %vm4282_vm11 = vmor %vm4280_vm3, %vm4281_vm14 }
0x10cc   : > { %v4076_v49 = vsel %vm4075_vm2, %v5409_v13, %v4072_v55  ;;  %v4276_v52 = vmul.f32 %v5413_v41, %v4275_v30  ;;  %v4305_v53 = vadd.f32 %v4301_v47, %v4104_v42  ;;  %vm4085_vm4 = vmor %vm4083_vm12, %vm4084_vm0 }
0x10cd   : > { %v4273_v54 = vsel %vm4272_vm15, %v5411_v18, %v4269_v32  ;;  %v4079_v51 = vmul.f32 %v5415_v36, %v4078_v34  ;;  %v4089_v59 = vmul.f32 %v4076_v49, %v6556_v1 }
0x10ce   : > { %v4286_v44 = vmul.f32 %v4273_v54, %v6554_v0  ;;  %v4277_v29 = vmul.f32 0.5, %v4276_v52  ;;  %v4309_v60 = vmax.f32 %v4305_v53, 0.0 }
0x10cf   : > { %v4080_v62 = vmul.f32 0.5, %v4079_v51  ;;  %v4097_v4 = vmul.f32 %v6607_v61, %v4089_v59 }
0x10d0   : > { %v4278_v63 = vsub.f32 1.5, %v4277_v29  ;;  %v4312_v2 = vpack.c.bf16 %v4309_v60, %v4308_v57  ;;  %v4294_v6 = vmul.f32 %v6613_v5, %v4286_v44 }
0x10d1   : > { %v4081_v50 = vsub.f32 1.5, %v4080_v62  ;;  %v4105_v12 = vadd.f32 %v6621_v48, %v4097_v4 }
0x10d2   : > { %v4279_v3 = vmul.f32 %v5413_v41, %v4278_v63  ;;  %5128 = vmatmul.msk.bf16.vlgmr.msrb.gmra.mxu2 %vm6974_vm9, %v4312_v2  ;;  %v4302_v13 = vadd.f32 %v6633_v21, %v4294_v6 }
0x10d3   : > { %v4082_v1 = vmul.f32 %v5415_v36, %v4081_v50 }
0x10d4   : > { %v4283_v0 = vsel %vm4282_vm11, %v5413_v41, %v4279_v3  ;;  %v4306_v45 = vadd.f32 %v4302_v13, %v4105_v12 }
0x10d5   : > { %v4287_v7 = vmul.f32 %v4283_v0, %v6566_v10  ;;  %v4086_v8 = vsel %vm4085_vm4, %v5415_v36, %v4082_v1 }
0x10d6   : > { %v4090_v9 = vmul.f32 %v4086_v8, %v6568_v11  ;;  %v4310_v20 = vmax.f32 %v4306_v45, 0.0 }
0x10d7   : > { %v4295_v14 = vmul.f32 %v6613_v5, %v4287_v7 }
0x10d8   : > { %v4098_v15 = vmul.f32 %v6607_v61, %v4090_v9 }
0x10d9   : > { %v4303_v16 = vadd.f32 %v6633_v21, %v4295_v14 }
0x10da   : > { %v4106_v18 = vadd.f32 %v6621_v48, %v4098_v15 }
0x10dc   : > { %v4307_v19 = vadd.f32 %v4303_v16, %v4106_v18 }
0x10de   : > { %v4311_v22 = vmax.f32 %v4307_v19, 0.0 }
0x10e0   : > { %v4313_v10 = vpack.c.bf16 %v4311_v22, %v4310_v20 }
0x10e2   : > { %5129 = vmatmul.msk.bf16.gmra.mxu2 %vm6976_vm13, %v4313_v10 }
0x1155   : > { %v4345_v11 = vpop.f32.mrf.mxu2 }
0x1156   : > { %v4355_v61 = vsel %vm4174_vm7, %v4345_v11, 0.0 }
0x115d   : > { %v4347_v23 = vpop.f32.mrf.mxu2 }
0x115e   : > { %v4356_v5 = vsel %vm4174_vm7, %v4347_v23, 0.0 }
0x115f   : > { %v4357_v24 = vadd.f32 %v4356_v5, %v4355_v61 }
0x1165   : > { %v4350_v58 = vpop.f32.mrf.mxu2 }
0x1166   : > { %v4358_v21 = vsel %vm4174_vm7, %v4350_v58, 0.0 }
0x1167   : > { %v4359_v48 = vadd.f32 %v4358_v21, %v4357_v24 }
0x116d   : > { %v4352_v25 = vpop.f32.mrf.mxu2 }
0x116e   : > { %v4360_v26 = vsel %vm4174_vm7, %v4352_v25, 0.0 }
0x116f   : > { %v4361_v27 = vadd.f32 %v4360_v26, %v4359_v48 }
0x1171   : > { %v4362_v33 = vrot.slane %v4361_v27, 4 }
0x1173   : > { %v4363_v35 = vadd.f32 %v4362_v33, %v4361_v27 }
0x1175   : > { %v4364_v37 = vrot.slane %v4363_v35, 2 }
0x1177   : > { %v4365_v38 = vadd.f32 %v4364_v37, %v4363_v35 }
0x1179   : > { %v4366_v39 = vrot.slane %v4365_v38, 1 }
0x117b   : > { %v4367_v46 = vadd.f32 %v4366_v39, %v4365_v38 }
0x117d   : > { %v4368_v28 = vmul.f32 %v4367_v46, %v6178_v17 }
0x117f   : > { %4370 = vst.msk [vmem:[%s810_s17] sm:$0x1] %vm4369_vm1, %v4368_v28 }
0x1180   : > { %5443 = shalt.err (!%p5440_p3)
}
0x1181   : > { %5303 = dma.vmem_to_hbm [thread:$0]  (%p5678_p5), %s4383_s18, 16, %s4385_s23, %s4372_s4  }
0x1182 PF: > { %s6980_s10 = sld [smem:[#allocation10_spill]] }
0x1183   : > { %s6981_s2 = sld [smem:[#allocation7_spill]] }
0x1188   : > { %p5309_p4 = scmp.ge.s32.totalorder %s6980_s10, 2 }
0x1189   : > { %s4396_s6 = sand.u32 1, %s6981_s2  }
0x118a   : > { %p5306_p7 = pnand %p5309_p4, %p5682_p6  ;;  %s4397_s30 = scalar_lea.sflag [#allocation5], %s4396_s6 }
0x118c   : > { %p5307_p8 = pneg %p5306_p7 }
0x118e   : > { %5461 = dma.done.wait (%p5307_p8), %s4397_s30, 16  }
0x118f   : > { %5463 = vsyncadd (%p5307_p8), %s4397_s30, 4294967280  ;;  %s6983_s30 = sld [smem:[#allocation12_spill]] }
0x1190   : > { %s6984_s7 = sld [smem:[#allocation8_spill]] }
0x1191   : > { %s6985_s4 = sld [smem:[#allocation9_spill]] }
0x1192   : > { %s6986_s8 = sld [smem:[#allocation13_spill]] }
0x1195   : > { %p37_p9 = scmp.ge.s32.totalorder %s6983_s30, 4  }
0x1197   :  { %39 = sbr.rel (!%p37_p9) target bundleno = 29 (0x1d), region = 163 }
0x119c   :  { %4402 = vsyncpa [#allocation5], 1 }
0x119d   :  { %4404 = vsyncpa [#allocation5 + $0x1], 1 }

</bundles_post_ra>
